<compile_context>
chip_gen: v7x
topology: tpu7x:2x2x1
jax: 0.10.0
libtpu: 0.0.40
codegen_flags: <defaults>
</compile_context>

<pallas_src>
import functools

import jax
import jax.numpy as jnp
from jax.experimental import pallas as pl
from jax.experimental.pallas import tpu as pltpu


_COMPILER_PARAMS = pltpu.CompilerParams(
    dimension_semantics=("parallel",),
    vmem_limit_bytes=64 * 1024 * 1024,
)


def _round_up(x, m):
    return (x + m - 1) // m * m


# ----------------------------------------------------------------------------
# In-kernel Mish (f32):  mish(y) = y * tanh(softplus(y)) = y * n / (n + 2),
# with n = e^y (e^y + 2).  One EUP exp + one approx reciprocal.
# ----------------------------------------------------------------------------
def _mish(y):
    e = jnp.exp(jnp.minimum(y, 20.0))          # clamp: for y>20 mish(y)==y
    n = e * (e + 2.0)
    return y * n * pl.reciprocal(n + 2.0, approx=True)


# ----------------------------------------------------------------------------
# 1x1 conv kernels:  acc = x @ W (+ x2 @ W2)  ->  + bias  ->  Mish
# (BN scale already folded into W; accumulate in f32 on the MXU.)
# ----------------------------------------------------------------------------
def _mm_bn_mish_kernel(x_ref, w_ref, b_ref, o_ref):
    acc = jnp.dot(x_ref[...], w_ref[...], preferred_element_type=jnp.float32)
    o_ref[...] = _mish(acc + b_ref[...]).astype(o_ref.dtype)


def _mm2_bn_mish_kernel(a_ref, b_ref, wa_ref, wb_ref, bias_ref, o_ref):
    # Fused channel-concat + 1x1 conv:  [a, b] @ [Wa; Wb] == a@Wa + b@Wb.
    acc = jnp.dot(a_ref[...], wa_ref[...], preferred_element_type=jnp.float32)
    acc = acc + jnp.dot(b_ref[...], wb_ref[...], preferred_element_type=jnp.float32)
    o_ref[...] = _mish(acc + bias_ref[...]).astype(o_ref.dtype)


def conv1x1_bn_mish(x2d, w, bias, *, out_dtype, tm=512):
    """x2d: (M, Cin), w: (Cin, Cout) scale-folded, bias: (1, Cout) f32."""
    M, K = x2d.shape
    Cout = w.shape[-1]
    tm = min(tm, M)            # big M tiles (mem-bound roofline); full M if small
    grid = (pl.cdiv(M, tm),)   # ragged last tile handled by Pallas masking
    # TODO(synk): for production K*N, tile K ("arbitrary" axis + VMEM acc) or
    # use pipeline_mode=pl.Buffered(1) on the weight spec (v5e 16MiB / v7x 32MiB
    # default scoped VMEM).
    return pl.pallas_call(
        _mm_bn_mish_kernel,
        out_shape=jax.ShapeDtypeStruct((M, Cout), out_dtype),
        grid=grid,
        in_specs=[pl.BlockSpec((tm, K), lambda i: (i, 0)),
                  pl.BlockSpec((K, Cout), lambda i: (0, 0)),
                  pl.BlockSpec((1, Cout), lambda i: (0, 0))],
        out_specs=pl.BlockSpec((tm, Cout), lambda i: (i, 0)),
        compiler_params=_COMPILER_PARAMS,
    )(x2d, w, bias)


def concat_conv1x1_bn_mish(a2d, b2d, wa, wb, bias, *, out_dtype, tm=512):
    """Fused cat([a2d, b2d], -1) @ W  with W pre-split into (wa, wb)."""
    M, Ka = a2d.shape
    _, Kb = b2d.shape
    Cout = wa.shape[-1]
    tm = min(tm, M)
    grid = (pl.cdiv(M, tm),)
    return pl.pallas_call(
        _mm2_bn_mish_kernel,
        out_shape=jax.ShapeDtypeStruct((M, Cout), out_dtype),
        grid=grid,
        in_specs=[pl.BlockSpec((tm, Ka), lambda i: (i, 0)),
                  pl.BlockSpec((tm, Kb), lambda i: (i, 0)),
                  pl.BlockSpec((Ka, Cout), lambda i: (0, 0)),
                  pl.BlockSpec((Kb, Cout), lambda i: (0, 0)),
                  pl.BlockSpec((1, Cout), lambda i: (0, 0))],
        out_specs=pl.BlockSpec((tm, Cout), lambda i: (i, 0)),
        compiler_params=_COMPILER_PARAMS,
    )(a2d, b2d, wa, wb, bias)


# ----------------------------------------------------------------------------
# 3x3 conv kernel (no im2col): 9-tap shift-and-matmul over a phase-split,
# spatially padded input; folded-BN bias + Mish (+ optional residual) epilogue.
# Grid is over the batch; each step reads a (s*s, Hq, Wq, Cin) slab.
# ----------------------------------------------------------------------------
def _conv3x3_body(x_ref, w_ref, b_ref, r_ref, o_ref, *, stride, Ho, Wo_p):
    s = stride
    Cin = x_ref.shape[-1]
    Cout = o_ref.shape[-1]
    acc = jnp.zeros((Ho * Wo_p, Cout), jnp.float32)
    for kh in range(3):
        for kw in range(3):
            ph = (kh % s) * s + (kw % s)              # space-to-depth phase
            tap = x_ref[ph, pl.ds(kh // s, Ho), pl.ds(kw // s, Wo_p), :]
            # Wo_p is a multiple of 8 -> this flatten is layout-trivial (f32).
            tap = tap.astype(jnp.float32).reshape(Ho * Wo_p, Cin)
            acc = acc + jnp.dot(tap, w_ref[kh, kw, :, :],
                                preferred_element_type=jnp.float32)
    y = _mish(acc + b_ref[...])
    if r_ref is not None:                             # residual after Mish
        y = y + r_ref[...].astype(jnp.float32)
    o_ref[...] = y.astype(o_ref.dtype)


def _conv3x3_kernel(x_ref, w_ref, b_ref, o_ref, *, stride, Ho, Wo_p):
    _conv3x3_body(x_ref, w_ref, b_ref, None, o_ref,
                  stride=stride, Ho=Ho, Wo_p=Wo_p)


def _conv3x3_res_kernel(x_ref, w_ref, b_ref, r_ref, o_ref, *, stride, Ho, Wo_p):
    _conv3x3_body(x_ref, w_ref, b_ref, r_ref, o_ref,
                  stride=stride, Ho=Ho, Wo_p=Wo_p)


def conv3x3_bn_mish(x, w, bias, *, stride=1, residual=None,
                    out_dtype=jnp.bfloat16):
    """x: (N,H,W,Cin) f32; w: (3,3,Cin,Cout) scale-folded f32; bias: (1,Cout).

    3x3 conv, padding=1 (dilation=1), stride in {1,2}; residual (if given) is
    (N,Ho,Wo,Cout) and is added after Mish (DarkBlock skip)."""
    assert stride in (1, 2)
    N, H, W, Cin = x.shape
    Cout = w.shape[-1]
    s = stride
    Ho = (H + 2 - 3) // s + 1
    Wo = (W + 2 - 3) // s + 1
    Wo_p = _round_up(Wo, 8)        # keep the in-kernel flatten layout-trivial
    ext = 2 // s                   # extra per-phase rows/cols for the 3 taps
    Hq, Wq = Ho + ext, Wo_p + ext
    Hp, Wp = s * Hq, s * Wq
    pad_b, pad_r = Hp - 1 - H, Wp - 1 - W
    assert pad_b >= 0 and pad_r >= 0
    xp = jnp.pad(x, ((0, 0), (1, pad_b), (1, pad_r), (0, 0)))
    # Space-to-depth phase split (a 1x rearrangement, NOT a 9x im2col).
    # For stride=1 this is just a free reshape.
    xph = xp.reshape(N, Hq, s, Wq, s, Cin).transpose(0, 2, 4, 1, 3, 5)
    xph = xph.reshape(N, s * s, Hq, Wq, Cin)

    M2 = Ho * Wo_p
    has_res = residual is not None
    kern = functools.partial(
        _conv3x3_res_kernel if has_res else _conv3x3_kernel,
        stride=s, Ho=Ho, Wo_p=Wo_p)

    in_specs = [
        pl.BlockSpec((None, s * s, Hq, Wq, Cin), lambda n: (n, 0, 0, 0, 0)),
        pl.BlockSpec((3, 3, Cin, Cout), lambda n: (0, 0, 0, 0)),
        pl.BlockSpec((1, Cout), lambda n: (0, 0)),
    ]
    args = [xph, w, bias]
    if has_res:
        if Wo_p != Wo:
            residual = jnp.pad(residual, ((0, 0), (0, 0), (0, Wo_p - Wo), (0, 0)))
        args.append(residual.reshape(N, M2, Cout))
        in_specs.append(pl.BlockSpec((None, M2, Cout), lambda n: (n, 0, 0)))

    # TODO(synk): for large images, add an output-row-tile grid axis with a
    # manual halo DMA (memory_space=pl.ANY + make_async_copy) so the per-step
    # slab stays within VMEM; whole-image-per-batch-step is fine at these sizes.
    out = pl.pallas_call(
        kern,
        out_shape=jax.ShapeDtypeStruct((N, M2, Cout), out_dtype),
        grid=(N,),
        in_specs=in_specs,
        out_specs=pl.BlockSpec((None, M2, Cout), lambda n: (n, 0, 0)),
        compiler_params=_COMPILER_PARAMS,
    )(*args)

    out = out.reshape(N, Ho, Wo_p, Cout)
    if Wo_p != Wo:
        out = out[:, :, :Wo, :]
    return out


# ----------------------------------------------------------------------------
# Parameters: BatchNorm (eval-mode) folded into the conv weights and a bias.
# 1x1 weights stored bf16 in (Cin, Cout) matmul layout; 3x3 weights stored f32
# in (kh, kw, Cin, Cout) layout.  Bias stays f32.
# ----------------------------------------------------------------------------
def make_cna_params(key, cin, cout, k, *, w_dtype):
    kw_, kg, kb, km, kv = jax.random.split(key, 5)
    fan_in = float(cin * k * k)
    w = jax.random.normal(kw_, (cout, cin, k, k), jnp.float32) / jnp.sqrt(fan_in)
    gamma = 1.0 + 0.1 * jax.random.normal(kg, (cout,), jnp.float32)
    beta = 0.1 * jax.random.normal(kb, (cout,), jnp.float32)
    running_mean = 0.1 * jax.random.normal(km, (cout,), jnp.float32)
    running_var = 1.0 + 0.1 * jnp.abs(jax.random.normal(kv, (cout,), jnp.float32))
    eps = 1e-4  # BatchNorm2d(eps=0.0001), eval-mode running stats
    scale = gamma / jnp.sqrt(running_var + eps)
    bias = (beta - running_mean * scale).reshape(1, cout).astype(jnp.float32)
    if k == 1:
        wmat = (w.reshape(cout, cin).T * scale[None, :]).astype(w_dtype)
    else:
        wmat = (jnp.transpose(w, (2, 3, 1, 0)) * scale).astype(w_dtype)
    return {"w": wmat, "bias": bias}


def make_csp_params(key, inplanes, planes, is_csp_first_stage=True):
    keys = jax.random.split(key, 6)
    mid = planes if is_csp_first_stage else inplanes
    pt1_out = planes if is_csp_first_stage else inplanes
    fuse_in = planes * 2 if is_csp_first_stage else planes
    params = {
        "base": make_cna_params(keys[0], inplanes, planes, 3, w_dtype=jnp.float32),
        "pt1": make_cna_params(keys[1], planes, pt1_out, 1, w_dtype=jnp.bfloat16),
        # stage_layers (user-provided): DarkBlock-like residual block
        "stage_conv1": make_cna_params(keys[2], planes, planes, 1, w_dtype=jnp.bfloat16),
        "stage_conv2": make_cna_params(keys[3], planes, mid, 3, w_dtype=jnp.float32),
        "pt2": make_cna_params(keys[4], mid, mid, 1, w_dtype=jnp.bfloat16),
    }
    fuse = make_cna_params(keys[5], fuse_in, planes, 1, w_dtype=jnp.bfloat16)
    # concat order is [out2, out1]: first `mid` weight rows act on out2.
    params["fuse"] = {"wa": fuse["w"][:mid], "wb": fuse["w"][mid:],
                      "bias": fuse["bias"]}
    return params


# ----------------------------------------------------------------------------
# CrossStagePartialBlock forward
# ----------------------------------------------------------------------------
@functools.partial(jax.jit, static_argnames=("stride",))
def csp_block_forward(params, x_nchw, stride=2):
    x_nhwc = jnp.transpose(x_nchw, (0, 2, 3, 1)).astype(jnp.float32)

    # base_layer: 3x3 conv, stride=stride, padding=dilation(=1)  -> bf16
    x = conv3x3_bn_mish(x_nhwc, params["base"]["w"], params["base"]["bias"],
                        stride=stride, out_dtype=jnp.bfloat16)
    N, Ho, Wo, P = x.shape
    x2d = x.reshape(N * Ho * Wo, P)

    # partial_transition1 (1x1)
    out1 = conv1x1_bn_mish(x2d, params["pt1"]["w"], params["pt1"]["bias"],
                           out_dtype=jnp.bfloat16)

    # stage_layers: DarkBlock-like residual block (1x1 CNA -> 3x3 CNA + skip)
    h2d = conv1x1_bn_mish(x2d, params["stage_conv1"]["w"],
                          params["stage_conv1"]["bias"], out_dtype=jnp.float32)
    h = h2d.reshape(N, Ho, Wo, -1)
    out2 = conv3x3_bn_mish(h, params["stage_conv2"]["w"],
                           params["stage_conv2"]["bias"], stride=1,
                           residual=x, out_dtype=jnp.bfloat16)
    out2_2d = out2.reshape(N * Ho * Wo, -1)

    # partial_transition2 (1x1)
    out2_2d = conv1x1_bn_mish(out2_2d, params["pt2"]["w"], params["pt2"]["bias"],
                              out_dtype=jnp.bfloat16)

    # torch.cat([out2, out1], dim=1) + fuse_transition (1x1), fused in-kernel
    out2d = concat_conv1x1_bn_mish(out2_2d, out1,
                                   params["fuse"]["wa"], params["fuse"]["wb"],
                                   params["fuse"]["bias"],
                                   out_dtype=jnp.float32)
    out = out2d.reshape(N, Ho, Wo, -1)
    return jnp.transpose(out, (0, 3, 1, 2))  # NHWC -> NCHW


if __name__ == "__main__":
    key = jax.random.PRNGKey(0)
    k_param, k_x = jax.random.split(key)

    inplanes, planes = 4, 8
    x = jax.random.normal(k_x, (2, inplanes, 16, 16), jnp.float32)  # NCHW
    params = make_csp_params(k_param, inplanes, planes, is_csp_first_stage=True)

    out = csp_block_forward(params, x, stride=2)
    out = jax.block_until_ready(out)

    assert out.shape == (2, planes, 8, 8), out.shape
    assert jnp.all(jnp.isfinite(out))
    print("KERNEL_OK")
</pallas_src>

<mosaic_0001>
module attributes {stable_mosaic.version = 11 : i64} {
  func.func @_conv3x3_kernel(%arg0: i32, %arg1: memref<1x4x9x9x4xf32, #tpu.memory_space<vmem>>, %arg2: memref<3x3x4x8xf32, #tpu.memory_space<vmem>>, %arg3: memref<1x8xf32, #tpu.memory_space<vmem>>, %arg4: memref<1x64x8xbf16, #tpu.memory_space<vmem>>) attributes {dimension_semantics = [#tpu.dimension_semantics<parallel>], iteration_bounds = array<i64: 2>, scalar_prefetch = 0 : i64, scratch_operands = 0 : i64, tpu.core_type = #tpu.core_type<tc>, window_params = [{transform_indices = @transform_0, window_bounds = array<i64: 1, 4, 9, 9, 4>}, {pipeline_mode = #tpu.pipeline_mode<synchronous>, transform_indices = @transform_1, window_bounds = array<i64: 3, 3, 4, 8>}, {pipeline_mode = #tpu.pipeline_mode<synchronous>, transform_indices = @transform_2, window_bounds = array<i64: 1, 8>}, {transform_indices = @transform_3, window_bounds = array<i64: 1, 64, 8>}]} {
    %cst = arith.constant 0.000000e+00 : f32
    %0 = vector.broadcast %cst : f32 to vector<64x8xf32>
    %c0 = arith.constant 0 : index
    %c0_0 = arith.constant 0 : index
    %c0_1 = arith.constant 0 : index
    %c0_2 = arith.constant 0 : index
    %c0_3 = arith.constant 0 : index
    %1 = vector.load %arg1[%c0, %c0_0, %c0_1, %c0_2, %c0_3] : memref<1x4x9x9x4xf32, #tpu.memory_space<vmem>>, vector<1x1x8x8x4xf32>
    %2 = vector.shape_cast %1 : vector<1x1x8x8x4xf32> to vector<8x8x4xf32>
    %3 = vector.shape_cast %2 : vector<8x8x4xf32> to vector<64x4xf32>
    %c0_4 = arith.constant 0 : index
    %c0_5 = arith.constant 0 : index
    %c0_6 = arith.constant 0 : index
    %c0_7 = arith.constant 0 : index
    %4 = vector.load %arg2[%c0_4, %c0_5, %c0_6, %c0_7] : memref<3x3x4x8xf32, #tpu.memory_space<vmem>>, vector<1x1x4x8xf32>
    %5 = vector.shape_cast %4 : vector<1x1x4x8xf32> to vector<4x8xf32>
    %cst_8 = arith.constant dense<0.000000e+00> : vector<64x8xf32>
    %6 = tpu.matmul %3, %5, %cst_8 {dimension_numbers = #tpu.dot_dimension_numbers<[1], [0], [0], [1], [0, 0, 1, 1], [], []>} : vector<64x4xf32>, vector<4x8xf32>, vector<64x8xf32> -> vector<64x8xf32>
    %7 = arith.addf %0, %6 : vector<64x8xf32>
    %c0_9 = arith.constant 0 : index
    %c1 = arith.constant 1 : index
    %c0_10 = arith.constant 0 : index
    %c0_11 = arith.constant 0 : index
    %c0_12 = arith.constant 0 : index
    %8 = vector.load %arg1[%c0_9, %c1, %c0_10, %c0_11, %c0_12] : memref<1x4x9x9x4xf32, #tpu.memory_space<vmem>>, vector<1x1x8x8x4xf32>
    %9 = vector.shape_cast %8 : vector<1x1x8x8x4xf32> to vector<8x8x4xf32>
    %10 = vector.shape_cast %9 : vector<8x8x4xf32> to vector<64x4xf32>
    %c0_13 = arith.constant 0 : index
    %c1_14 = arith.constant 1 : index
    %c0_15 = arith.constant 0 : index
    %c0_16 = arith.constant 0 : index
    %11 = vector.load %arg2[%c0_13, %c1_14, %c0_15, %c0_16] : memref<3x3x4x8xf32, #tpu.memory_space<vmem>>, vector<1x1x4x8xf32>
    %12 = vector.shape_cast %11 : vector<1x1x4x8xf32> to vector<4x8xf32>
    %cst_17 = arith.constant dense<0.000000e+00> : vector<64x8xf32>
    %13 = tpu.matmul %10, %12, %cst_17 {dimension_numbers = #tpu.dot_dimension_numbers<[1], [0], [0], [1], [0, 0, 1, 1], [], []>} : vector<64x4xf32>, vector<4x8xf32>, vector<64x8xf32> -> vector<64x8xf32>
    %14 = arith.addf %7, %13 : vector<64x8xf32>
    %c0_18 = arith.constant 0 : index
    %c0_19 = arith.constant 0 : index
    %c0_20 = arith.constant 0 : index
    %c1_21 = arith.constant 1 : index
    %c0_22 = arith.constant 0 : index
    %15 = vector.load %arg1[%c0_18, %c0_19, %c0_20, %c1_21, %c0_22] : memref<1x4x9x9x4xf32, #tpu.memory_space<vmem>>, vector<1x1x8x8x4xf32>
    %16 = vector.shape_cast %15 : vector<1x1x8x8x4xf32> to vector<8x8x4xf32>
    %17 = vector.shape_cast %16 : vector<8x8x4xf32> to vector<64x4xf32>
    %c0_23 = arith.constant 0 : index
    %c2 = arith.constant 2 : index
    %c0_24 = arith.constant 0 : index
    %c0_25 = arith.constant 0 : index
    %18 = vector.load %arg2[%c0_23, %c2, %c0_24, %c0_25] : memref<3x3x4x8xf32, #tpu.memory_space<vmem>>, vector<1x1x4x8xf32>
    %19 = vector.shape_cast %18 : vector<1x1x4x8xf32> to vector<4x8xf32>
    %cst_26 = arith.constant dense<0.000000e+00> : vector<64x8xf32>
    %20 = tpu.matmul %17, %19, %cst_26 {dimension_numbers = #tpu.dot_dimension_numbers<[1], [0], [0], [1], [0, 0, 1, 1], [], []>} : vector<64x4xf32>, vector<4x8xf32>, vector<64x8xf32> -> vector<64x8xf32>
    %21 = arith.addf %14, %20 : vector<64x8xf32>
    %c0_27 = arith.constant 0 : index
    %c2_28 = arith.constant 2 : index
    %c0_29 = arith.constant 0 : index
    %c0_30 = arith.constant 0 : index
    %c0_31 = arith.constant 0 : index
    %22 = vector.load %arg1[%c0_27, %c2_28, %c0_29, %c0_30, %c0_31] : memref<1x4x9x9x4xf32, #tpu.memory_space<vmem>>, vector<1x1x8x8x4xf32>
    %23 = vector.shape_cast %22 : vector<1x1x8x8x4xf32> to vector<8x8x4xf32>
    %24 = vector.shape_cast %23 : vector<8x8x4xf32> to vector<64x4xf32>
    %c1_32 = arith.constant 1 : index
    %c0_33 = arith.constant 0 : index
    %c0_34 = arith.constant 0 : index
    %c0_35 = arith.constant 0 : index
    %25 = vector.load %arg2[%c1_32, %c0_33, %c0_34, %c0_35] : memref<3x3x4x8xf32, #tpu.memory_space<vmem>>, vector<1x1x4x8xf32>
    %26 = vector.shape_cast %25 : vector<1x1x4x8xf32> to vector<4x8xf32>
    %cst_36 = arith.constant dense<0.000000e+00> : vector<64x8xf32>
    %27 = tpu.matmul %24, %26, %cst_36 {dimension_numbers = #tpu.dot_dimension_numbers<[1], [0], [0], [1], [0, 0, 1, 1], [], []>} : vector<64x4xf32>, vector<4x8xf32>, vector<64x8xf32> -> vector<64x8xf32>
    %28 = arith.addf %21, %27 : vector<64x8xf32>
    %c0_37 = arith.constant 0 : index
    %c3 = arith.constant 3 : index
    %c0_38 = arith.constant 0 : index
    %c0_39 = arith.constant 0 : index
    %c0_40 = arith.constant 0 : index
    %29 = vector.load %arg1[%c0_37, %c3, %c0_38, %c0_39, %c0_40] : memref<1x4x9x9x4xf32, #tpu.memory_space<vmem>>, vector<1x1x8x8x4xf32>
    %30 = vector.shape_cast %29 : vector<1x1x8x8x4xf32> to vector<8x8x4xf32>
    %31 = vector.shape_cast %30 : vector<8x8x4xf32> to vector<64x4xf32>
    %c1_41 = arith.constant 1 : index
    %c1_42 = arith.constant 1 : index
    %c0_43 = arith.constant 0 : index
    %c0_44 = arith.constant 0 : index
    %32 = vector.load %arg2[%c1_41, %c1_42, %c0_43, %c0_44] : memref<3x3x4x8xf32, #tpu.memory_space<vmem>>, vector<1x1x4x8xf32>
    %33 = vector.shape_cast %32 : vector<1x1x4x8xf32> to vector<4x8xf32>
    %cst_45 = arith.constant dense<0.000000e+00> : vector<64x8xf32>
    %34 = tpu.matmul %31, %33, %cst_45 {dimension_numbers = #tpu.dot_dimension_numbers<[1], [0], [0], [1], [0, 0, 1, 1], [], []>} : vector<64x4xf32>, vector<4x8xf32>, vector<64x8xf32> -> vector<64x8xf32>
    %35 = arith.addf %28, %34 : vector<64x8xf32>
    %c0_46 = arith.constant 0 : index
    %c2_47 = arith.constant 2 : index
    %c0_48 = arith.constant 0 : index
    %c1_49 = arith.constant 1 : index
    %c0_50 = arith.constant 0 : index
    %36 = vector.load %arg1[%c0_46, %c2_47, %c0_48, %c1_49, %c0_50] : memref<1x4x9x9x4xf32, #tpu.memory_space<vmem>>, vector<1x1x8x8x4xf32>
    %37 = vector.shape_cast %36 : vector<1x1x8x8x4xf32> to vector<8x8x4xf32>
    %38 = vector.shape_cast %37 : vector<8x8x4xf32> to vector<64x4xf32>
    %c1_51 = arith.constant 1 : index
    %c2_52 = arith.constant 2 : index
    %c0_53 = arith.constant 0 : index
    %c0_54 = arith.constant 0 : index
    %39 = vector.load %arg2[%c1_51, %c2_52, %c0_53, %c0_54] : memref<3x3x4x8xf32, #tpu.memory_space<vmem>>, vector<1x1x4x8xf32>
    %40 = vector.shape_cast %39 : vector<1x1x4x8xf32> to vector<4x8xf32>
    %cst_55 = arith.constant dense<0.000000e+00> : vector<64x8xf32>
    %41 = tpu.matmul %38, %40, %cst_55 {dimension_numbers = #tpu.dot_dimension_numbers<[1], [0], [0], [1], [0, 0, 1, 1], [], []>} : vector<64x4xf32>, vector<4x8xf32>, vector<64x8xf32> -> vector<64x8xf32>
    %42 = arith.addf %35, %41 : vector<64x8xf32>
    %c0_56 = arith.constant 0 : index
    %c0_57 = arith.constant 0 : index
    %c1_58 = arith.constant 1 : index
    %c0_59 = arith.constant 0 : index
    %c0_60 = arith.constant 0 : index
    %43 = vector.load %arg1[%c0_56, %c0_57, %c1_58, %c0_59, %c0_60] : memref<1x4x9x9x4xf32, #tpu.memory_space<vmem>>, vector<1x1x8x8x4xf32>
    %44 = vector.shape_cast %43 : vector<1x1x8x8x4xf32> to vector<8x8x4xf32>
    %45 = vector.shape_cast %44 : vector<8x8x4xf32> to vector<64x4xf32>
    %c2_61 = arith.constant 2 : index
    %c0_62 = arith.constant 0 : index
    %c0_63 = arith.constant 0 : index
    %c0_64 = arith.constant 0 : index
    %46 = vector.load %arg2[%c2_61, %c0_62, %c0_63, %c0_64] : memref<3x3x4x8xf32, #tpu.memory_space<vmem>>, vector<1x1x4x8xf32>
    %47 = vector.shape_cast %46 : vector<1x1x4x8xf32> to vector<4x8xf32>
    %cst_65 = arith.constant dense<0.000000e+00> : vector<64x8xf32>
    %48 = tpu.matmul %45, %47, %cst_65 {dimension_numbers = #tpu.dot_dimension_numbers<[1], [0], [0], [1], [0, 0, 1, 1], [], []>} : vector<64x4xf32>, vector<4x8xf32>, vector<64x8xf32> -> vector<64x8xf32>
    %49 = arith.addf %42, %48 : vector<64x8xf32>
    %c0_66 = arith.constant 0 : index
    %c1_67 = arith.constant 1 : index
    %c1_68 = arith.constant 1 : index
    %c0_69 = arith.constant 0 : index
    %c0_70 = arith.constant 0 : index
    %50 = vector.load %arg1[%c0_66, %c1_67, %c1_68, %c0_69, %c0_70] : memref<1x4x9x9x4xf32, #tpu.memory_space<vmem>>, vector<1x1x8x8x4xf32>
    %51 = vector.shape_cast %50 : vector<1x1x8x8x4xf32> to vector<8x8x4xf32>
    %52 = vector.shape_cast %51 : vector<8x8x4xf32> to vector<64x4xf32>
    %c2_71 = arith.constant 2 : index
    %c1_72 = arith.constant 1 : index
    %c0_73 = arith.constant 0 : index
    %c0_74 = arith.constant 0 : index
    %53 = vector.load %arg2[%c2_71, %c1_72, %c0_73, %c0_74] : memref<3x3x4x8xf32, #tpu.memory_space<vmem>>, vector<1x1x4x8xf32>
    %54 = vector.shape_cast %53 : vector<1x1x4x8xf32> to vector<4x8xf32>
    %cst_75 = arith.constant dense<0.000000e+00> : vector<64x8xf32>
    %55 = tpu.matmul %52, %54, %cst_75 {dimension_numbers = #tpu.dot_dimension_numbers<[1], [0], [0], [1], [0, 0, 1, 1], [], []>} : vector<64x4xf32>, vector<4x8xf32>, vector<64x8xf32> -> vector<64x8xf32>
    %56 = arith.addf %49, %55 : vector<64x8xf32>
    %c0_76 = arith.constant 0 : index
    %c0_77 = arith.constant 0 : index
    %c1_78 = arith.constant 1 : index
    %c1_79 = arith.constant 1 : index
    %c0_80 = arith.constant 0 : index
    %57 = vector.load %arg1[%c0_76, %c0_77, %c1_78, %c1_79, %c0_80] : memref<1x4x9x9x4xf32, #tpu.memory_space<vmem>>, vector<1x1x8x8x4xf32>
    %58 = vector.shape_cast %57 : vector<1x1x8x8x4xf32> to vector<8x8x4xf32>
    %59 = vector.shape_cast %58 : vector<8x8x4xf32> to vector<64x4xf32>
    %c2_81 = arith.constant 2 : index
    %c2_82 = arith.constant 2 : index
    %c0_83 = arith.constant 0 : index
    %c0_84 = arith.constant 0 : index
    %60 = vector.load %arg2[%c2_81, %c2_82, %c0_83, %c0_84] : memref<3x3x4x8xf32, #tpu.memory_space<vmem>>, vector<1x1x4x8xf32>
    %61 = vector.shape_cast %60 : vector<1x1x4x8xf32> to vector<4x8xf32>
    %cst_85 = arith.constant dense<0.000000e+00> : vector<64x8xf32>
    %62 = tpu.matmul %59, %61, %cst_85 {dimension_numbers = #tpu.dot_dimension_numbers<[1], [0], [0], [1], [0, 0, 1, 1], [], []>} : vector<64x4xf32>, vector<4x8xf32>, vector<64x8xf32> -> vector<64x8xf32>
    %63 = arith.addf %56, %62 : vector<64x8xf32>
    %c0_86 = arith.constant 0 : index
    %c0_87 = arith.constant 0 : index
    %64 = vector.load %arg3[%c0_86, %c0_87] : memref<1x8xf32, #tpu.memory_space<vmem>>, vector<1x8xf32>
    %65 = vector.broadcast %64 : vector<1x8xf32> to vector<64x8xf32>
    %66 = arith.addf %63, %65 : vector<64x8xf32>
    %cst_88 = arith.constant 2.000000e+01 : f32
    %67 = vector.broadcast %cst_88 : f32 to vector<64x8xf32>
    %68 = arith.minimumf %66, %67 : vector<64x8xf32>
    %69 = math.exp %68 : vector<64x8xf32>
    %cst_89 = arith.constant 2.000000e+00 : f32
    %70 = vector.broadcast %cst_89 : f32 to vector<64x8xf32>
    %71 = arith.addf %69, %70 : vector<64x8xf32>
    %72 = arith.mulf %69, %71 : vector<64x8xf32>
    %73 = arith.mulf %66, %72 : vector<64x8xf32>
    %cst_90 = arith.constant 2.000000e+00 : f32
    %74 = vector.broadcast %cst_90 : f32 to vector<64x8xf32>
    %75 = arith.addf %72, %74 : vector<64x8xf32>
    %76 = tpu.reciprocal %75 {approx = true} : vector<64x8xf32> -> vector<64x8xf32>
    %77 = arith.mulf %73, %76 : vector<64x8xf32>
    %78 = arith.truncf %77 : vector<64x8xf32> to vector<64x8xbf16>
    %c0_91 = arith.constant 0 : index
    %c0_92 = arith.constant 0 : index
    %c0_93 = arith.constant 0 : index
    %79 = vector.load %arg4[%c0_91, %c0_92, %c0_93] : memref<1x64x8xbf16, #tpu.memory_space<vmem>>, vector<1x64x8xbf16>
    %80 = vector.shape_cast %79 : vector<1x64x8xbf16> to vector<64x8xbf16>
    %81 = vector.shape_cast %78 : vector<64x8xbf16> to vector<1x64x8xbf16>
    tpu.vector_store %arg4[%c0_91, %c0_92, %c0_93], %81 {strides = array<i32>} : memref<1x64x8xbf16, #tpu.memory_space<vmem>>, vector<1x64x8xbf16>,
    return
  }
  func.func @transform_0(%arg0: i32) -> (i32, i32, i32, i32, i32) {
    %c0_i32 = arith.constant 0 : i32
    %c0_i32_0 = arith.constant 0 : i32
    %c0_i32_1 = arith.constant 0 : i32
    %c0_i32_2 = arith.constant 0 : i32
    %c0_i32_3 = arith.constant 0 : i32
    return %arg0, %c0_i32, %c0_i32_0, %c0_i32_1, %c0_i32_2 : i32, i32, i32, i32, i32
  }
  func.func @transform_1(%arg0: i32) -> (i32, i32, i32, i32) {
    %c0_i32 = arith.constant 0 : i32
    %c0_i32_0 = arith.constant 0 : i32
    %c0_i32_1 = arith.constant 0 : i32
    %c0_i32_2 = arith.constant 0 : i32
    %c0_i32_3 = arith.constant 0 : i32
    return %c0_i32, %c0_i32_0, %c0_i32_1, %c0_i32_2 : i32, i32, i32, i32
  }
  func.func @transform_2(%arg0: i32) -> (i32, i32) {
    %c0_i32 = arith.constant 0 : i32
    %c0_i32_0 = arith.constant 0 : i32
    %c0_i32_1 = arith.constant 0 : i32
    return %c0_i32, %c0_i32_0 : i32, i32
  }
  func.func @transform_3(%arg0: i32) -> (i32, i32, i32) {
    %c0_i32 = arith.constant 0 : i32
    %c0_i32_0 = arith.constant 0 : i32
    %c0_i32_1 = arith.constant 0 : i32
    return %arg0, %c0_i32, %c0_i32_0 : i32, i32, i32
  }
}

module attributes {stable_mosaic.version = 11 : i64} {
  func.func @_mm_bn_mish_kernel(%arg0: i32, %arg1: memref<128x8xbf16, #tpu.memory_space<vmem>>, %arg2: memref<8x8xbf16, #tpu.memory_space<vmem>>, %arg3: memref<1x8xf32, #tpu.memory_space<vmem>>, %arg4: memref<128x8xbf16, #tpu.memory_space<vmem>>) attributes {dimension_semantics = [#tpu.dimension_semantics<parallel>], iteration_bounds = array<i64: 1>, scalar_prefetch = 0 : i64, scratch_operands = 0 : i64, tpu.core_type = #tpu.core_type<tc>, window_params = [{transform_indices = @transform_0, window_bounds = array<i64: 128, 8>}, {pipeline_mode = #tpu.pipeline_mode<synchronous>, transform_indices = @transform_1, window_bounds = array<i64: 8, 8>}, {pipeline_mode = #tpu.pipeline_mode<synchronous>, transform_indices = @transform_2, window_bounds = array<i64: 1, 8>}, {transform_indices = @transform_3, window_bounds = array<i64: 128, 8>}]} {
    %c0 = arith.constant 0 : index
    %c0_0 = arith.constant 0 : index
    %0 = vector.load %arg1[%c0, %c0_0] : memref<128x8xbf16, #tpu.memory_space<vmem>>, vector<128x8xbf16>
    %c0_1 = arith.constant 0 : index
    %c0_2 = arith.constant 0 : index
    %1 = vector.load %arg2[%c0_1, %c0_2] : memref<8x8xbf16, #tpu.memory_space<vmem>>, vector<8x8xbf16>
    %cst = arith.constant dense<0.000000e+00> : vector<128x8xf32>
    %2 = tpu.matmul %0, %1, %cst {dimension_numbers = #tpu.dot_dimension_numbers<[1], [0], [0], [1], [0, 0, 1, 1], [], []>} : vector<128x8xbf16>, vector<8x8xbf16>, vector<128x8xf32> -> vector<128x8xf32>
    %c0_3 = arith.constant 0 : index
    %c0_4 = arith.constant 0 : index
    %3 = vector.load %arg3[%c0_3, %c0_4] : memref<1x8xf32, #tpu.memory_space<vmem>>, vector<1x8xf32>
    %4 = vector.broadcast %3 : vector<1x8xf32> to vector<128x8xf32>
    %5 = arith.addf %2, %4 : vector<128x8xf32>
    %cst_5 = arith.constant 2.000000e+01 : f32
    %6 = vector.broadcast %cst_5 : f32 to vector<128x8xf32>
    %7 = arith.minimumf %5, %6 : vector<128x8xf32>
    %8 = math.exp %7 : vector<128x8xf32>
    %cst_6 = arith.constant 2.000000e+00 : f32
    %9 = vector.broadcast %cst_6 : f32 to vector<128x8xf32>
    %10 = arith.addf %8, %9 : vector<128x8xf32>
    %11 = arith.mulf %8, %10 : vector<128x8xf32>
    %12 = arith.mulf %5, %11 : vector<128x8xf32>
    %cst_7 = arith.constant 2.000000e+00 : f32
    %13 = vector.broadcast %cst_7 : f32 to vector<128x8xf32>
    %14 = arith.addf %11, %13 : vector<128x8xf32>
    %15 = tpu.reciprocal %14 {approx = true} : vector<128x8xf32> -> vector<128x8xf32>
    %16 = arith.mulf %12, %15 : vector<128x8xf32>
    %17 = arith.truncf %16 : vector<128x8xf32> to vector<128x8xbf16>
    %c0_8 = arith.constant 0 : index
    %c0_9 = arith.constant 0 : index
    %18 = vector.load %arg4[%c0_8, %c0_9] : memref<128x8xbf16, #tpu.memory_space<vmem>>, vector<128x8xbf16>
    tpu.vector_store %arg4[%c0_8, %c0_9], %17 {strides = array<i32>} : memref<128x8xbf16, #tpu.memory_space<vmem>>, vector<128x8xbf16>,
    return
  }
  func.func @transform_0(%arg0: i32) -> (i32, i32) {
    %c0_i32 = arith.constant 0 : i32
    %c0_i32_0 = arith.constant 0 : i32
    return %arg0, %c0_i32 : i32, i32
  }
  func.func @transform_1(%arg0: i32) -> (i32, i32) {
    %c0_i32 = arith.constant 0 : i32
    %c0_i32_0 = arith.constant 0 : i32
    %c0_i32_1 = arith.constant 0 : i32
    return %c0_i32, %c0_i32_0 : i32, i32
  }
  func.func @transform_2(%arg0: i32) -> (i32, i32) {
    %c0_i32 = arith.constant 0 : i32
    %c0_i32_0 = arith.constant 0 : i32
    %c0_i32_1 = arith.constant 0 : i32
    return %c0_i32, %c0_i32_0 : i32, i32
  }
  func.func @transform_3(%arg0: i32) -> (i32, i32) {
    %c0_i32 = arith.constant 0 : i32
    %c0_i32_0 = arith.constant 0 : i32
    return %arg0, %c0_i32 : i32, i32
  }
}

module attributes {stable_mosaic.version = 11 : i64} {
  func.func @_mm_bn_mish_kernel(%arg0: i32, %arg1: memref<128x8xbf16, #tpu.memory_space<vmem>>, %arg2: memref<8x8xbf16, #tpu.memory_space<vmem>>, %arg3: memref<1x8xf32, #tpu.memory_space<vmem>>, %arg4: memref<128x8xf32, #tpu.memory_space<vmem>>) attributes {dimension_semantics = [#tpu.dimension_semantics<parallel>], iteration_bounds = array<i64: 1>, scalar_prefetch = 0 : i64, scratch_operands = 0 : i64, tpu.core_type = #tpu.core_type<tc>, window_params = [{transform_indices = @transform_0, window_bounds = array<i64: 128, 8>}, {pipeline_mode = #tpu.pipeline_mode<synchronous>, transform_indices = @transform_1, window_bounds = array<i64: 8, 8>}, {pipeline_mode = #tpu.pipeline_mode<synchronous>, transform_indices = @transform_2, window_bounds = array<i64: 1, 8>}, {transform_indices = @transform_3, window_bounds = array<i64: 128, 8>}]} {
    %c0 = arith.constant 0 : index
    %c0_0 = arith.constant 0 : index
    %0 = vector.load %arg1[%c0, %c0_0] : memref<128x8xbf16, #tpu.memory_space<vmem>>, vector<128x8xbf16>
    %c0_1 = arith.constant 0 : index
    %c0_2 = arith.constant 0 : index
    %1 = vector.load %arg2[%c0_1, %c0_2] : memref<8x8xbf16, #tpu.memory_space<vmem>>, vector<8x8xbf16>
    %cst = arith.constant dense<0.000000e+00> : vector<128x8xf32>
    %2 = tpu.matmul %0, %1, %cst {dimension_numbers = #tpu.dot_dimension_numbers<[1], [0], [0], [1], [0, 0, 1, 1], [], []>} : vector<128x8xbf16>, vector<8x8xbf16>, vector<128x8xf32> -> vector<128x8xf32>
    %c0_3 = arith.constant 0 : index
    %c0_4 = arith.constant 0 : index
    %3 = vector.load %arg3[%c0_3, %c0_4] : memref<1x8xf32, #tpu.memory_space<vmem>>, vector<1x8xf32>
    %4 = vector.broadcast %3 : vector<1x8xf32> to vector<128x8xf32>
    %5 = arith.addf %2, %4 : vector<128x8xf32>
    %cst_5 = arith.constant 2.000000e+01 : f32
    %6 = vector.broadcast %cst_5 : f32 to vector<128x8xf32>
    %7 = arith.minimumf %5, %6 : vector<128x8xf32>
    %8 = math.exp %7 : vector<128x8xf32>
    %cst_6 = arith.constant 2.000000e+00 : f32
    %9 = vector.broadcast %cst_6 : f32 to vector<128x8xf32>
    %10 = arith.addf %8, %9 : vector<128x8xf32>
    %11 = arith.mulf %8, %10 : vector<128x8xf32>
    %12 = arith.mulf %5, %11 : vector<128x8xf32>
    %cst_7 = arith.constant 2.000000e+00 : f32
    %13 = vector.broadcast %cst_7 : f32 to vector<128x8xf32>
    %14 = arith.addf %11, %13 : vector<128x8xf32>
    %15 = tpu.reciprocal %14 {approx = true} : vector<128x8xf32> -> vector<128x8xf32>
    %16 = arith.mulf %12, %15 : vector<128x8xf32>
    %c0_8 = arith.constant 0 : index
    %c0_9 = arith.constant 0 : index
    %17 = vector.load %arg4[%c0_8, %c0_9] : memref<128x8xf32, #tpu.memory_space<vmem>>, vector<128x8xf32>
    tpu.vector_store %arg4[%c0_8, %c0_9], %16 {strides = array<i32>} : memref<128x8xf32, #tpu.memory_space<vmem>>, vector<128x8xf32>,
    return
  }
  func.func @transform_0(%arg0: i32) -> (i32, i32) {
    %c0_i32 = arith.constant 0 : i32
    %c0_i32_0 = arith.constant 0 : i32
    return %arg0, %c0_i32 : i32, i32
  }
  func.func @transform_1(%arg0: i32) -> (i32, i32) {
    %c0_i32 = arith.constant 0 : i32
    %c0_i32_0 = arith.constant 0 : i32
    %c0_i32_1 = arith.constant 0 : i32
    return %c0_i32, %c0_i32_0 : i32, i32
  }
  func.func @transform_2(%arg0: i32) -> (i32, i32) {
    %c0_i32 = arith.constant 0 : i32
    %c0_i32_0 = arith.constant 0 : i32
    %c0_i32_1 = arith.constant 0 : i32
    return %c0_i32, %c0_i32_0 : i32, i32
  }
  func.func @transform_3(%arg0: i32) -> (i32, i32) {
    %c0_i32 = arith.constant 0 : i32
    %c0_i32_0 = arith.constant 0 : i32
    return %arg0, %c0_i32 : i32, i32
  }
}

module attributes {stable_mosaic.version = 11 : i64} {
  func.func @_mm2_bn_mish_kernel(%arg0: i32, %arg1: memref<128x8xbf16, #tpu.memory_space<vmem>>, %arg2: memref<128x8xbf16, #tpu.memory_space<vmem>>, %arg3: memref<8x8xbf16, #tpu.memory_space<vmem>>, %arg4: memref<8x8xbf16, #tpu.memory_space<vmem>>, %arg5: memref<1x8xf32, #tpu.memory_space<vmem>>, %arg6: memref<128x8xf32, #tpu.memory_space<vmem>>) attributes {dimension_semantics = [#tpu.dimension_semantics<parallel>], iteration_bounds = array<i64: 1>, scalar_prefetch = 0 : i64, scratch_operands = 0 : i64, tpu.core_type = #tpu.core_type<tc>, window_params = [{transform_indices = @transform_0, window_bounds = array<i64: 128, 8>}, {transform_indices = @transform_1, window_bounds = array<i64: 128, 8>}, {pipeline_mode = #tpu.pipeline_mode<synchronous>, transform_indices = @transform_2, window_bounds = array<i64: 8, 8>}, {pipeline_mode = #tpu.pipeline_mode<synchronous>, transform_indices = @transform_3, window_bounds = array<i64: 8, 8>}, {pipeline_mode = #tpu.pipeline_mode<synchronous>, transform_indices = @transform_4, window_bounds = array<i64: 1, 8>}, {transform_indices = @transform_5, window_bounds = array<i64: 128, 8>}]} {
    %c0 = arith.constant 0 : index
    %c0_0 = arith.constant 0 : index
    %0 = vector.load %arg1[%c0, %c0_0] : memref<128x8xbf16, #tpu.memory_space<vmem>>, vector<128x8xbf16>
    %c0_1 = arith.constant 0 : index
    %c0_2 = arith.constant 0 : index
    %1 = vector.load %arg3[%c0_1, %c0_2] : memref<8x8xbf16, #tpu.memory_space<vmem>>, vector<8x8xbf16>
    %cst = arith.constant dense<0.000000e+00> : vector<128x8xf32>
    %2 = tpu.matmul %0, %1, %cst {dimension_numbers = #tpu.dot_dimension_numbers<[1], [0], [0], [1], [0, 0, 1, 1], [], []>} : vector<128x8xbf16>, vector<8x8xbf16>, vector<128x8xf32> -> vector<128x8xf32>
    %c0_3 = arith.constant 0 : index
    %c0_4 = arith.constant 0 : index
    %3 = vector.load %arg2[%c0_3, %c0_4] : memref<128x8xbf16, #tpu.memory_space<vmem>>, vector<128x8xbf16>
    %c0_5 = arith.constant 0 : index
    %c0_6 = arith.constant 0 : index
    %4 = vector.load %arg4[%c0_5, %c0_6] : memref<8x8xbf16, #tpu.memory_space<vmem>>, vector<8x8xbf16>
    %cst_7 = arith.constant dense<0.000000e+00> : vector<128x8xf32>
    %5 = tpu.matmul %3, %4, %cst_7 {dimension_numbers = #tpu.dot_dimension_numbers<[1], [0], [0], [1], [0, 0, 1, 1], [], []>} : vector<128x8xbf16>, vector<8x8xbf16>, vector<128x8xf32> -> vector<128x8xf32>
    %6 = arith.addf %2, %5 : vector<128x8xf32>
    %c0_8 = arith.constant 0 : index
    %c0_9 = arith.constant 0 : index
    %7 = vector.load %arg5[%c0_8, %c0_9] : memref<1x8xf32, #tpu.memory_space<vmem>>, vector<1x8xf32>
    %8 = vector.broadcast %7 : vector<1x8xf32> to vector<128x8xf32>
    %9 = arith.addf %6, %8 : vector<128x8xf32>
    %cst_10 = arith.constant 2.000000e+01 : f32
    %10 = vector.broadcast %cst_10 : f32 to vector<128x8xf32>
    %11 = arith.minimumf %9, %10 : vector<128x8xf32>
    %12 = math.exp %11 : vector<128x8xf32>
    %cst_11 = arith.constant 2.000000e+00 : f32
    %13 = vector.broadcast %cst_11 : f32 to vector<128x8xf32>
    %14 = arith.addf %12, %13 : vector<128x8xf32>
    %15 = arith.mulf %12, %14 : vector<128x8xf32>
    %16 = arith.mulf %9, %15 : vector<128x8xf32>
    %cst_12 = arith.constant 2.000000e+00 : f32
    %17 = vector.broadcast %cst_12 : f32 to vector<128x8xf32>
    %18 = arith.addf %15, %17 : vector<128x8xf32>
    %19 = tpu.reciprocal %18 {approx = true} : vector<128x8xf32> -> vector<128x8xf32>
    %20 = arith.mulf %16, %19 : vector<128x8xf32>
    %c0_13 = arith.constant 0 : index
    %c0_14 = arith.constant 0 : index
    %21 = vector.load %arg6[%c0_13, %c0_14] : memref<128x8xf32, #tpu.memory_space<vmem>>, vector<128x8xf32>
    tpu.vector_store %arg6[%c0_13, %c0_14], %20 {strides = array<i32>} : memref<128x8xf32, #tpu.memory_space<vmem>>, vector<128x8xf32>,
    return
  }
  func.func @transform_0(%arg0: i32) -> (i32, i32) {
    %c0_i32 = arith.constant 0 : i32
    %c0_i32_0 = arith.constant 0 : i32
    return %arg0, %c0_i32 : i32, i32
  }
  func.func @transform_1(%arg0: i32) -> (i32, i32) {
    %c0_i32 = arith.constant 0 : i32
    %c0_i32_0 = arith.constant 0 : i32
    return %arg0, %c0_i32 : i32, i32
  }
  func.func @transform_2(%arg0: i32) -> (i32, i32) {
    %c0_i32 = arith.constant 0 : i32
    %c0_i32_0 = arith.constant 0 : i32
    %c0_i32_1 = arith.constant 0 : i32
    return %c0_i32, %c0_i32_0 : i32, i32
  }
  func.func @transform_3(%arg0: i32) -> (i32, i32) {
    %c0_i32 = arith.constant 0 : i32
    %c0_i32_0 = arith.constant 0 : i32
    %c0_i32_1 = arith.constant 0 : i32
    return %c0_i32, %c0_i32_0 : i32, i32
  }
  func.func @transform_4(%arg0: i32) -> (i32, i32) {
    %c0_i32 = arith.constant 0 : i32
    %c0_i32_0 = arith.constant 0 : i32
    %c0_i32_1 = arith.constant 0 : i32
    return %c0_i32, %c0_i32_0 : i32, i32
  }
  func.func @transform_5(%arg0: i32) -> (i32, i32) {
    %c0_i32 = arith.constant 0 : i32
    %c0_i32_0 = arith.constant 0 : i32
    return %arg0, %c0_i32 : i32, i32
  }
}

module attributes {stable_mosaic.version = 11 : i64} {
  func.func @_conv3x3_res_kernel(%arg0: i32, %arg1: memref<1x1x10x10x8xf32, #tpu.memory_space<vmem>>, %arg2: memref<3x3x8x8xf32, #tpu.memory_space<vmem>>, %arg3: memref<1x8xf32, #tpu.memory_space<vmem>>, %arg4: memref<1x64x8xbf16, #tpu.memory_space<vmem>>, %arg5: memref<1x64x8xbf16, #tpu.memory_space<vmem>>) attributes {dimension_semantics = [#tpu.dimension_semantics<parallel>], iteration_bounds = array<i64: 2>, scalar_prefetch = 0 : i64, scratch_operands = 0 : i64, tpu.core_type = #tpu.core_type<tc>, window_params = [{transform_indices = @transform_0, window_bounds = array<i64: 1, 1, 10, 10, 8>}, {pipeline_mode = #tpu.pipeline_mode<synchronous>, transform_indices = @transform_1, window_bounds = array<i64: 3, 3, 8, 8>}, {pipeline_mode = #tpu.pipeline_mode<synchronous>, transform_indices = @transform_2, window_bounds = array<i64: 1, 8>}, {transform_indices = @transform_3, window_bounds = array<i64: 1, 64, 8>}, {transform_indices = @transform_4, window_bounds = array<i64: 1, 64, 8>}]} {
    %cst = arith.constant 0.000000e+00 : f32
    %0 = vector.broadcast %cst : f32 to vector<64x8xf32>
    %c0 = arith.constant 0 : index
    %c0_0 = arith.constant 0 : index
    %c0_1 = arith.constant 0 : index
    %c0_2 = arith.constant 0 : index
    %c0_3 = arith.constant 0 : index
    %1 = vector.load %arg1[%c0, %c0_0, %c0_1, %c0_2, %c0_3] : memref<1x1x10x10x8xf32, #tpu.memory_space<vmem>>, vector<1x1x8x8x8xf32>
    %2 = vector.shape_cast %1 : vector<1x1x8x8x8xf32> to vector<8x8x8xf32>
    %3 = vector.shape_cast %2 : vector<8x8x8xf32> to vector<64x8xf32>
    %c0_4 = arith.constant 0 : index
    %c0_5 = arith.constant 0 : index
    %c0_6 = arith.constant 0 : index
    %c0_7 = arith.constant 0 : index
    %4 = vector.load %arg2[%c0_4, %c0_5, %c0_6, %c0_7] : memref<3x3x8x8xf32, #tpu.memory_space<vmem>>, vector<1x1x8x8xf32>
    %5 = vector.shape_cast %4 : vector<1x1x8x8xf32> to vector<8x8xf32>
    %cst_8 = arith.constant dense<0.000000e+00> : vector<64x8xf32>
    %6 = tpu.matmul %3, %5, %cst_8 {dimension_numbers = #tpu.dot_dimension_numbers<[1], [0], [0], [1], [0, 0, 1, 1], [], []>} : vector<64x8xf32>, vector<8x8xf32>, vector<64x8xf32> -> vector<64x8xf32>
    %7 = arith.addf %0, %6 : vector<64x8xf32>
    %c0_9 = arith.constant 0 : index
    %c0_10 = arith.constant 0 : index
    %c0_11 = arith.constant 0 : index
    %c1 = arith.constant 1 : index
    %c0_12 = arith.constant 0 : index
    %8 = vector.load %arg1[%c0_9, %c0_10, %c0_11, %c1, %c0_12] : memref<1x1x10x10x8xf32, #tpu.memory_space<vmem>>, vector<1x1x8x8x8xf32>
    %9 = vector.shape_cast %8 : vector<1x1x8x8x8xf32> to vector<8x8x8xf32>
    %10 = vector.shape_cast %9 : vector<8x8x8xf32> to vector<64x8xf32>
    %c0_13 = arith.constant 0 : index
    %c1_14 = arith.constant 1 : index
    %c0_15 = arith.constant 0 : index
    %c0_16 = arith.constant 0 : index
    %11 = vector.load %arg2[%c0_13, %c1_14, %c0_15, %c0_16] : memref<3x3x8x8xf32, #tpu.memory_space<vmem>>, vector<1x1x8x8xf32>
    %12 = vector.shape_cast %11 : vector<1x1x8x8xf32> to vector<8x8xf32>
    %cst_17 = arith.constant dense<0.000000e+00> : vector<64x8xf32>
    %13 = tpu.matmul %10, %12, %cst_17 {dimension_numbers = #tpu.dot_dimension_numbers<[1], [0], [0], [1], [0, 0, 1, 1], [], []>} : vector<64x8xf32>, vector<8x8xf32>, vector<64x8xf32> -> vector<64x8xf32>
    %14 = arith.addf %7, %13 : vector<64x8xf32>
    %c0_18 = arith.constant 0 : index
    %c0_19 = arith.constant 0 : index
    %c0_20 = arith.constant 0 : index
    %c2 = arith.constant 2 : index
    %c0_21 = arith.constant 0 : index
    %15 = vector.load %arg1[%c0_18, %c0_19, %c0_20, %c2, %c0_21] : memref<1x1x10x10x8xf32, #tpu.memory_space<vmem>>, vector<1x1x8x8x8xf32>
    %16 = vector.shape_cast %15 : vector<1x1x8x8x8xf32> to vector<8x8x8xf32>
    %17 = vector.shape_cast %16 : vector<8x8x8xf32> to vector<64x8xf32>
    %c0_22 = arith.constant 0 : index
    %c2_23 = arith.constant 2 : index
    %c0_24 = arith.constant 0 : index
    %c0_25 = arith.constant 0 : index
    %18 = vector.load %arg2[%c0_22, %c2_23, %c0_24, %c0_25] : memref<3x3x8x8xf32, #tpu.memory_space<vmem>>, vector<1x1x8x8xf32>
    %19 = vector.shape_cast %18 : vector<1x1x8x8xf32> to vector<8x8xf32>
    %cst_26 = arith.constant dense<0.000000e+00> : vector<64x8xf32>
    %20 = tpu.matmul %17, %19, %cst_26 {dimension_numbers = #tpu.dot_dimension_numbers<[1], [0], [0], [1], [0, 0, 1, 1], [], []>} : vector<64x8xf32>, vector<8x8xf32>, vector<64x8xf32> -> vector<64x8xf32>
    %21 = arith.addf %14, %20 : vector<64x8xf32>
    %c0_27 = arith.constant 0 : index
    %c0_28 = arith.constant 0 : index
    %c1_29 = arith.constant 1 : index
    %c0_30 = arith.constant 0 : index
    %c0_31 = arith.constant 0 : index
    %22 = vector.load %arg1[%c0_27, %c0_28, %c1_29, %c0_30, %c0_31] : memref<1x1x10x10x8xf32, #tpu.memory_space<vmem>>, vector<1x1x8x8x8xf32>
    %23 = vector.shape_cast %22 : vector<1x1x8x8x8xf32> to vector<8x8x8xf32>
    %24 = vector.shape_cast %23 : vector<8x8x8xf32> to vector<64x8xf32>
    %c1_32 = arith.constant 1 : index
    %c0_33 = arith.constant 0 : index
    %c0_34 = arith.constant 0 : index
    %c0_35 = arith.constant 0 : index
    %25 = vector.load %arg2[%c1_32, %c0_33, %c0_34, %c0_35] : memref<3x3x8x8xf32, #tpu.memory_space<vmem>>, vector<1x1x8x8xf32>
    %26 = vector.shape_cast %25 : vector<1x1x8x8xf32> to vector<8x8xf32>
    %cst_36 = arith.constant dense<0.000000e+00> : vector<64x8xf32>
    %27 = tpu.matmul %24, %26, %cst_36 {dimension_numbers = #tpu.dot_dimension_numbers<[1], [0], [0], [1], [0, 0, 1, 1], [], []>} : vector<64x8xf32>, vector<8x8xf32>, vector<64x8xf32> -> vector<64x8xf32>
    %28 = arith.addf %21, %27 : vector<64x8xf32>
    %c0_37 = arith.constant 0 : index
    %c0_38 = arith.constant 0 : index
    %c1_39 = arith.constant 1 : index
    %c1_40 = arith.constant 1 : index
    %c0_41 = arith.constant 0 : index
    %29 = vector.load %arg1[%c0_37, %c0_38, %c1_39, %c1_40, %c0_41] : memref<1x1x10x10x8xf32, #tpu.memory_space<vmem>>, vector<1x1x8x8x8xf32>
    %30 = vector.shape_cast %29 : vector<1x1x8x8x8xf32> to vector<8x8x8xf32>
    %31 = vector.shape_cast %30 : vector<8x8x8xf32> to vector<64x8xf32>
    %c1_42 = arith.constant 1 : index
    %c1_43 = arith.constant 1 : index
    %c0_44 = arith.constant 0 : index
    %c0_45 = arith.constant 0 : index
    %32 = vector.load %arg2[%c1_42, %c1_43, %c0_44, %c0_45] : memref<3x3x8x8xf32, #tpu.memory_space<vmem>>, vector<1x1x8x8xf32>
    %33 = vector.shape_cast %32 : vector<1x1x8x8xf32> to vector<8x8xf32>
    %cst_46 = arith.constant dense<0.000000e+00> : vector<64x8xf32>
    %34 = tpu.matmul %31, %33, %cst_46 {dimension_numbers = #tpu.dot_dimension_numbers<[1], [0], [0], [1], [0, 0, 1, 1], [], []>} : vector<64x8xf32>, vector<8x8xf32>, vector<64x8xf32> -> vector<64x8xf32>
    %35 = arith.addf %28, %34 : vector<64x8xf32>
    %c0_47 = arith.constant 0 : index
    %c0_48 = arith.constant 0 : index
    %c1_49 = arith.constant 1 : index
    %c2_50 = arith.constant 2 : index
    %c0_51 = arith.constant 0 : index
    %36 = vector.load %arg1[%c0_47, %c0_48, %c1_49, %c2_50, %c0_51] : memref<1x1x10x10x8xf32, #tpu.memory_space<vmem>>, vector<1x1x8x8x8xf32>
    %37 = vector.shape_cast %36 : vector<1x1x8x8x8xf32> to vector<8x8x8xf32>
    %38 = vector.shape_cast %37 : vector<8x8x8xf32> to vector<64x8xf32>
    %c1_52 = arith.constant 1 : index
    %c2_53 = arith.constant 2 : index
    %c0_54 = arith.constant 0 : index
    %c0_55 = arith.constant 0 : index
    %39 = vector.load %arg2[%c1_52, %c2_53, %c0_54, %c0_55] : memref<3x3x8x8xf32, #tpu.memory_space<vmem>>, vector<1x1x8x8xf32>
    %40 = vector.shape_cast %39 : vector<1x1x8x8xf32> to vector<8x8xf32>
    %cst_56 = arith.constant dense<0.000000e+00> : vector<64x8xf32>
    %41 = tpu.matmul %38, %40, %cst_56 {dimension_numbers = #tpu.dot_dimension_numbers<[1], [0], [0], [1], [0, 0, 1, 1], [], []>} : vector<64x8xf32>, vector<8x8xf32>, vector<64x8xf32> -> vector<64x8xf32>
    %42 = arith.addf %35, %41 : vector<64x8xf32>
    %c0_57 = arith.constant 0 : index
    %c0_58 = arith.constant 0 : index
    %c2_59 = arith.constant 2 : index
    %c0_60 = arith.constant 0 : index
    %c0_61 = arith.constant 0 : index
    %43 = vector.load %arg1[%c0_57, %c0_58, %c2_59, %c0_60, %c0_61] : memref<1x1x10x10x8xf32, #tpu.memory_space<vmem>>, vector<1x1x8x8x8xf32>
    %44 = vector.shape_cast %43 : vector<1x1x8x8x8xf32> to vector<8x8x8xf32>
    %45 = vector.shape_cast %44 : vector<8x8x8xf32> to vector<64x8xf32>
    %c2_62 = arith.constant 2 : index
    %c0_63 = arith.constant 0 : index
    %c0_64 = arith.constant 0 : index
    %c0_65 = arith.constant 0 : index
    %46 = vector.load %arg2[%c2_62, %c0_63, %c0_64, %c0_65] : memref<3x3x8x8xf32, #tpu.memory_space<vmem>>, vector<1x1x8x8xf32>
    %47 = vector.shape_cast %46 : vector<1x1x8x8xf32> to vector<8x8xf32>
    %cst_66 = arith.constant dense<0.000000e+00> : vector<64x8xf32>
    %48 = tpu.matmul %45, %47, %cst_66 {dimension_numbers = #tpu.dot_dimension_numbers<[1], [0], [0], [1], [0, 0, 1, 1], [], []>} : vector<64x8xf32>, vector<8x8xf32>, vector<64x8xf32> -> vector<64x8xf32>
    %49 = arith.addf %42, %48 : vector<64x8xf32>
    %c0_67 = arith.constant 0 : index
    %c0_68 = arith.constant 0 : index
    %c2_69 = arith.constant 2 : index
    %c1_70 = arith.constant 1 : index
    %c0_71 = arith.constant 0 : index
    %50 = vector.load %arg1[%c0_67, %c0_68, %c2_69, %c1_70, %c0_71] : memref<1x1x10x10x8xf32, #tpu.memory_space<vmem>>, vector<1x1x8x8x8xf32>
    %51 = vector.shape_cast %50 : vector<1x1x8x8x8xf32> to vector<8x8x8xf32>
    %52 = vector.shape_cast %51 : vector<8x8x8xf32> to vector<64x8xf32>
    %c2_72 = arith.constant 2 : index
    %c1_73 = arith.constant 1 : index
    %c0_74 = arith.constant 0 : index
    %c0_75 = arith.constant 0 : index
    %53 = vector.load %arg2[%c2_72, %c1_73, %c0_74, %c0_75] : memref<3x3x8x8xf32, #tpu.memory_space<vmem>>, vector<1x1x8x8xf32>
    %54 = vector.shape_cast %53 : vector<1x1x8x8xf32> to vector<8x8xf32>
    %cst_76 = arith.constant dense<0.000000e+00> : vector<64x8xf32>
    %55 = tpu.matmul %52, %54, %cst_76 {dimension_numbers = #tpu.dot_dimension_numbers<[1], [0], [0], [1], [0, 0, 1, 1], [], []>} : vector<64x8xf32>, vector<8x8xf32>, vector<64x8xf32> -> vector<64x8xf32>
    %56 = arith.addf %49, %55 : vector<64x8xf32>
    %c0_77 = arith.constant 0 : index
    %c0_78 = arith.constant 0 : index
    %c2_79 = arith.constant 2 : index
    %c2_80 = arith.constant 2 : index
    %c0_81 = arith.constant 0 : index
    %57 = vector.load %arg1[%c0_77, %c0_78, %c2_79, %c2_80, %c0_81] : memref<1x1x10x10x8xf32, #tpu.memory_space<vmem>>, vector<1x1x8x8x8xf32>
    %58 = vector.shape_cast %57 : vector<1x1x8x8x8xf32> to vector<8x8x8xf32>
    %59 = vector.shape_cast %58 : vector<8x8x8xf32> to vector<64x8xf32>
    %c2_82 = arith.constant 2 : index
    %c2_83 = arith.constant 2 : index
    %c0_84 = arith.constant 0 : index
    %c0_85 = arith.constant 0 : index
    %60 = vector.load %arg2[%c2_82, %c2_83, %c0_84, %c0_85] : memref<3x3x8x8xf32, #tpu.memory_space<vmem>>, vector<1x1x8x8xf32>
    %61 = vector.shape_cast %60 : vector<1x1x8x8xf32> to vector<8x8xf32>
    %cst_86 = arith.constant dense<0.000000e+00> : vector<64x8xf32>
    %62 = tpu.matmul %59, %61, %cst_86 {dimension_numbers = #tpu.dot_dimension_numbers<[1], [0], [0], [1], [0, 0, 1, 1], [], []>} : vector<64x8xf32>, vector<8x8xf32>, vector<64x8xf32> -> vector<64x8xf32>
    %63 = arith.addf %56, %62 : vector<64x8xf32>
    %c0_87 = arith.constant 0 : index
    %c0_88 = arith.constant 0 : index
    %64 = vector.load %arg3[%c0_87, %c0_88] : memref<1x8xf32, #tpu.memory_space<vmem>>, vector<1x8xf32>
    %65 = vector.broadcast %64 : vector<1x8xf32> to vector<64x8xf32>
    %66 = arith.addf %63, %65 : vector<64x8xf32>
    %cst_89 = arith.constant 2.000000e+01 : f32
    %67 = vector.broadcast %cst_89 : f32 to vector<64x8xf32>
    %68 = arith.minimumf %66, %67 : vector<64x8xf32>
    %69 = math.exp %68 : vector<64x8xf32>
    %cst_90 = arith.constant 2.000000e+00 : f32
    %70 = vector.broadcast %cst_90 : f32 to vector<64x8xf32>
    %71 = arith.addf %69, %70 : vector<64x8xf32>
    %72 = arith.mulf %69, %71 : vector<64x8xf32>
    %73 = arith.mulf %66, %72 : vector<64x8xf32>
    %cst_91 = arith.constant 2.000000e+00 : f32
    %74 = vector.broadcast %cst_91 : f32 to vector<64x8xf32>
    %75 = arith.addf %72, %74 : vector<64x8xf32>
    %76 = tpu.reciprocal %75 {approx = true} : vector<64x8xf32> -> vector<64x8xf32>
    %77 = arith.mulf %73, %76 : vector<64x8xf32>
    %c0_92 = arith.constant 0 : index
    %c0_93 = arith.constant 0 : index
    %c0_94 = arith.constant 0 : index
    %78 = vector.load %arg4[%c0_92, %c0_93, %c0_94] : memref<1x64x8xbf16, #tpu.memory_space<vmem>>, vector<1x64x8xbf16>
    %79 = vector.shape_cast %78 : vector<1x64x8xbf16> to vector<64x8xbf16>
    %80 = arith.extf %79 : vector<64x8xbf16> to vector<64x8xf32>
    %81 = arith.addf %77, %80 : vector<64x8xf32>
    %82 = arith.truncf %81 : vector<64x8xf32> to vector<64x8xbf16>
    %c0_95 = arith.constant 0 : index
    %c0_96 = arith.constant 0 : index
    %c0_97 = arith.constant 0 : index
    %83 = vector.load %arg5[%c0_95, %c0_96, %c0_97] : memref<1x64x8xbf16, #tpu.memory_space<vmem>>, vector<1x64x8xbf16>
    %84 = vector.shape_cast %83 : vector<1x64x8xbf16> to vector<64x8xbf16>
    %85 = vector.shape_cast %82 : vector<64x8xbf16> to vector<1x64x8xbf16>
    tpu.vector_store %arg5[%c0_95, %c0_96, %c0_97], %85 {strides = array<i32>} : memref<1x64x8xbf16, #tpu.memory_space<vmem>>, vector<1x64x8xbf16>,
    return
  }
  func.func @transform_0(%arg0: i32) -> (i32, i32, i32, i32, i32) {
    %c0_i32 = arith.constant 0 : i32
    %c0_i32_0 = arith.constant 0 : i32
    %c0_i32_1 = arith.constant 0 : i32
    %c0_i32_2 = arith.constant 0 : i32
    %c0_i32_3 = arith.constant 0 : i32
    return %arg0, %c0_i32, %c0_i32_0, %c0_i32_1, %c0_i32_2 : i32, i32, i32, i32, i32
  }
  func.func @transform_1(%arg0: i32) -> (i32, i32, i32, i32) {
    %c0_i32 = arith.constant 0 : i32
    %c0_i32_0 = arith.constant 0 : i32
    %c0_i32_1 = arith.constant 0 : i32
    %c0_i32_2 = arith.constant 0 : i32
    %c0_i32_3 = arith.constant 0 : i32
    return %c0_i32, %c0_i32_0, %c0_i32_1, %c0_i32_2 : i32, i32, i32, i32
  }
  func.func @transform_2(%arg0: i32) -> (i32, i32) {
    %c0_i32 = arith.constant 0 : i32
    %c0_i32_0 = arith.constant 0 : i32
    %c0_i32_1 = arith.constant 0 : i32
    return %c0_i32, %c0_i32_0 : i32, i32
  }
  func.func @transform_3(%arg0: i32) -> (i32, i32, i32) {
    %c0_i32 = arith.constant 0 : i32
    %c0_i32_0 = arith.constant 0 : i32
    %c0_i32_1 = arith.constant 0 : i32
    return %arg0, %c0_i32, %c0_i32_0 : i32, i32, i32
  }
  func.func @transform_4(%arg0: i32) -> (i32, i32, i32) {
    %c0_i32 = arith.constant 0 : i32
    %c0_i32_0 = arith.constant 0 : i32
    %c0_i32_1 = arith.constant 0 : i32
    return %arg0, %c0_i32, %c0_i32_0 : i32, i32, i32
  }
}

</mosaic_0001>

<bundles_post_ra>
// kernel: csp_block_forward.7
= control target key start
LH: loop header
LB: loop body
LE: loop exit
PB: predicated region body
PF: predicated region fallthrough
CT: control target
= control target key end

     0   :  { %8 = vsyncpa [#allocation3], 0  ;;  %s955_s0 = inlined_call_operand.hbm [shape: bf16[128,8], index: 0, kind: input, shape index: {}]   ;;  %s956_s1 = inlined_call_operand.hbm [shape: bf16[8,8], index: 1, kind: input, shape index: {}]   ;;  %s957_s2 = inlined_call_operand.hbm [shape: f32[1,8], index: 2, kind: input, shape index: {}]   ;;  %s958_s3 = inlined_call_operand.hbm [shape: bf16[128,8], index: 3, kind: output, shape index: {}]  }
   0x1   :  { %9 = vsyncpa [#allocation6], 0 }
   0x2   :  { %10 = vsyncpa [#allocation4], 0  ;;  %s738_s12 = smov [#allocation5]   ;;  %s739_s14 = smov [#allocation2]  }
   0x3   :  { %s29_s13 = sshll.u32 %s738_s12, 4  ;;  %s16_s15 = sshll.u32 %s739_s14, 4  ;;  %s30_s13 = int_to_ptr.vmem [resolvable:$true] %s29_s13  ;;  %s764_s15 = int_to_ptr.vmem [resolvable:$true] %s16_s15 }
   0x4   :  { %s644_s18 = scalar_lea.hbm %s956_s1, 64 }
   0x5   :  { %p645_p0 = scmp.ne.s32.totalorder %s956_s1, %s644_s18  ;;  %p648_p1 = scmp.lt.u32.totalorder %s644_s18, %s956_s1 }
   0x7   :  { %p650_p2 = pnand %p648_p1, %p645_p0 }
   0x9   :  { %653 = shalt.err (!%p650_p2)
}
   0xa   :  { %s654_s23 = scalar_lea.vmem %s30_s13, 64  ;;  %p659_p4 = scmp.lt.s32.totalorder %s30_s13, %s30_s13 }
   0xb   :  { %p655_p3 = scmp.ne.s32.totalorder %s30_s13, %s654_s23  ;;  %p660_p5 = scmp.lt.s32.totalorder %s654_s23, %s654_s23 }
   0xd   :  { %p661_p6 = por %p660_p5, %p659_p4 }
   0xf   :  { %p662_p7 = pnand %p661_p6, %p655_p3 }
  0x11   :  { %665 = shalt.err (!%p662_p7)
}
  0x12   :  { %32 = dma.hbm_to_vmem [thread:$0]  %s956_s1, 64, %s30_s13, [#allocation6]  }
  0x13   :  { %s666_s28 = scalar_lea.hbm %s955_s0, 1024 }
  0x14   :  { %p667_p8 = scmp.ne.s32.totalorder %s955_s0, %s666_s28  ;;  %p670_p9 = scmp.lt.u32.totalorder %s666_s28, %s955_s0 }
  0x16   :  { %p672_p10 = pnand %p670_p9, %p667_p8 }
  0x18   :  { %675 = shalt.err (!%p672_p10)
}
  0x19   :  { %s676_s6 = scalar_lea.vmem %s764_s15, 1024  ;;  %p681_p12 = scmp.lt.s32.totalorder %s764_s15, %s764_s15 }
  0x1a   :  { %p677_p11 = scmp.ne.s32.totalorder %s764_s15, %s676_s6  ;;  %p682_p13 = scmp.lt.s32.totalorder %s676_s6, %s676_s6 }
  0x1c   :  { %p683_p0 = por %p682_p13, %p681_p12 }
  0x1e   :  { %p684_p1 = pnand %p683_p0, %p677_p11 }
  0x20   :  { %687 = shalt.err (!%p684_p1)
}
  0x21   :  { %s740_s1 = smov 64   ;;  %s741_s7 = smov 4  }
  0x22   :  { %22 = dma.hbm_to_vmem [thread:$0]  %s955_s0, 1024, %s764_s15, [#allocation3], %s740_s1, %s740_s1, %s741_s7  }
  0x23   :  { %s742_s10 = smov [#allocation7]   ;;  %s688_s14 = scalar_lea.hbm %s957_s2, 16 }
  0x24   :  { %s39_s11 = sshll.u32 %s742_s10, 4  ;;  %p689_p2 = scmp.ne.s32.totalorder %s957_s2, %s688_s14  ;;  %s40_s11 = int_to_ptr.vmem [resolvable:$true] %s39_s11 }
  0x25   :  { %p692_p3 = scmp.lt.u32.totalorder %s688_s14, %s957_s2 }
  0x27   :  { %p694_p4 = pnand %p692_p3, %p689_p2 }
  0x29   :  { %697 = shalt.err (!%p694_p4)
}
  0x2a   :  { %s698_s20 = scalar_lea.vmem %s40_s11, 16  ;;  %s702_s0 = scalar_lea.vmem %s40_s11, 32 }
  0x2b   :  { %p699_p5 = scmp.ne.s32.totalorder %s40_s11, %s698_s20  ;;  %p703_p6 = scmp.lt.s32.totalorder %s40_s11, %s40_s11 }
  0x2c   :  { %p704_p7 = scmp.lt.s32.totalorder %s702_s0, %s698_s20 }
  0x2e   :  { %p705_p8 = por %p704_p7, %p703_p6 }
  0x30   :  { %p706_p9 = pnand %p705_p8, %p699_p5 }
  0x32   :  { %709 = shalt.err (!%p706_p9)
}
  0x33   :  { %42 = dma.hbm_to_vmem [thread:$0]  %s957_s2, 16, %s40_s11, [#allocation6]  }
  0x34   :  { %732 = dma.done.wait [#allocation3], 1024  }
  0x35   :  { %733 = vsyncadd [#allocation3], 4294966272 }
  0x36   :  { %734 = dma.done.wait [#allocation6], 80  }
  0x37   :  { %735 = vsyncadd [#allocation6], 4294967216  ;;  %vm142_vm0 = vcmask 1043456   ;;  %vm117_vm1 = vcmask 64512   ;;  %v69_v0 = vld [vmem:[#allocation5] sm:$0xf] }
  0x38   :  { %564 = vmatprep.subr.msk.bf16.mxu0 %vm142_vm0, %v69_v0  ;;  %565 = vmatprep.subr.msk.bf16.mxu1 %vm142_vm0, %v69_v0  ;;  %v144_v1 = vsel %vm142_vm0, %v69_v0, 0  ;;  %v572_v2 = vld [vmem:[#allocation2] sm:$0xff]   ;;  %v574_v4 = vld [vmem:[#allocation2 + $0x8] sm:$0xff]   ;;  %v576_v6 = vld [vmem:[#allocation2 + $0x10] sm:$0xff]   ;;  %vm451_vm2 = vcmask 60416   ;;  %s743_s2 = smov [#allocation8]  }
  0x39   :  { %545 = vmatpush3.bf16.msra.mxu0 %v144_v1  ;;  %563 = vmatpush3.bf16.msra.mxu1 %v144_v1  ;;  %v573_v3 = vld [vmem:[#allocation2 + $0x20] sm:$0xff]   ;;  %v575_v5 = vld [vmem:[#allocation2 + $0x28] sm:$0xff]   ;;  %v577_v7 = vld [vmem:[#allocation2 + $0x30] sm:$0xff]   ;;  %s473_s22 = sshll.u32 %s743_s2, 4  ;;  %s474_s22 = int_to_ptr.vmem [resolvable:$true] %s473_s22 }
  0x3a   :  { %546 = vmatprep.mubr.msk.bf16.mxu0 %vm117_vm1, %v572_v2  ;;  %554 = vmatprep.mubr.msk.bf16.mxu1 %vm117_vm1, %v573_v3  ;;  %v578_v8 = vld [vmem:[#allocation2 + $0x18] sm:$0xff]   ;;  %v818_v10 = vld [vmem:[#allocation7] ss:$0 sm:$0xff]  ;;  %s710_s23 = scalar_lea.vmem %s474_s22, 1024  ;;  %p715_p11 = scmp.lt.s32.totalorder %s474_s22, %s474_s22 }
  0x3b   :  { %v579_v9 = vld [vmem:[#allocation2 + $0x38] sm:$0xff]   ;;  %p711_p10 = scmp.ne.s32.totalorder %s474_s22, %s710_s23  ;;  %p716_p12 = scmp.lt.s32.totalorder %s710_s23, %s710_s23 }
  0x3c   :  { %547 = vmatmul.mubr.msk.bf16.vlgmr.msra.gmra.mrb[0].mxu0 %vm117_vm1, %v574_v4  ;;  %555 = vmatmul.mubr.msk.bf16.vlgmr.msra.gmra.mrb[0].mxu1 %vm117_vm1, %v575_v5 }
  0x3d   :  { %550 = vmatprep.mubr.msk.bf16.mxu0 %vm117_vm1, %v576_v6  ;;  %558 = vmatprep.mubr.msk.bf16.mxu1 %vm117_vm1, %v577_v7  ;;  %p717_p13 = por %p716_p12, %p715_p11 }
  0x3f   :  { %p718_p0 = pnand %p717_p13, %p711_p10 }
  0x44   :  { %551 = vmatmul.mubr.msk.bf16.gmra.mrb[4].mxu0 %vm117_vm1, %v578_v8  ;;  %559 = vmatmul.mubr.msk.bf16.gmra.mrb[4].mxu1 %vm117_vm1, %v579_v9 }
 0x10f   :  { %v548_v11 = vpop.f32.mrb[0].mxu0  ;;  %v556_v13 = vpop.f32.mrb[0].mxu1 }
 0x110   :  { %v821_v12 = vadd.f32 %v548_v11, %v818_v10  ;;  %v180_v14 = vpop.f32.mrb[1].mxu0  ;;  %v824_v15 = vadd.f32 %v556_v13, %v818_v10  ;;  %v212_v17 = vpop.f32.mrb[1].mxu1 }
 0x111   :  { %v827_v16 = vadd.f32 %v818_v10, %v180_v14  ;;  %v549_v18 = vpop.f32.mrb[2].mxu0  ;;  %v831_v20 = vadd.f32 %v818_v10, %v212_v17  ;;  %v557_v22 = vpop.f32.mrb[2].mxu1 }
 0x112   :  { %v245_v19 = vmin.f32 %v821_v12, 20.0  ;;  %v834_v21 = vadd.f32 %v549_v18, %v818_v10  ;;  %v183_v23 = vpop.f32.mrb[3].mxu0  ;;  %v253_v24 = vmin.f32 %v824_v15, 20.0  ;;  %v839_v26 = vadd.f32 %v557_v22, %v818_v10  ;;  %v215_v28 = vpop.f32.mrb[3].mxu1 }
 0x113   :  { %v243_v25 = vmin.f32 %v827_v16, 20.0  ;;  %v842_v27 = vadd.f32 %v818_v10, %v183_v23  ;;  %v251_v30 = vmin.f32 %v831_v20, 20.0  ;;  %v847_v32 = vadd.f32 %v818_v10, %v215_v28 }
 0x114   :  { %v263_v29 = vmul.f32 1.442695, %v245_v19  ;;  %v246_v31 = vmin.f32 %v834_v21, 20.0  ;;  %v279_v33 = vmul.f32 1.442695, %v253_v24  ;;  %v254_v35 = vmin.f32 %v839_v26, 20.0 }
 0x115   :  { %v259_v34 = vmul.f32 1.442695, %v243_v25  ;;  %v244_v36 = vmin.f32 %v842_v27, 20.0  ;;  %v275_v37 = vmul.f32 1.442695, %v251_v30  ;;  %v252_v39 = vmin.f32 %v847_v32, 20.0 }
 0x116   :  { %580 = vpow2.f32 %v263_v29  ;;  %v265_v38 = vmul.f32 1.442695, %v246_v31  ;;  %v281_v40 = vmul.f32 1.442695, %v254_v35 }
 0x117   :  { %582 = vpow2.f32 %v279_v33  ;;  %v552_v41 = vpop.f32.mrb[4].mxu0  ;;  %v261_v42 = vmul.f32 1.442695, %v244_v36  ;;  %v560_v44 = vpop.f32.mrb[4].mxu1  ;;  %v277_v46 = vmul.f32 1.442695, %v252_v39 }
 0x118   :  { %584 = vpow2.f32 %v259_v34  ;;  %v853_v43 = vadd.f32 %v552_v41, %v818_v10  ;;  %v196_v45 = vpop.f32.mrb[5].mxu0  ;;  %v856_v47 = vadd.f32 %v560_v44, %v818_v10  ;;  %v228_v49 = vpop.f32.mrb[5].mxu1 }
 0x119   :  { %586 = vpow2.f32 %v275_v37  ;;  %v859_v48 = vadd.f32 %v818_v10, %v196_v45  ;;  %v553_v50 = vpop.f32.mrb[6].mxu0  ;;  %v863_v52 = vadd.f32 %v818_v10, %v228_v49  ;;  %v561_v54 = vpop.f32.mrb[6].mxu1 }
 0x11a   :  { %588 = vpow2.f32 %v265_v38  ;;  %v249_v51 = vmin.f32 %v853_v43, 20.0  ;;  %v866_v53 = vadd.f32 %v553_v50, %v818_v10  ;;  %v199_v55 = vpop.f32.mrb[7].mxu0  ;;  %v257_v56 = vmin.f32 %v856_v47, 20.0  ;;  %v231_v59 = vpop.f32.mrb[7].mxu1 }
 0x11b   :  { %590 = vpow2.f32 %v281_v40  ;;  %v247_v57 = vmin.f32 %v859_v48, 20.0  ;;  %v871_v58 = vadd.f32 %v561_v54, %v818_v10  ;;  %v255_v61 = vmin.f32 %v863_v52, 20.0 }
 0x11c   :  { %592 = vpow2.f32 %v261_v42  ;;  %v271_v60 = vmul.f32 1.442695, %v249_v51  ;;  %v250_v62 = vmin.f32 %v866_v53, 20.0  ;;  %v287_v63 = vmul.f32 1.442695, %v257_v56 }
 0x11d   :  { %594 = vpow2.f32 %v277_v46  ;;  %v267_v0 = vmul.f32 1.442695, %v247_v57  ;;  %v258_v1 = vmin.f32 %v871_v58, 20.0  ;;  %v283_v2 = vmul.f32 1.442695, %v255_v61 }
 0x11e   :  { %596 = vpow2.f32 %v271_v60  ;;  %v877_v3 = vadd.f32 %v818_v10, %v199_v55  ;;  %v273_v5 = vmul.f32 1.442695, %v250_v62  ;;  %v881_v25 = vadd.f32 %v818_v10, %v231_v59 }
 0x11f   :  { %598 = vpow2.f32 %v287_v63  ;;  %v289_v9 = vmul.f32 1.442695, %v258_v1 }
 0x120   :  { %v581_v4 = vpop.eup %580  ;;  %600 = vpow2.f32 %v267_v0  ;;  %v248_v6 = vmin.f32 %v877_v3, 20.0  ;;  %v256_v51 = vmin.f32 %v881_v25, 20.0 }
 0x121   :  { %v583_v7 = vpop.eup %582  ;;  %v293_v8 = vadd.f32 2.0, %v581_v4  ;;  %602 = vpow2.f32 %v283_v2 }
 0x122   :  { %v585_v11 = vpop.eup %584  ;;  %v301_v13 = vadd.f32 2.0, %v583_v7  ;;  %v269_v14 = vmul.f32 1.442695, %v248_v6  ;;  %604 = vpow2.f32 %v273_v5  ;;  %v285_v6 = vmul.f32 1.442695, %v256_v51 }
 0x123   :  { %v587_v17 = vpop.eup %586  ;;  %v309_v18 = vmul.f32 %v581_v4, %v293_v8  ;;  %v291_v19 = vadd.f32 2.0, %v585_v11  ;;  %606 = vpow2.f32 %v289_v9 }
 0x124   :  { %v589_v22 = vpop.eup %588  ;;  %v317_v23 = vmul.f32 %v583_v7, %v301_v13  ;;  %v299_v24 = vadd.f32 2.0, %v587_v17  ;;  %608 = vpow2.f32 %v269_v14 }
 0x125   :  { %v591_v28 = vpop.eup %590  ;;  %v341_v29 = vadd.f32 2.0, %v309_v18  ;;  %v307_v30 = vmul.f32 %v585_v11, %v291_v19  ;;  %v294_v31 = vadd.f32 2.0, %v589_v22  ;;  %v325_v8 = vmul.f32 %v309_v18, %v821_v12 }
 0x126   :  { %v593_v33 = vpop.eup %592  ;;  %v349_v34 = vadd.f32 2.0, %v317_v23  ;;  %v315_v35 = vmul.f32 %v587_v17, %v299_v24  ;;  %v302_v36 = vadd.f32 2.0, %v591_v28  ;;  %v333_v9 = vmul.f32 %v317_v23, %v824_v15 }
 0x127   :  { %v595_v37 = vpop.eup %594  ;;  %610 = vrcp.f32 %v341_v29  ;;  %v339_v38 = vadd.f32 2.0, %v307_v30  ;;  %v310_v39 = vmul.f32 %v589_v22, %v294_v31  ;;  %v292_v45 = vadd.f32 2.0, %v593_v33 }
 0x128   :  { %v597_v40 = vpop.eup %596  ;;  %612 = vrcp.f32 %v349_v34  ;;  %v347_v41 = vadd.f32 2.0, %v315_v35  ;;  %v318_v42 = vmul.f32 %v591_v28, %v302_v36  ;;  %v300_v50 = vadd.f32 2.0, %v595_v37 }
 0x129   :  { %v599_v10 = vpop.eup %598  ;;  %614 = vrcp.f32 %v339_v38  ;;  %v342_v44 = vadd.f32 2.0, %v310_v39  ;;  %v884_v55 = vmul.f32 %v593_v33, %v292_v45  ;;  %v297_v56 = vadd.f32 2.0, %v597_v40 }
 0x12a   :  { %v601_v46 = vpop.eup %600  ;;  %616 = vrcp.f32 %v347_v41  ;;  %v350_v49 = vadd.f32 2.0, %v318_v42  ;;  %v305_v57 = vadd.f32 2.0, %v599_v10  ;;  %v886_v59 = vmul.f32 %v595_v37, %v300_v50 }
 0x12b   :  { %v603_v54 = vpop.eup %602  ;;  %618 = vrcp.f32 %v342_v44  ;;  %v295_v60 = vadd.f32 2.0, %v601_v46  ;;  %v340_v62 = vadd.f32 2.0, %v884_v55  ;;  %v889_v63 = vmul.f32 %v597_v40, %v297_v56 }
 0x12c   :  { %620 = vrcp.f32 %v350_v49  ;;  %v303_v61 = vadd.f32 2.0, %v603_v54  ;;  %v891_v0 = vmul.f32 %v599_v10, %v305_v57  ;;  %v605_v1 = vpop.eup %604  ;;  %v348_v2 = vadd.f32 2.0, %v886_v59 }
 0x12d   :  { %v894_v4 = vmul.f32 %v601_v46, %v295_v60  ;;  %v607_v7 = vpop.eup %606  ;;  %622 = vrcp.f32 %v340_v62  ;;  %v345_v11 = vadd.f32 2.0, %v889_v63  ;;  %v323_v14 = vmul.f32 %v307_v30, %v827_v16 }
 0x12e   :  { %v896_v5 = vmul.f32 %v603_v54, %v303_v61  ;;  %v609_v13 = vpop.eup %608  ;;  %624 = vrcp.f32 %v348_v2  ;;  %v353_v17 = vadd.f32 2.0, %v891_v0  ;;  %v331_v24 = vmul.f32 %v315_v35, %v831_v20 }
 0x12f   :  { %v343_v19 = vadd.f32 2.0, %v894_v4  ;;  %626 = vrcp.f32 %v345_v11  ;;  %v298_v12 = vadd.f32 2.0, %v605_v1  ;;  %v326_v23 = vmul.f32 %v310_v39, %v834_v21 }
 0x130   :  { %v351_v28 = vadd.f32 2.0, %v896_v5  ;;  %628 = vrcp.f32 %v353_v17  ;;  %v306_v29 = vadd.f32 2.0, %v607_v7  ;;  %v296_v33 = vadd.f32 2.0, %v609_v13 }
 0x131   :  { %v611_v22 = vpop.eup %610  ;;  %630 = vrcp.f32 %v343_v19  ;;  %v314_v30 = vmul.f32 %v605_v1, %v298_v12  ;;  %v334_v41 = vmul.f32 %v318_v42, %v839_v26  ;;  %v324_v54 = vmul.f32 %v884_v55, %v842_v27 }
 0x132   :  { %v613_v18 = vpop.eup %612  ;;  %v373_v15 = vmul.f32 %v611_v22, %v325_v8  ;;  %632 = vrcp.f32 %v351_v28  ;;  %v322_v20 = vmul.f32 %v607_v7, %v306_v29  ;;  %v312_v50 = vmul.f32 %v609_v13, %v296_v33 }
 0x133   :  { %v615_v31 = vpop.eup %614  ;;  %v381_v16 = vmul.f32 %v613_v18, %v333_v9  ;;  %v346_v10 = vadd.f32 2.0, %v314_v30  ;;  %v332_v56 = vmul.f32 %v886_v59, %v847_v32  ;;  %v329_v62 = vmul.f32 %v889_v63, %v853_v43 }
 0x134   :  { %v617_v34 = vpop.eup %616  ;;  %v521_v36 = vpack.c.bf16 %v373_v15, %v373_v15  ;;  %v371_v37 = vmul.f32 %v615_v31, %v323_v14  ;;  %v354_v45 = vadd.f32 2.0, %v322_v20  ;;  %v344_v57 = vadd.f32 2.0, %v312_v50 }
 0x135   :  { %v619_v35 = vpop.eup %618  ;;  %v529_v38 = vpack.c.bf16 %v381_v16, %v381_v16  ;;  %v379_v40 = vmul.f32 %v617_v34, %v331_v24  ;;  %634 = vrcp.f32 %v346_v10  ;;  %v337_v55 = vmul.f32 %v891_v0, %v856_v47 }
 0x136   :  { %v621_v44 = vpop.eup %620  ;;  %454 = vst.msk [vmem:[#allocation8 + $0x8] sm:$0xf] %vm451_vm2, %v521_v36  ;;  %v519_v21 = vpack.c.bf16 %v371_v37, %v371_v37  ;;  %v374_v39 = vmul.f32 %v619_v35, %v326_v23  ;;  %636 = vrcp.f32 %v354_v45  ;;  %v327_v59 = vmul.f32 %v894_v4, %v859_v48 }
 0x137   :  { %462 = vst.msk [vmem:[#allocation8 + $0x28] sm:$0xf] %vm451_vm2, %v529_v38  ;;  %v527_v46 = vpack.c.bf16 %v379_v40, %v379_v40  ;;  %v382_v49 = vmul.f32 %v621_v44, %v334_v41  ;;  %v623_v26 = vpop.eup %622  ;;  %638 = vpow2.f32 %v285_v6  ;;  %v335_v43 = vmul.f32 %v896_v5, %v863_v52 }
 0x138   :  { %452 = vst.msk [vmem:[#allocation8] sm:$0xf] %vm451_vm2, %v519_v21  ;;  %v522_v51 = vpack.c.bf16 %v374_v39, %v374_v39  ;;  %v625_v60 = vpop.eup %624  ;;  %v372_v61 = vmul.f32 %v623_v26, %v324_v54  ;;  %640 = vrcp.f32 %v344_v57  ;;  %v330_v48 = vmul.f32 %v314_v30, %v866_v53 }
 0x139   :  { %460 = vst.msk [vmem:[#allocation8 + $0x20] sm:$0xf] %vm451_vm2, %v527_v46  ;;  %v530_v42 = vpack.c.bf16 %v382_v49, %v382_v49  ;;  %v627_v1 = vpop.eup %626  ;;  %v380_v27 = vmul.f32 %v625_v60, %v332_v56  ;;  %v338_v52 = vmul.f32 %v322_v20, %v871_v58  ;;  %v328_v12 = vmul.f32 %v312_v50, %v877_v3 }
 0x13a   :  { %455 = vst.msk [vmem:[#allocation8 + $0xc] sm:$0xf] %vm451_vm2, %v522_v51  ;;  %v629_v2 = vpop.eup %628  ;;  %v520_v7 = vpack.c.bf16 %v372_v61, %v372_v61  ;;  %v377_v32 = vmul.f32 %v627_v1, %v329_v62 }
 0x13b   :  { %463 = vst.msk [vmem:[#allocation8 + $0x2c] sm:$0xf] %vm451_vm2, %v530_v42  ;;  %v631_v6 = vpop.eup %630  ;;  %v528_v8 = vpack.c.bf16 %v380_v27, %v380_v27  ;;  %v385_v9 = vmul.f32 %v629_v2, %v337_v55 }
 0x13c   :  { %v633_v63 = vpop.eup %632  ;;  %453 = vst.msk [vmem:[#allocation8 + $0x4] sm:$0xf] %vm451_vm2, %v520_v7  ;;  %v525_v11 = vpack.c.bf16 %v377_v32, %v377_v32  ;;  %v375_v13 = vmul.f32 %v631_v6, %v327_v59 }
 0x13d   :  { %461 = vst.msk [vmem:[#allocation8 + $0x24] sm:$0xf] %vm451_vm2, %v528_v8  ;;  %v533_v47 = vpack.c.bf16 %v385_v9, %v385_v9  ;;  %v383_v0 = vmul.f32 %v633_v63, %v335_v43 }
 0x13e   :  { %458 = vst.msk [vmem:[#allocation8 + $0x18] sm:$0xf] %vm451_vm2, %v525_v11  ;;  %v523_v14 = vpack.c.bf16 %v375_v13, %v375_v13 }
 0x13f   :  { %v635_v4 = vpop.eup %634  ;;  %466 = vst.msk [vmem:[#allocation8 + $0x38] sm:$0xf] %vm451_vm2, %v533_v47  ;;  %v531_v17 = vpack.c.bf16 %v383_v0, %v383_v0 }
 0x140   :  { %v637_v5 = vpop.eup %636  ;;  %456 = vst.msk [vmem:[#allocation8 + $0x10] sm:$0xf] %vm451_vm2, %v523_v14  ;;  %v378_v19 = vmul.f32 %v635_v4, %v330_v48 }
 0x141   :  { %v639_v22 = vpop.eup %638  ;;  %464 = vst.msk [vmem:[#allocation8 + $0x30] sm:$0xf] %vm451_vm2, %v531_v17  ;;  %v386_v24 = vmul.f32 %v637_v5, %v338_v52 }
 0x142   :  { %v526_v28 = vpack.c.bf16 %v378_v19, %v378_v19  ;;  %v304_v18 = vadd.f32 2.0, %v639_v22  ;;  %v641_v15 = vpop.eup %640 }
 0x143   :  { %v534_v53 = vpack.c.bf16 %v386_v24, %v386_v24  ;;  %v376_v23 = vmul.f32 %v641_v15, %v328_v12 }
 0x144   :  { %459 = vst.msk [vmem:[#allocation8 + $0x1c] sm:$0xf] %vm451_vm2, %v526_v28  ;;  %v320_v29 = vmul.f32 %v639_v22, %v304_v18 }
 0x145   :  { %467 = vst.msk [vmem:[#allocation8 + $0x3c] sm:$0xf] %vm451_vm2, %v534_v53  ;;  %v524_v58 = vpack.c.bf16 %v376_v23, %v376_v23 }
 0x146   :  { %v352_v31 = vadd.f32 2.0, %v320_v29  ;;  %v336_v16 = vmul.f32 %v320_v29, %v881_v25 }
 0x147   :  { %457 = vst.msk [vmem:[#allocation8 + $0x14] sm:$0xf] %vm451_vm2, %v524_v58 }
 0x148   :  { %642 = vrcp.f32 %v352_v31 }
 0x152   :  { %v643_v30 = vpop.eup %642 }
 0x153   :  { %v384_v3 = vmul.f32 %v643_v30, %v336_v16 }
 0x155   :  { %v532_v33 = vpack.c.bf16 %v384_v3, %v384_v3 }
 0x157   :  { %465 = vst.msk [vmem:[#allocation8 + $0x34] sm:$0xf] %vm451_vm2, %v532_v33 }
 0x158   :  { %721 = shalt.err (!%p718_p0)
}
 0x159   :  { %s722_s26 = scalar_lea.hbm %s958_s3, 1024 }
 0x15a   :  { %p723_p1 = scmp.ne.s32.totalorder %s958_s3, %s722_s26  ;;  %p726_p2 = scmp.lt.u32.totalorder %s722_s26, %s958_s3 }
 0x15c   :  { %p728_p3 = pnand %p726_p2, %p723_p1 }
 0x15e   :  { %731 = shalt.err (!%p728_p3)
}
 0x15f   :  { %479 = dma.vmem_to_hbm [thread:$0]  %s474_s22, 1024, %s958_s3, [#allocation4], %s740_s1, %s740_s1, %s741_s7  }
 0x160   :  { %736 = dma.done.wait [#allocation4], 1024  }
 0x161   :  { %737 = vsyncadd [#allocation4], 4294966272 }
 0x162   :  { %483 = vsyncpa [#allocation3], 1 }
 0x163   :  { %484 = vsyncpa [#allocation6], 1 }
 0x164   :  { %485 = vsyncpa [#allocation4], 1 }

// kernel: csp_block_forward.8
= control target key start
LH: loop header
LB: loop body
LE: loop exit
PB: predicated region body
PF: predicated region fallthrough
CT: control target
= control target key end

     0   :  { %8 = vsyncpa [#allocation3], 0  ;;  %s840_s0 = inlined_call_operand.hbm [shape: bf16[128,8], index: 0, kind: input, shape index: {}]   ;;  %s841_s1 = inlined_call_operand.hbm [shape: bf16[8,8], index: 1, kind: input, shape index: {}]   ;;  %s842_s2 = inlined_call_operand.hbm [shape: f32[1,8], index: 2, kind: input, shape index: {}]   ;;  %s843_s3 = inlined_call_operand.hbm [shape: f32[128,8], index: 3, kind: output, shape index: {}]  }
   0x1   :  { %9 = vsyncpa [#allocation6], 0 }
   0x2   :  { %10 = vsyncpa [#allocation4], 0  ;;  %s643_s12 = smov [#allocation5]   ;;  %s644_s14 = smov [#allocation2]  }
   0x3   :  { %s29_s13 = sshll.u32 %s643_s12, 4  ;;  %s16_s15 = sshll.u32 %s644_s14, 4  ;;  %s30_s13 = int_to_ptr.vmem [resolvable:$true] %s29_s13  ;;  %s671_s15 = int_to_ptr.vmem [resolvable:$true] %s16_s15 }
   0x4   :  { %s549_s18 = scalar_lea.hbm %s841_s1, 64 }
   0x5   :  { %p550_p0 = scmp.ne.s32.totalorder %s841_s1, %s549_s18  ;;  %p553_p1 = scmp.lt.u32.totalorder %s549_s18, %s841_s1 }
   0x7   :  { %p555_p2 = pnand %p553_p1, %p550_p0 }
   0x9   :  { %558 = shalt.err (!%p555_p2)
}
   0xa   :  { %s559_s23 = scalar_lea.vmem %s30_s13, 64  ;;  %p564_p4 = scmp.lt.s32.totalorder %s30_s13, %s30_s13 }
   0xb   :  { %p560_p3 = scmp.ne.s32.totalorder %s30_s13, %s559_s23  ;;  %p565_p5 = scmp.lt.s32.totalorder %s559_s23, %s559_s23 }
   0xd   :  { %p566_p6 = por %p565_p5, %p564_p4 }
   0xf   :  { %p567_p7 = pnand %p566_p6, %p560_p3 }
  0x11   :  { %570 = shalt.err (!%p567_p7)
}
  0x12   :  { %32 = dma.hbm_to_vmem [thread:$0]  %s841_s1, 64, %s30_s13, [#allocation6]  }
  0x13   :  { %s571_s28 = scalar_lea.hbm %s840_s0, 1024 }
  0x14   :  { %p572_p8 = scmp.ne.s32.totalorder %s840_s0, %s571_s28  ;;  %p575_p9 = scmp.lt.u32.totalorder %s571_s28, %s840_s0 }
  0x16   :  { %p577_p10 = pnand %p575_p9, %p572_p8 }
  0x18   :  { %580 = shalt.err (!%p577_p10)
}
  0x19   :  { %s581_s6 = scalar_lea.vmem %s671_s15, 1024  ;;  %p586_p12 = scmp.lt.s32.totalorder %s671_s15, %s671_s15 }
  0x1a   :  { %p582_p11 = scmp.ne.s32.totalorder %s671_s15, %s581_s6  ;;  %p587_p13 = scmp.lt.s32.totalorder %s581_s6, %s581_s6 }
  0x1c   :  { %p588_p0 = por %p587_p13, %p586_p12 }
  0x1e   :  { %p589_p1 = pnand %p588_p0, %p582_p11 }
  0x20   :  { %592 = shalt.err (!%p589_p1)
}
  0x21   :  { %s645_s1 = smov 64   ;;  %s646_s7 = smov 4  }
  0x22   :  { %22 = dma.hbm_to_vmem [thread:$0]  %s840_s0, 1024, %s671_s15, [#allocation3], %s645_s1, %s645_s1, %s646_s7  }
  0x23   :  { %s647_s10 = smov [#allocation7]   ;;  %s593_s14 = scalar_lea.hbm %s842_s2, 16 }
  0x24   :  { %s39_s11 = sshll.u32 %s647_s10, 4  ;;  %p594_p2 = scmp.ne.s32.totalorder %s842_s2, %s593_s14  ;;  %s40_s11 = int_to_ptr.vmem [resolvable:$true] %s39_s11 }
  0x25   :  { %p597_p3 = scmp.lt.u32.totalorder %s593_s14, %s842_s2 }
  0x27   :  { %p599_p4 = pnand %p597_p3, %p594_p2 }
  0x29   :  { %602 = shalt.err (!%p599_p4)
}
  0x2a   :  { %s603_s20 = scalar_lea.vmem %s40_s11, 16  ;;  %s607_s0 = scalar_lea.vmem %s40_s11, 32 }
  0x2b   :  { %p604_p5 = scmp.ne.s32.totalorder %s40_s11, %s603_s20  ;;  %p608_p6 = scmp.lt.s32.totalorder %s40_s11, %s40_s11 }
  0x2c   :  { %p609_p7 = scmp.lt.s32.totalorder %s607_s0, %s603_s20 }
  0x2e   :  { %p610_p8 = por %p609_p7, %p608_p6 }
  0x30   :  { %p611_p9 = pnand %p610_p8, %p604_p5 }
  0x32   :  { %614 = shalt.err (!%p611_p9)
}
  0x33   :  { %42 = dma.hbm_to_vmem [thread:$0]  %s842_s2, 16, %s40_s11, [#allocation6]  }
  0x34   :  { %637 = dma.done.wait [#allocation3], 1024  }
  0x35   :  { %638 = vsyncadd [#allocation3], 4294966272 }
  0x36   :  { %639 = dma.done.wait [#allocation6], 80  }
  0x37   :  { %640 = vsyncadd [#allocation6], 4294967216  ;;  %vm142_vm0 = vcmask 1043456   ;;  %vm117_vm1 = vcmask 64512   ;;  %v69_v0 = vld [vmem:[#allocation5] sm:$0xf] }
  0x38   :  { %467 = vmatprep.subr.msk.bf16.mxu0 %vm142_vm0, %v69_v0  ;;  %468 = vmatprep.subr.msk.bf16.mxu1 %vm142_vm0, %v69_v0  ;;  %v144_v1 = vsel %vm142_vm0, %v69_v0, 0  ;;  %v477_v2 = vld [vmem:[#allocation2] sm:$0xff]   ;;  %v479_v4 = vld [vmem:[#allocation2 + $0x8] sm:$0xff]   ;;  %v481_v6 = vld [vmem:[#allocation2 + $0x10] sm:$0xff]   ;;  %s648_s2 = smov [#allocation8]  }
  0x39   :  { %448 = vmatpush3.bf16.msra.mxu0 %v144_v1  ;;  %466 = vmatpush3.bf16.msra.mxu1 %v144_v1  ;;  %v478_v3 = vld [vmem:[#allocation2 + $0x20] sm:$0xff]   ;;  %v480_v5 = vld [vmem:[#allocation2 + $0x28] sm:$0xff]   ;;  %v482_v7 = vld [vmem:[#allocation2 + $0x30] sm:$0xff]   ;;  %s408_s22 = sshll.u32 %s648_s2, 4  ;;  %s409_s22 = int_to_ptr.vmem [resolvable:$true] %s408_s22 }
  0x3a   :  { %449 = vmatprep.mubr.msk.bf16.mxu0 %vm117_vm1, %v477_v2  ;;  %457 = vmatprep.mubr.msk.bf16.mxu1 %vm117_vm1, %v478_v3  ;;  %v483_v8 = vld [vmem:[#allocation2 + $0x18] sm:$0xff]   ;;  %v722_v10 = vld [vmem:[#allocation7] ss:$0 sm:$0xff]  ;;  %s615_s23 = scalar_lea.vmem %s409_s22, 2048  ;;  %p620_p11 = scmp.lt.s32.totalorder %s409_s22, %s409_s22 }
  0x3b   :  { %v484_v9 = vld [vmem:[#allocation2 + $0x38] sm:$0xff]   ;;  %p616_p10 = scmp.ne.s32.totalorder %s409_s22, %s615_s23  ;;  %p621_p12 = scmp.lt.s32.totalorder %s615_s23, %s615_s23 }
  0x3c   :  { %450 = vmatmul.mubr.msk.bf16.vlgmr.msra.gmra.mrb[0].mxu0 %vm117_vm1, %v479_v4  ;;  %458 = vmatmul.mubr.msk.bf16.vlgmr.msra.gmra.mrb[0].mxu1 %vm117_vm1, %v480_v5 }
  0x3d   :  { %453 = vmatprep.mubr.msk.bf16.mxu0 %vm117_vm1, %v481_v6  ;;  %461 = vmatprep.mubr.msk.bf16.mxu1 %vm117_vm1, %v482_v7  ;;  %p622_p13 = por %p621_p12, %p620_p11 }
  0x3f   :  { %p623_p0 = pnand %p622_p13, %p616_p10 }
  0x44   :  { %454 = vmatmul.mubr.msk.bf16.gmra.mrb[4].mxu0 %vm117_vm1, %v483_v8  ;;  %462 = vmatmul.mubr.msk.bf16.gmra.mrb[4].mxu1 %vm117_vm1, %v484_v9 }
 0x10f   :  { %v451_v11 = vpop.f32.mrb[0].mxu0  ;;  %v459_v13 = vpop.f32.mrb[0].mxu1 }
 0x110   :  { %v725_v12 = vadd.f32 %v451_v11, %v722_v10  ;;  %v180_v14 = vpop.f32.mrb[1].mxu0  ;;  %v728_v15 = vadd.f32 %v459_v13, %v722_v10  ;;  %v212_v17 = vpop.f32.mrb[1].mxu1 }
 0x111   :  { %v731_v16 = vadd.f32 %v722_v10, %v180_v14  ;;  %v452_v18 = vpop.f32.mrb[2].mxu0  ;;  %v735_v20 = vadd.f32 %v722_v10, %v212_v17  ;;  %v460_v22 = vpop.f32.mrb[2].mxu1 }
 0x112   :  { %v245_v19 = vmin.f32 %v725_v12, 20.0  ;;  %v738_v21 = vadd.f32 %v452_v18, %v722_v10  ;;  %v183_v23 = vpop.f32.mrb[3].mxu0  ;;  %v253_v24 = vmin.f32 %v728_v15, 20.0  ;;  %v743_v26 = vadd.f32 %v460_v22, %v722_v10  ;;  %v215_v28 = vpop.f32.mrb[3].mxu1 }
 0x113   :  { %v243_v25 = vmin.f32 %v731_v16, 20.0  ;;  %v746_v27 = vadd.f32 %v722_v10, %v183_v23  ;;  %v251_v30 = vmin.f32 %v735_v20, 20.0  ;;  %v751_v32 = vadd.f32 %v722_v10, %v215_v28 }
 0x114   :  { %v263_v29 = vmul.f32 1.442695, %v245_v19  ;;  %v246_v31 = vmin.f32 %v738_v21, 20.0  ;;  %v279_v33 = vmul.f32 1.442695, %v253_v24  ;;  %v254_v35 = vmin.f32 %v743_v26, 20.0 }
 0x115   :  { %v259_v34 = vmul.f32 1.442695, %v243_v25  ;;  %v244_v36 = vmin.f32 %v746_v27, 20.0  ;;  %v275_v37 = vmul.f32 1.442695, %v251_v30  ;;  %v252_v39 = vmin.f32 %v751_v32, 20.0 }
 0x116   :  { %485 = vpow2.f32 %v263_v29  ;;  %v265_v38 = vmul.f32 1.442695, %v246_v31  ;;  %v281_v40 = vmul.f32 1.442695, %v254_v35 }
 0x117   :  { %487 = vpow2.f32 %v279_v33  ;;  %v455_v41 = vpop.f32.mrb[4].mxu0  ;;  %v261_v42 = vmul.f32 1.442695, %v244_v36  ;;  %v463_v44 = vpop.f32.mrb[4].mxu1  ;;  %v277_v46 = vmul.f32 1.442695, %v252_v39 }
 0x118   :  { %489 = vpow2.f32 %v259_v34  ;;  %v757_v43 = vadd.f32 %v455_v41, %v722_v10  ;;  %v196_v45 = vpop.f32.mrb[5].mxu0  ;;  %v760_v47 = vadd.f32 %v463_v44, %v722_v10  ;;  %v228_v49 = vpop.f32.mrb[5].mxu1 }
 0x119   :  { %491 = vpow2.f32 %v275_v37  ;;  %v763_v48 = vadd.f32 %v722_v10, %v196_v45  ;;  %v456_v50 = vpop.f32.mrb[6].mxu0  ;;  %v767_v52 = vadd.f32 %v722_v10, %v228_v49  ;;  %v464_v54 = vpop.f32.mrb[6].mxu1 }
 0x11a   :  { %493 = vpow2.f32 %v265_v38  ;;  %v249_v51 = vmin.f32 %v757_v43, 20.0  ;;  %v770_v53 = vadd.f32 %v456_v50, %v722_v10  ;;  %v199_v55 = vpop.f32.mrb[7].mxu0  ;;  %v257_v56 = vmin.f32 %v760_v47, 20.0  ;;  %v231_v59 = vpop.f32.mrb[7].mxu1 }
 0x11b   :  { %495 = vpow2.f32 %v281_v40  ;;  %v247_v57 = vmin.f32 %v763_v48, 20.0  ;;  %v775_v58 = vadd.f32 %v464_v54, %v722_v10  ;;  %v255_v61 = vmin.f32 %v767_v52, 20.0 }
 0x11c   :  { %497 = vpow2.f32 %v261_v42  ;;  %v271_v60 = vmul.f32 1.442695, %v249_v51  ;;  %v250_v62 = vmin.f32 %v770_v53, 20.0  ;;  %v287_v63 = vmul.f32 1.442695, %v257_v56 }
 0x11d   :  { %499 = vpow2.f32 %v277_v46  ;;  %v267_v0 = vmul.f32 1.442695, %v247_v57  ;;  %v258_v1 = vmin.f32 %v775_v58, 20.0  ;;  %v283_v2 = vmul.f32 1.442695, %v255_v61 }
 0x11e   :  { %501 = vpow2.f32 %v271_v60  ;;  %v781_v3 = vadd.f32 %v722_v10, %v199_v55  ;;  %v273_v4 = vmul.f32 1.442695, %v250_v62  ;;  %v785_v36 = vadd.f32 %v722_v10, %v231_v59 }
 0x11f   :  { %503 = vpow2.f32 %v287_v63  ;;  %v289_v6 = vmul.f32 1.442695, %v258_v1 }
 0x120   :  { %v486_v5 = vpop.eup %485  ;;  %505 = vpow2.f32 %v267_v0  ;;  %v248_v7 = vmin.f32 %v781_v3, 20.0  ;;  %v256_v54 = vmin.f32 %v785_v36, 20.0 }
 0x121   :  { %v488_v8 = vpop.eup %487  ;;  %v293_v9 = vadd.f32 2.0, %v486_v5  ;;  %507 = vpow2.f32 %v283_v2 }
 0x122   :  { %v490_v11 = vpop.eup %489  ;;  %v301_v13 = vadd.f32 2.0, %v488_v8  ;;  %v269_v14 = vmul.f32 1.442695, %v248_v7  ;;  %509 = vpow2.f32 %v273_v4  ;;  %v285_v7 = vmul.f32 1.442695, %v256_v54 }
 0x123   :  { %v492_v17 = vpop.eup %491  ;;  %v309_v18 = vmul.f32 %v486_v5, %v293_v9  ;;  %v291_v19 = vadd.f32 2.0, %v490_v11  ;;  %511 = vpow2.f32 %v289_v6 }
 0x124   :  { %v494_v22 = vpop.eup %493  ;;  %v317_v23 = vmul.f32 %v488_v8, %v301_v13  ;;  %v299_v24 = vadd.f32 2.0, %v492_v17  ;;  %513 = vpow2.f32 %v269_v14 }
 0x125   :  { %v496_v25 = vpop.eup %495  ;;  %v341_v28 = vadd.f32 2.0, %v309_v18  ;;  %v307_v29 = vmul.f32 %v490_v11, %v291_v19  ;;  %v294_v30 = vadd.f32 2.0, %v494_v22  ;;  %v325_v9 = vmul.f32 %v309_v18, %v725_v12 }
 0x126   :  { %v498_v31 = vpop.eup %497  ;;  %v349_v33 = vadd.f32 2.0, %v317_v23  ;;  %v315_v34 = vmul.f32 %v492_v17, %v299_v24  ;;  %v302_v35 = vadd.f32 2.0, %v496_v25  ;;  %v333_v11 = vmul.f32 %v317_v23, %v728_v15 }
 0x127   :  { %v500_v37 = vpop.eup %499  ;;  %515 = vrcp.f32 %v341_v28  ;;  %v339_v38 = vadd.f32 2.0, %v307_v29  ;;  %v310_v39 = vmul.f32 %v494_v22, %v294_v30  ;;  %v292_v46 = vadd.f32 2.0, %v498_v31 }
 0x128   :  { %v502_v40 = vpop.eup %501  ;;  %517 = vrcp.f32 %v349_v33  ;;  %v347_v41 = vadd.f32 2.0, %v315_v34  ;;  %v318_v42 = vmul.f32 %v496_v25, %v302_v35  ;;  %v300_v51 = vadd.f32 2.0, %v500_v37 }
 0x129   :  { %v504_v44 = vpop.eup %503  ;;  %519 = vrcp.f32 %v339_v38  ;;  %v342_v45 = vadd.f32 2.0, %v310_v39  ;;  %v308_v55 = vmul.f32 %v498_v31, %v292_v46  ;;  %v297_v56 = vadd.f32 2.0, %v502_v40 }
 0x12a   :  { %v506_v49 = vpop.eup %505  ;;  %521 = vrcp.f32 %v347_v41  ;;  %v350_v50 = vadd.f32 2.0, %v318_v42  ;;  %v305_v57 = vadd.f32 2.0, %v504_v44  ;;  %v316_v59 = vmul.f32 %v500_v37, %v300_v51 }
 0x12b   :  { %v508_v10 = vpop.eup %507  ;;  %523 = vrcp.f32 %v342_v45  ;;  %v295_v60 = vadd.f32 2.0, %v506_v49  ;;  %v340_v63 = vadd.f32 2.0, %v308_v55  ;;  %v313_v0 = vmul.f32 %v502_v40, %v297_v56 }
 0x12c   :  { %525 = vrcp.f32 %v350_v50  ;;  %v303_v61 = vadd.f32 2.0, %v508_v10  ;;  %v510_v62 = vpop.eup %509  ;;  %v321_v1 = vmul.f32 %v504_v44, %v305_v57  ;;  %v348_v4 = vadd.f32 2.0, %v316_v59 }
 0x12d   :  { %v512_v2 = vpop.eup %511  ;;  %v788_v5 = vmul.f32 %v506_v49, %v295_v60  ;;  %527 = vrcp.f32 %v340_v63  ;;  %v345_v13 = vadd.f32 2.0, %v313_v0  ;;  %v323_v14 = vmul.f32 %v307_v29, %v731_v16 }
 0x12e   :  { %v790_v6 = vmul.f32 %v508_v10, %v303_v61  ;;  %v514_v8 = vpop.eup %513  ;;  %529 = vrcp.f32 %v348_v4  ;;  %v353_v17 = vadd.f32 2.0, %v321_v1  ;;  %v331_v24 = vmul.f32 %v315_v34, %v735_v20 }
 0x12f   :  { %v343_v19 = vadd.f32 2.0, %v788_v5  ;;  %531 = vrcp.f32 %v345_v13  ;;  %v298_v28 = vadd.f32 2.0, %v510_v62  ;;  %v306_v12 = vadd.f32 2.0, %v512_v2 }
 0x130   :  { %v351_v25 = vadd.f32 2.0, %v790_v6  ;;  %533 = vrcp.f32 %v353_v17  ;;  %v296_v15 = vadd.f32 2.0, %v514_v8  ;;  %v326_v16 = vmul.f32 %v310_v39, %v738_v21 }
 0x131   :  { %v516_v22 = vpop.eup %515  ;;  %535 = vrcp.f32 %v343_v19  ;;  %v314_v29 = vmul.f32 %v510_v62, %v298_v28  ;;  %v322_v20 = vmul.f32 %v512_v2, %v306_v12  ;;  %v334_v40 = vmul.f32 %v318_v42, %v743_v26 }
 0x132   :  { %v518_v30 = vpop.eup %517  ;;  %v373_v31 = vmul.f32 %v516_v22, %v325_v9  ;;  %537 = vrcp.f32 %v351_v25  ;;  %v312_v34 = vmul.f32 %v514_v8, %v296_v15  ;;  %v324_v49 = vmul.f32 %v308_v55, %v746_v27 }
 0x133   :  { %v520_v18 = vpop.eup %519  ;;  %v381_v23 = vmul.f32 %v518_v30, %v333_v11  ;;  %v346_v41 = vadd.f32 2.0, %v314_v29  ;;  %539 = vpow2.f32 %v285_v7  ;;  %v354_v39 = vadd.f32 2.0, %v322_v20 }
 0x134   :  { %v522_v33 = vpop.eup %521  ;;  %389 = vst.msk [vmem:[#allocation8 + $0x10] sm:$0xff] %vm117_vm1, %v373_v31  ;;  %v371_v35 = vmul.f32 %v520_v18, %v323_v14  ;;  %v344_v46 = vadd.f32 2.0, %v312_v34  ;;  %v332_v26 = vmul.f32 %v316_v59, %v751_v32  ;;  %v329_v54 = vmul.f32 %v313_v0, %v757_v43 }
 0x135   :  { %v524_v37 = vpop.eup %523  ;;  %397 = vst.msk [vmem:[#allocation8 + $0x50] sm:$0xff] %vm117_vm1, %v381_v23  ;;  %v379_v38 = vmul.f32 %v522_v33, %v331_v24  ;;  %541 = vrcp.f32 %v346_v41  ;;  %v337_v57 = vmul.f32 %v321_v1, %v760_v47  ;;  %v327_v27 = vmul.f32 %v788_v5, %v763_v48 }
 0x136   :  { %v526_v44 = vpop.eup %525  ;;  %387 = vst.msk [vmem:[#allocation8] sm:$0xff] %vm117_vm1, %v371_v35  ;;  %v374_v21 = vmul.f32 %v524_v37, %v326_v16  ;;  %543 = vrcp.f32 %v354_v39  ;;  %v335_v59 = vmul.f32 %v790_v6, %v767_v52  ;;  %v330_v0 = vmul.f32 %v314_v29, %v770_v53 }
 0x137   :  { %395 = vst.msk [vmem:[#allocation8 + $0x40] sm:$0xff] %vm117_vm1, %v379_v38  ;;  %v382_v45 = vmul.f32 %v526_v44, %v334_v40  ;;  %v528_v50 = vpop.eup %527  ;;  %545 = vrcp.f32 %v344_v46  ;;  %v338_v2 = vmul.f32 %v322_v20, %v775_v58  ;;  %v328_v5 = vmul.f32 %v312_v34, %v781_v3 }
 0x138   :  { %390 = vst.msk [vmem:[#allocation8 + $0x18] sm:$0xff] %vm117_vm1, %v374_v21  ;;  %v530_v42 = vpop.eup %529  ;;  %v372_v51 = vmul.f32 %v528_v50, %v324_v49 }
 0x139   :  { %398 = vst.msk [vmem:[#allocation8 + $0x58] sm:$0xff] %vm117_vm1, %v382_v45  ;;  %v532_v10 = vpop.eup %531  ;;  %v380_v56 = vmul.f32 %v530_v42, %v332_v26 }
 0x13a   :  { %v534_v60 = vpop.eup %533  ;;  %388 = vst.msk [vmem:[#allocation8 + $0x8] sm:$0xff] %vm117_vm1, %v372_v51  ;;  %v377_v61 = vmul.f32 %v532_v10, %v329_v54 }
 0x13b   :  { %v536_v55 = vpop.eup %535  ;;  %396 = vst.msk [vmem:[#allocation8 + $0x48] sm:$0xff] %vm117_vm1, %v380_v56  ;;  %v385_v32 = vmul.f32 %v534_v60, %v337_v57 }
 0x13c   :  { %v538_v62 = vpop.eup %537  ;;  %393 = vst.msk [vmem:[#allocation8 + $0x30] sm:$0xff] %vm117_vm1, %v377_v61  ;;  %v375_v43 = vmul.f32 %v536_v55, %v327_v27 }
 0x13d   :  { %v540_v63 = vpop.eup %539  ;;  %401 = vst.msk [vmem:[#allocation8 + $0x70] sm:$0xff] %vm117_vm1, %v385_v32  ;;  %v383_v47 = vmul.f32 %v538_v62, %v335_v59 }
 0x13e   :  { %391 = vst.msk [vmem:[#allocation8 + $0x20] sm:$0xff] %vm117_vm1, %v375_v43  ;;  %v304_v48 = vadd.f32 2.0, %v540_v63 }
 0x13f   :  { %v542_v1 = vpop.eup %541  ;;  %399 = vst.msk [vmem:[#allocation8 + $0x60] sm:$0xff] %vm117_vm1, %v383_v47 }
 0x140   :  { %v544_v4 = vpop.eup %543  ;;  %v378_v52 = vmul.f32 %v542_v1, %v330_v0  ;;  %v320_v6 = vmul.f32 %v540_v63, %v304_v48 }
 0x141   :  { %v546_v7 = vpop.eup %545  ;;  %v386_v8 = vmul.f32 %v544_v4, %v338_v2 }
 0x142   :  { %394 = vst.msk [vmem:[#allocation8 + $0x38] sm:$0xff] %vm117_vm1, %v378_v52  ;;  %v376_v9 = vmul.f32 %v546_v7, %v328_v5  ;;  %v352_v11 = vadd.f32 2.0, %v320_v6  ;;  %v336_v53 = vmul.f32 %v320_v6, %v785_v36 }
 0x143   :  { %402 = vst.msk [vmem:[#allocation8 + $0x78] sm:$0xff] %vm117_vm1, %v386_v8 }
 0x144   :  { %392 = vst.msk [vmem:[#allocation8 + $0x28] sm:$0xff] %vm117_vm1, %v376_v9  ;;  %547 = vrcp.f32 %v352_v11 }
 0x14e   :  { %v548_v58 = vpop.eup %547 }
 0x14f   :  { %v384_v13 = vmul.f32 %v548_v58, %v336_v53 }
 0x151   :  { %400 = vst.msk [vmem:[#allocation8 + $0x68] sm:$0xff] %vm117_vm1, %v384_v13 }
 0x152   :  { %626 = shalt.err (!%p623_p0)
}
 0x153   :  { %s627_s26 = scalar_lea.hbm %s843_s3, 2048 }
 0x154   :  { %p628_p1 = scmp.ne.s32.totalorder %s843_s3, %s627_s26  ;;  %p631_p2 = scmp.lt.u32.totalorder %s627_s26, %s843_s3 }
 0x156   :  { %p633_p3 = pnand %p631_p2, %p628_p1 }
 0x158   :  { %636 = shalt.err (!%p633_p3)
}
 0x159   :  { %s649_s4 = smov 128   ;;  %s650_s5 = smov 8  }
 0x15a   :  { %414 = dma.vmem_to_hbm [thread:$0]  %s409_s22, 2048, %s843_s3, [#allocation4], %s649_s4, %s649_s4, %s650_s5  }
 0x15b   :  { %641 = dma.done.wait [#allocation4], 2048  }
 0x15c   :  { %642 = vsyncadd [#allocation4], 4294965248 }
 0x15d   :  { %418 = vsyncpa [#allocation3], 1 }
 0x15e   :  { %419 = vsyncpa [#allocation6], 1 }
 0x15f   :  { %420 = vsyncpa [#allocation4], 1 }

// kernel: csp_block_forward.6
= control target key start
LH: loop header
LB: loop body
LE: loop exit
PB: predicated region body
PF: predicated region fallthrough
CT: control target
= control target key end

     0   :  { %8 = vsyncpa [#allocation3], 0  ;;  %s2995_s0 = inlined_call_operand.hbm [shape: f32[2,4,9,9,4], index: 0, kind: input, shape index: {}]   ;;  %s2996_s1 = inlined_call_operand.hbm [shape: f32[3,3,4,8], index: 1, kind: input, shape index: {}]   ;;  %s2997_s2 = inlined_call_operand.hbm [shape: f32[1,8], index: 2, kind: input, shape index: {}]   ;;  %s2998_s3 = inlined_call_operand.hbm [shape: bf16[2,64,8], index: 3, kind: output, shape index: {}]  }
   0x1   :  { %10 = vsyncpa [#allocation3 + $0x1], 0 }
   0x2   :  { %11 = vsyncpa [#allocation6], 0 }
   0x3   :  { %12 = vsyncpa [#allocation4], 0 }
   0x4   :  { %14 = vsyncpa [#allocation4 + $0x1], 0  ;;  %s2529_s12 = smov 0   ;;  %s2531_s13 = smov 0  }
   0x5   :  { %s2533_s14 = smov 0   ;;  %s2535_s15 = smov 0  }
   0x6 LB: > { %s2550_s16 = sadd.s32 4294967295, %s2497_s15   ;;  %s1790_s17 = sadd.s32 4294967294, %s2497_s15   ;;  %s2497_s15 = sphi %s2535_s15, %s3018_s15   ;;  %s2493_s14 = sphi %s2533_s14, %s3017_s14   ;;  %s2489_s13 = sphi %s2531_s13, %s3016_s13   ;;  %s2485_s12 = sphi %s2529_s12, %s3015_s12  }
   0x7   : > { %p40_p0 = scmp.ne.s32.totalorder %s2489_s13, %s2485_s12  ;;  %p2999_p1 = scmp.eq.s32.totalorder %s2550_s16, 0 }
   0x8   : > { %p112_p3 = scmp.eq.s32.totalorder %s1790_s17, 1  ;;  %p1791_p5 = scmp.ge.s32.totalorder %s2497_s15, 1 }
   0x9   : > { %p2559_p4 = por %p2999_p1, %p40_p0  ;;  %p119_p7 = scmp.lt.s32.totalorder %s2497_s15, 3 }
   0xa   : > { %p2564_p6 = por %p112_p3, %p40_p0  ;;  %s2499_s21 = smov [#allocation5]  }
   0xb   : > { %s3002_s18 = scalar_select %p2559_p4, 1, 0 }
   0xc   : > { %s3003_s19 = scalar_select %p2564_p6, 1, 0 }
   0xd   : > { %p2569_p8 = pnand %p1791_p5, %p119_p7  ;;  %s131_s22 = sshll.u32 %s2499_s21, 4  ;;  %s2573_s22 = int_to_ptr.vmem [resolvable:$true] %s131_s22 }
   0xe   : > { %s2500_s24 = smov [#allocation7]   ;;  %s2341_s28 = scalar_lea.hbm %s2996_s1, 576 }
   0xf   : > { %p2248_p9 = pneg %p2569_p8  ;;  %s145_s25 = sshll.u32 %s2500_s24, 4  ;;  %s2584_s25 = int_to_ptr.vmem [resolvable:$true] %s145_s25 }
  0x10   : > { %p2342_p12 = scmp.ne.s32.totalorder %s2996_s1, %s2341_s28  ;;  %p2348_p5 = scmp.lt.u32.totalorder %s2341_s28, %s2996_s1 }
  0x11   : > { %p2580_p11 = pnand %p2248_p9, %p2999_p1 }
  0x13   : > { %p2343_p13 = pneg %p2580_p11 }
  0x15   : > { %p2344_p0 = pnand %p2343_p13, %p2342_p12 }
  0x17   : > { %p2345_p3 = pneg %p2344_p0 }
  0x19   : > { %p2350_p7 = pnand %p2348_p5, %p2345_p3 }
  0x1b   : > { %2353 = shalt.err (!%p2350_p7)
}
  0x1c   : > { %s2354_s6 = scalar_lea.vmem %s2573_s22, 576  ;;  %p2362_p2 = scmp.lt.s32.totalorder %s2573_s22, %s2573_s22 }
  0x1d   : > { %p2355_p9 = scmp.ne.s32.totalorder %s2573_s22, %s2354_s6  ;;  %p2363_p12 = scmp.lt.s32.totalorder %s2354_s6, %s2354_s6 }
  0x1f   : > { %p2357_p10 = pnand %p2355_p9, %p2343_p13  ;;  %p2364_p0 = por %p2363_p12, %p2362_p2 }
  0x21   : > { %p2358_p1 = pneg %p2357_p10 }
  0x23   : > { %p2365_p6 = pnand %p2364_p0, %p2358_p1 }
  0x25   : > { %2368 = shalt.err (!%p2365_p6)
}
  0x26   : > { %s2501_s7 = smov 64   ;;  %s2502_s8 = smov 4  }
  0x27   : > { %2251 = dma.hbm_to_vmem [thread:$0]  (!%p2580_p11), %s2996_s1, 576, %s2573_s22, [#allocation6], %s2501_s7, %s2501_s7, %s2502_s8  }
  0x28   : > { %s2369_s21 = scalar_lea.hbm %s2997_s2, 16 }
  0x29   : > { %p2370_p2 = scmp.ne.s32.totalorder %s2997_s2, %s2369_s21  ;;  %p2376_p10 = scmp.lt.u32.totalorder %s2369_s21, %s2997_s2 }
  0x2b   : > { %p2372_p1 = pnand %p2370_p2, %p2343_p13 }
  0x2d   : > { %p2373_p6 = pneg %p2372_p1 }
  0x2f   : > { %p2378_p3 = pnand %p2376_p10, %p2373_p6 }
  0x31   : > { %2381 = shalt.err (!%p2378_p3)
}
  0x32   : > { %s2382_s22 = scalar_lea.vmem %s2584_s25, 16  ;;  %s2389_s29 = scalar_lea.vmem %s2584_s25, 32 }
  0x33   : > { %p2383_p5 = scmp.ne.s32.totalorder %s2584_s25, %s2382_s22  ;;  %p2390_p12 = scmp.lt.s32.totalorder %s2584_s25, %s2584_s25 }
  0x34   : > { %p2391_p0 = scmp.lt.s32.totalorder %s2389_s29, %s2382_s22 }
  0x35   : > { %p2385_p7 = pnand %p2383_p5, %p2343_p13 }
  0x36   : > { %p2392_p2 = por %p2391_p0, %p2390_p12 }
  0x37   : > { %p2386_p9 = pneg %p2385_p7 }
  0x39   : > { %p2393_p1 = pnand %p2392_p2, %p2386_p9 }
  0x3b   : > { %2396 = shalt.err (!%p2393_p1)
}
  0x3c   : > { %2254 = dma.hbm_to_vmem [thread:$0]  (!%p2580_p11), %s2997_s2, 16, %s2584_s25, [#allocation6]  }
  0x3d   : > { %s2640_s5 = sadd.s32 1, %s2497_s15   ;;  %s27_s23 = sadd.s32 1, %s2493_s14 }
  0x3e   : > { %s24_s6 = ssub.s32 %s2497_s15, %s2640_s5  ;;  %p34_p13 = scmp.ne.s32.totalorder %s2493_s14, %s2489_s13 }
  0x3f   : > { %p25_p6 = scmp.eq.s32.totalorder %s24_s6, 0  ;;  %p35_p10 = scmp.eq.s32.totalorder %s2497_s15, 0 }
  0x40   : > { %p3006_p3 = scmp.eq.s32.totalorder %s2550_s16, 1  ;;  %p2265_p7 = scmp.lt.s32.totalorder %s2497_s15, 2 }
  0x41   : > { %s2656_s8 = scalar_select %p25_p6, %s2493_s14, %s27_s23  }
  0x42   : > { %p2650_p5 = por %p3006_p3, %p34_p13  ;;  %p36_p9 = por %p35_p10, %p34_p13 }
  0x43   : > { %s156_s9 = sand.u32 1, %s2493_s14   ;;  %s2234_s25 = smul.u32 9216, %s2497_s15 }
  0x44   : > { %s3007_s7 = scalar_select %p2650_p5, 1, 0 }
  0x45   : > { %s2233_s10 = smul.u32 576, %s156_s9  ;;  %p2660_p11 = pnand %p2265_p7, %p36_p9 }
  0x46   : > { %s2667_s24 = scalar_lea.hbm %s2995_s0, %s2234_s25  ;;  %s2671_s28 = scalar_lea.sflag [#allocation3], %s156_s9 }
  0x47   : > { %s160_s26 = scalar_lea.vmem [#allocation2], %s2233_s10  ;;  %s2397_s22 = scalar_lea.hbm %s2667_s24, 9216 }
  0x48   : > { %s167_s27 = sshll.u32 %s160_s26, 4  ;;  %p2398_p12 = scmp.ne.s32.totalorder %s2667_s24, %s2397_s22  ;;  %s2669_s27 = int_to_ptr.vmem [resolvable:$true] %s167_s27 }
  0x49   : > { %p2399_p0 = pneg %p2660_p11  ;;  %s2402_s4 = scalar_lea.hbm %s2995_s0, 18432 }
  0x4a   : > { %p2403_p13 = scmp.lt.u32.totalorder %s2667_s24, %s2995_s0  ;;  %p2404_p6 = scmp.lt.u32.totalorder %s2402_s4, %s2397_s22 }
  0x4b   : > { %p2400_p2 = pnand %p2399_p0, %p2398_p12  ;;  %p2406_p3 = scmp.lt.u32.totalorder %s2397_s22, %s2667_s24 }
  0x4c   : > { %p2405_p10 = por %p2404_p6, %p2403_p13 }
  0x4d   : > { %p2401_p1 = pneg %p2400_p2 }
  0x4e   : > { %p2407_p7 = por %p2406_p3, %p2405_p10 }
  0x50   : > { %p2408_p9 = pnand %p2407_p7, %p2401_p1 }
  0x52   : > { %2411 = shalt.err (!%p2408_p9)
}
  0x53   : > { %s2412_s9 = scalar_lea.vmem %s2669_s27, 9216  ;;  %s2503_s10 = smov [#allocation2]  }
  0x54   : > { %p2413_p12 = scmp.ne.s32.totalorder %s2669_s27, %s2412_s9  ;;  %s2417_s25 = sshll.u32 %s2503_s10, 4  ;;  %s2418_s25 = int_to_ptr.vmem [resolvable:$false] %s2417_s25 }
  0x55   : > { %s2419_s17 = scalar_lea.vmem %s2418_s25, 18432  ;;  %p2420_p4 = scmp.lt.s32.totalorder %s2669_s27, %s2418_s25 }
  0x56   : > { %p2415_p2 = pnand %p2413_p12, %p2399_p0  ;;  %p2421_p13 = scmp.lt.s32.totalorder %s2419_s17, %s2412_s9 }
  0x58   : > { %p2416_p5 = pneg %p2415_p2  ;;  %p2422_p6 = por %p2421_p13, %p2420_p4 }
  0x5a   : > { %p2423_p10 = pnand %p2422_p6, %p2416_p5 }
  0x5c   : > { %2426 = shalt.err (!%p2423_p10)
}
  0x5d   : > { %s2504_s21 = smov 128   ;;  %s2505_s26 = smov 8  }
  0x5e   : > { %2258 = dma.hbm_to_vmem [thread:$0]  (!%p2660_p11), %s2667_s24, 9216, %s2669_s27, %s2671_s28, %s2504_s21, %s2504_s21, %s2505_s26  }
  0x5f   : > { %179 = sbr.rel (%p2569_p8) target bundleno = 447 (0x1bf), region = 32  ;;  %s2702_s22 = sand.u32 (!%p2569_p8), 1, %s2489_s13  }
  0x60   : > { %s2235_s29 = smul.u32 (!%p2569_p8), 576, %s2702_s22  ;;  %s182_s30 = scalar_lea.sflag (!%p2569_p8), [#allocation3], %s2702_s22 }
  0x61   : > { %p3009_p4 = scmp.ne.s32.totalorder (!%p2569_p8), %s3002_s18, 0 }
  0x62   : > { %s2706_s4 = scalar_lea.vmem (!%p2569_p8), [#allocation2], %s2235_s29 }
  0x66   : > { %2472 = dma.done.wait (%p3009_p4), %s182_s30, 9216  }
  0x67   : > { %2474 = vsyncadd (%p3009_p4), %s182_s30, 4294958080  ;;  %p3010_p5 = scmp.eq.s32.totalorder %s2550_s16, 0 }
  0x69   : > { %2476 = dma.done.wait (%p3010_p5), [#allocation6], 592   ;;  %p3011_p8 = pmov %p3010_p5 }
  0x6a   : > { %vm261_vm0 = vcmask 1043456   ;;  %vm236_vm1 = vcmask 31744   ;;  %v235_v0 = vld [vmem:[#allocation5 + $0x4] sm:$0xf]  ;;  %v2716_v1 = vld [vmem:[#allocation5 + $0x10] sm:$0xf] }
  0x6b   : > { %2478 = vsyncadd (%p3011_p8), [#allocation6], 4294966704  ;;  %v1800_v2 = vld [vmem:[%s2706_s4 + $0x90] sm:$0xff]  ;;  %2041 = vmatprep.subr.msk.mxu1 %vm261_vm0, %v235_v0  ;;  %2097 = vmatprep.subr.msk.mxu0 %vm261_vm0, %v2716_v1  ;;  %v2724_v4 = vld [vmem:[%s2706_s4 + $0xa0] sm:$0xff]  ;;  %s1799_s18 = sshll.u32 %s2702_s22, 5  ;;  %vm1675_vm2 = vcmask 60416  }
  0x6c   : > { %v1852_v3 = vld [vmem:[%s2706_s4 + $0x1b0] sm:$0xff]  ;;  %v224_v5 = vld [vmem:[#allocation5] sm:$0xf]  ;;  %2042 = vmatpush3.msk.msra.mxu1 %vm261_vm0, %v235_v0  ;;  %2043 = vmatprep.mubr.msk.f32.mxu1 %vm236_vm1, %v1800_v2  ;;  %v1114_v11 = vld [vmem:[#allocation5 + $0x18] sm:$0xf]  ;;  %s2922_s20 = scalar_lea.vmem [#allocation8], %s1799_s18 }
  0x6d   : > { %v1853_v6 = vld [vmem:[%s2706_s4 + $0x1c0] sm:$0xff]  ;;  %v963_v7 = vld [vmem:[#allocation5 + $0x14] sm:$0xf]  ;;  %2098 = vmatpush3.msk.msra.mxu0 %vm261_vm0, %v2716_v1  ;;  %2099 = vmatprep.mubr.msk.f32.mxu0 %vm236_vm1, %v1852_v3  ;;  %v511_v15 = vld [vmem:[#allocation5 + $0x8] sm:$0xf]  ;;  %s1959_s11 = sshll.u32 %s2550_s16, 9 }
  0x6e   : > { %2044 = vmatmul.mubr.msk.f32.vlgmr.msra.gmra.mrb[0].mxu1 %vm236_vm1, %v2724_v4  ;;  %2055 = vmatprep.subr.msk.mxu1 %vm261_vm0, %v224_v5  ;;  %v2736_v8 = vld [vmem:[%s2706_s4 + $0xb0] sm:$0xff]  ;;  %v2742_v10 = vld [vmem:[%s2706_s4 + $0xc0] sm:$0xff]  ;;  %v1265_v20 = vld [vmem:[#allocation5 + $0x1c] sm:$0xf]  ;;  %s1698_s24 = sshll.u32 %s2922_s20, 4  ;;  %s2945_s23 = scalar_lea.hbm %s2998_s3, %s1959_s11  ;;  %s2947_s24 = int_to_ptr.vmem [resolvable:$true] %s1698_s24 }
  0x6f   : > { %v1854_v9 = vld [vmem:[%s2706_s4 + $0x1d0] sm:$0xff]  ;;  %2100 = vmatmul.mubr.msk.f32.vlgmr.msra.gmra.mrb[0].mxu0 %vm236_vm1, %v1853_v6  ;;  %2111 = vmatprep.subr.msk.mxu0 %vm261_vm0, %v963_v7  ;;  %v1855_v12 = vld [vmem:[%s2706_s4 + $0x1e0] sm:$0xff]  ;;  %v662_v29 = vld [vmem:[#allocation5 + $0xc] sm:$0xf]  ;;  %s1685_s16 = scalar_lea.sflag [#allocation4], %s2702_s22  ;;  %s2427_s6 = scalar_lea.vmem %s2947_s24, 512 }
  0x70   : > { %2056 = vmatpush3.msk.msra.mxu1 %vm261_vm0, %v224_v5  ;;  %2112 = vmatpush3.msk.msra.mxu0 %vm261_vm0, %v963_v7  ;;  %v2748_v13 = vld [vmem:[%s2706_s4 + $0xd0] sm:$0xff]  ;;  %v1869_v14 = vld [vmem:[%s2706_s4 + $0x121] sm:$0xff]  ;;  %p2428_p11 = scmp.ne.s32.totalorder %s2947_s24, %s2427_s6  ;;  %p3012_p0 = scmp.ne.s32.totalorder %s3007_s7, 0 }
  0x71   : > { %2046 = vmatprep.mubr.msk.f32.mxu1 %vm236_vm1, %v2736_v8  ;;  %2102 = vmatprep.mubr.msk.f32.mxu0 %vm236_vm1, %v1854_v9  ;;  %v2761_v16 = vld [vmem:[%s2706_s4 + $0xe0] sm:$0xff]  ;;  %v1870_v17 = vld [vmem:[%s2706_s4 + $0x131] sm:$0xff]  ;;  %s2506_s9 = smov [#allocation8]  }
  0x72   : > { %2047 = vmatmul.mubr.msk.f32.gmra.mrb[2].mxu1 %vm236_vm1, %v2742_v10  ;;  %2125 = vmatprep.subr.msk.mxu0 %vm261_vm0, %v1114_v11  ;;  %v2766_v18 = vld [vmem:[%s2706_s4 + $0xf0] sm:$0xff]  ;;  %v1871_v19 = vld [vmem:[%s2706_s4 + $0x141] sm:$0xff]  ;;  %p2429_p1 = pnand %p2428_p11, %p3012_p0  ;;  %s2431_s10 = sshll.u32 %s2506_s9, 4  ;;  %s2432_s10 = int_to_ptr.vmem [resolvable:$false] %s2431_s10 }
  0x73   : > { %2103 = vmatmul.mubr.msk.f32.gmra.mrb[2].mxu0 %vm236_vm1, %v1855_v12  ;;  %2049 = vmatprep.mubr.msk.f32.mxu1 %vm236_vm1, %v2748_v13  ;;  %v2776_v21 = vld [vmem:[%s2706_s4 + $0x100] sm:$0xff]  ;;  %v1872_v22 = vld [vmem:[%s2706_s4 + $0x151] sm:$0xff]  ;;  %s2433_s25 = scalar_lea.vmem %s2432_s10, 1024  ;;  %p2434_p7 = scmp.lt.s32.totalorder %s2947_s24, %s2432_s10 }
  0x74   : > { %2113 = vmatprep.mubr.msk.f32.mxu0 %vm236_vm1, %v1869_v14  ;;  %2069 = vmatprep.subr.msk.mxu1 %vm261_vm0, %v511_v15  ;;  %v216_v23 = vld [vmem:[%s2706_s4] sm:$0xff]  ;;  %v217_v25 = vld [vmem:[%s2706_s4 + $0x10] sm:$0xff]  ;;  %p2430_p3 = pneg %p2429_p1  ;;  %p2435_p9 = scmp.lt.s32.totalorder %s2433_s25, %s2427_s6 }
  0x75   : > { %v1873_v24 = vld [vmem:[%s2706_s4 + $0x161] sm:$0xff]  ;;  %v1874_v26 = vld [vmem:[%s2706_s4 + $0x171] sm:$0xff] }
  0x76   : > { %2050 = vmatmul.mubr.msk.f32.gmra.mrb[4].mxu1 %vm236_vm1, %v2761_v16  ;;  %v218_v27 = vld [vmem:[%s2706_s4 + $0x20] sm:$0xff]  ;;  %v219_v30 = vld [vmem:[%s2706_s4 + $0x30] sm:$0xff]  ;;  %p2436_p12 = por %p2435_p9, %p2434_p7 }
  0x77   : > { %2114 = vmatmul.mubr.msk.f32.vlgmr.msra.gmra.mrb[0].mxu0 %vm236_vm1, %v1870_v17  ;;  %2052 = vmatprep.mubr.msk.f32.mxu1 %vm236_vm1, %v2766_v18  ;;  %v1875_v28 = vld [vmem:[%s2706_s4 + $0x181] sm:$0xff]  ;;  %v1876_v31 = vld [vmem:[%s2706_s4 + $0x191] sm:$0xff] }
  0x78   : > { %2126 = vmatpush3.msk.msra.mxu0 %vm261_vm0, %v1114_v11  ;;  %2116 = vmatprep.mubr.msk.f32.mxu0 %vm236_vm1, %v1871_v19  ;;  %v220_v32 = vld [vmem:[%s2706_s4 + $0x40] sm:$0xff]  ;;  %v221_v33 = vld [vmem:[%s2706_s4 + $0x50] sm:$0xff]  ;;  %p2437_p2 = pnand %p2436_p12, %p2430_p3 }
  0x79   : > { %2139 = vmatprep.subr.msk.mxu0 %vm261_vm0, %v1265_v20  ;;  %v222_v34 = vld [vmem:[%s2706_s4 + $0x60] sm:$0xff]  ;;  %v223_v36 = vld [vmem:[%s2706_s4 + $0x70] sm:$0xff] }
  0x7a   : > { %2053 = vmatmul.mubr.msk.f32.gmra.mrb[6].mxu1 %vm236_vm1, %v2776_v21  ;;  %v1415_v35 = vld [vmem:[#allocation5 + $0x20] sm:$0xf]  ;;  %v503_v38 = vld [vmem:[%s2706_s4 + $0x11] sm:$0xff] }
  0x7b   : > { %2117 = vmatmul.mubr.msk.f32.gmra.mrb[2].mxu0 %vm236_vm1, %v1872_v22  ;;  %2057 = vmatprep.mubr.msk.f32.mxu1 %vm236_vm1, %v216_v23  ;;  %v502_v37 = vld [vmem:[%s2706_s4 + $0x1] sm:$0xff]  ;;  %v505_v40 = vld [vmem:[%s2706_s4 + $0x31] sm:$0xff] }
  0x7c   : > { %2119 = vmatprep.mubr.msk.f32.mxu0 %vm236_vm1, %v1873_v24  ;;  %v504_v39 = vld [vmem:[%s2706_s4 + $0x21] sm:$0xff]  ;;  %v507_v43 = vld [vmem:[%s2706_s4 + $0x51] sm:$0xff] }
  0x7d   : > { %v1893_v41 = vld [vmem:[%s2706_s4 + $0x80] sm:$0xff]  ;;  %v509_v45 = vld [vmem:[%s2706_s4 + $0x71] sm:$0xff] }
  0x7e   : > { %2058 = vmatmul.mubr.msk.f32.vlgmr.msra.gmra.mrb[0].mxu1 %vm236_vm1, %v217_v25  ;;  %v506_v42 = vld [vmem:[%s2706_s4 + $0x41] sm:$0xff]  ;;  %v1836_v47 = vld [vmem:[%s2706_s4 + $0x130] sm:$0xff] }
  0x7f   : > { %2120 = vmatmul.mubr.msk.f32.gmra.mrb[4].mxu0 %vm236_vm1, %v1874_v26  ;;  %2070 = vmatpush3.msk.msra.mxu1 %vm261_vm0, %v511_v15  ;;  %v508_v44 = vld [vmem:[%s2706_s4 + $0x61] sm:$0xff]  ;;  %v1838_v49 = vld [vmem:[%s2706_s4 + $0x150] sm:$0xff] }
  0x80   : > { %2060 = vmatprep.mubr.msk.f32.mxu1 %vm236_vm1, %v218_v27  ;;  %2122 = vmatprep.mubr.msk.f32.mxu0 %vm236_vm1, %v1875_v28  ;;  %v1835_v46 = vld [vmem:[%s2706_s4 + $0x120] sm:$0xff]  ;;  %v1910_v50 = vld [vmem:[%s2706_s4 + $0x110] sm:$0xff] }
  0x81   : > { %2083 = vmatprep.subr.msk.mxu1 %vm261_vm0, %v662_v29  ;;  %v1837_v48 = vld [vmem:[%s2706_s4 + $0x140] sm:$0xff]  ;;  %v1840_v52 = vld [vmem:[%s2706_s4 + $0x170] sm:$0xff] }
  0x82   : > { %2061 = vmatmul.mubr.msk.f32.gmra.mrb[2].mxu1 %vm236_vm1, %v219_v30  ;;  %v1839_v51 = vld [vmem:[%s2706_s4 + $0x160] sm:$0xff]  ;;  %v1842_v54 = vld [vmem:[%s2706_s4 + $0x190] sm:$0xff] }
  0x83   : > { %2123 = vmatmul.mubr.msk.f32.gmra.mrb[6].mxu0 %vm236_vm1, %v1876_v31  ;;  %2063 = vmatprep.mubr.msk.f32.mxu1 %vm236_vm1, %v220_v32  ;;  %v1841_v53 = vld [vmem:[%s2706_s4 + $0x180] sm:$0xff]  ;;  %v1856_v55 = vld [vmem:[%s2706_s4 + $0x1f0] sm:$0xff] }
  0x84   : > { %2127 = vmatprep.mubr.msk.f32.mxu0 %vm236_vm1, %v217_v25  ;;  %v1857_v56 = vld [vmem:[%s2706_s4 + $0x200] sm:$0xff]  ;;  %v1858_v57 = vld [vmem:[%s2706_s4 + $0x210] sm:$0xff] }
  0x85   : > { %v1859_v58 = vld [vmem:[%s2706_s4 + $0x220] sm:$0xff] }
  0x86   : > { %2064 = vmatmul.mubr.msk.f32.gmra.mrb[4].mxu1 %vm236_vm1, %v221_v33  ;;  %v1927_v59 = vld [vmem:[%s2706_s4 + $0x81] sm:$0xff] }
  0x87   : > { %2128 = vmatmul.mubr.msk.f32.vlgmr.msra.gmra.mrb[0].mxu0 %vm236_vm1, %v218_v27  ;;  %2066 = vmatprep.mubr.msk.f32.mxu1 %vm236_vm1, %v222_v34 }
  0x88   : > { %2140 = vmatpush3.msk.msra.mxu0 %vm261_vm0, %v1265_v20  ;;  %2130 = vmatprep.mubr.msk.f32.mxu0 %vm236_vm1, %v219_v30 }
  0x89   : > { %2153 = vmatprep.subr.msk.mxu0 %vm261_vm0, %v1415_v35 }
  0x8a   : > { %2067 = vmatmul.mubr.msk.f32.gmra.mrb[6].mxu1 %vm236_vm1, %v223_v36 }
  0x8b   : > { %2131 = vmatmul.mubr.msk.f32.gmra.mrb[2].mxu0 %vm236_vm1, %v220_v32  ;;  %2071 = vmatprep.mubr.msk.f32.mxu1 %vm236_vm1, %v502_v37 }
  0x8c   : > { %2133 = vmatprep.mubr.msk.f32.mxu0 %vm236_vm1, %v221_v33 }
  0x8e   : > { %2072 = vmatmul.mubr.msk.f32.vlgmr.msra.gmra.mrb[0].mxu1 %vm236_vm1, %v503_v38 }
  0x8f   : > { %2134 = vmatmul.mubr.msk.f32.gmra.mrb[4].mxu0 %vm236_vm1, %v222_v34  ;;  %2084 = vmatpush3.msk.msra.mxu1 %vm261_vm0, %v662_v29 }
  0x90   : > { %2074 = vmatprep.mubr.msk.f32.mxu1 %vm236_vm1, %v504_v39  ;;  %2136 = vmatprep.mubr.msk.f32.mxu0 %vm236_vm1, %v223_v36 }
  0x91   : > { %2167 = vmatprep.subr.msk.mxu1 %vm261_vm0, %v2716_v1 }
  0x92   : > { %2075 = vmatmul.mubr.msk.f32.gmra.mrb[2].mxu1 %vm236_vm1, %v505_v40 }
  0x93   : > { %2137 = vmatmul.mubr.msk.f32.gmra.mrb[6].mxu0 %vm236_vm1, %v1893_v41  ;;  %2077 = vmatprep.mubr.msk.f32.mxu1 %vm236_vm1, %v506_v42 }
  0x94   : > { %2141 = vmatprep.mubr.msk.f32.mxu0 %vm236_vm1, %v2724_v4 }
  0x96   : > { %2078 = vmatmul.mubr.msk.f32.gmra.mrb[4].mxu1 %vm236_vm1, %v507_v43 }
  0x97   : > { %2142 = vmatmul.mubr.msk.f32.vlgmr.msra.gmra.mrb[0].mxu0 %vm236_vm1, %v2736_v8  ;;  %2080 = vmatprep.mubr.msk.f32.mxu1 %vm236_vm1, %v508_v44 }
  0x98   : > { %2154 = vmatpush3.msk.msra.mxu0 %vm261_vm0, %v1415_v35  ;;  %2144 = vmatprep.mubr.msk.f32.mxu0 %vm236_vm1, %v2742_v10 }
  0x9a   : > { %2081 = vmatmul.mubr.msk.f32.gmra.mrb[6].mxu1 %vm236_vm1, %v509_v45 }
  0x9b   : > { %2145 = vmatmul.mubr.msk.f32.gmra.mrb[2].mxu0 %vm236_vm1, %v2748_v13  ;;  %2085 = vmatprep.mubr.msk.f32.mxu1 %vm236_vm1, %v1835_v46 }
  0x9c   : > { %2147 = vmatprep.mubr.msk.f32.mxu0 %vm236_vm1, %v2761_v16 }
  0x9e   : > { %2086 = vmatmul.mubr.msk.f32.vlgmr.msra.gmra.mrb[0].mxu1 %vm236_vm1, %v1836_v47 }
  0x9f   : > { %2148 = vmatmul.mubr.msk.f32.gmra.mrb[4].mxu0 %vm236_vm1, %v2766_v18  ;;  %2168 = vmatpush3.msk.msra.mxu1 %vm261_vm0, %v2716_v1  ;;  %v1937_v1 = vld [vmem:[#allocation7] ss:$0 sm:$0xff] }
  0xa0   : > { %2088 = vmatprep.mubr.msk.f32.mxu1 %vm236_vm1, %v1837_v48  ;;  %2150 = vmatprep.mubr.msk.f32.mxu0 %vm236_vm1, %v2776_v21 }
  0xa2   : > { %2089 = vmatmul.mubr.msk.f32.gmra.mrb[2].mxu1 %vm236_vm1, %v1838_v49 }
  0xa3   : > { %2151 = vmatmul.mubr.msk.f32.gmra.mrb[6].mxu0 %vm236_vm1, %v1910_v50  ;;  %2091 = vmatprep.mubr.msk.f32.mxu1 %vm236_vm1, %v1839_v51 }
  0xa4   : > { %2155 = vmatprep.mubr.msk.f32.mxu0 %vm236_vm1, %v503_v38 }
  0xa6   : > { %2092 = vmatmul.mubr.msk.f32.gmra.mrb[4].mxu1 %vm236_vm1, %v1840_v52 }
  0xa7   : > { %2156 = vmatmul.mubr.msk.f32.vlgmr.msra.gmra.mrb[0].mxu0 %vm236_vm1, %v504_v39  ;;  %2094 = vmatprep.mubr.msk.f32.mxu1 %vm236_vm1, %v1841_v53 }
  0xa8   : > { %2158 = vmatprep.mubr.msk.f32.mxu0 %vm236_vm1, %v505_v40 }
  0xaa   : > { %2095 = vmatmul.mubr.msk.f32.gmra.mrb[6].mxu1 %vm236_vm1, %v1842_v54 }
  0xab   : > { %2159 = vmatmul.mubr.msk.f32.gmra.mrb[2].mxu0 %vm236_vm1, %v506_v42  ;;  %2105 = vmatprep.mubr.msk.f32.mxu1 %vm236_vm1, %v1856_v55 }
  0xac   : > { %2161 = vmatprep.mubr.msk.f32.mxu0 %vm236_vm1, %v507_v43 }
  0xae   : > { %2106 = vmatmul.mubr.msk.f32.vlgmr.msra.gmra.mrb[4].mxu1 %vm236_vm1, %v1857_v56 }
  0xaf   : > { %2162 = vmatmul.mubr.msk.f32.gmra.mrb[4].mxu0 %vm236_vm1, %v508_v44  ;;  %2108 = vmatprep.mubr.msk.f32.mxu1 %vm236_vm1, %v1858_v57 }
  0xb0   : > { %2164 = vmatprep.mubr.msk.f32.mxu0 %vm236_vm1, %v509_v45 }
  0xb2   : > { %2109 = vmatmul.mubr.msk.f32.gmra.mrb[6].mxu1 %vm236_vm1, %v1859_v58 }
  0xb3   : > { %2165 = vmatmul.mubr.msk.f32.gmra.mrb[6].mxu0 %vm236_vm1, %v1927_v59 }
 0x171   : > { %v2087_v60 = vpop.f32.mrb[0].mxu1 }
 0x172   : > { %v756_v61 = vpop.f32.mrb[1].mxu1 }
 0x175   : > { %v2090_v62 = vpop.f32.mrb[2].mxu1 }
 0x176   : > { %v766_v63 = vpop.f32.mrb[3].mxu1 }
 0x17a   : > { %v2157_v0 = vpop.f32.mrb[0].mxu0 }
 0x17b   : > { %v2169_v2 = vadd.f32 %v2157_v0, %v2087_v60  ;;  %v1509_v3 = vpop.f32.mrb[1].mxu0 }
 0x17c   : > { %v2170_v4 = vadd.f32 %v1509_v3, %v756_v61 }
 0x17d   : > { %v2893_v5 = vadd.f32 %v2169_v2, %v1937_v1 }
 0x17e   : > { %v2895_v6 = vadd.f32 %v2170_v4, %v1937_v1  ;;  %v2160_v7 = vpop.f32.mrb[2].mxu0 }
 0x17f   : > { %v1572_v8 = vmin.f32 %v2893_v5, 20.0  ;;  %v2171_v9 = vadd.f32 %v2160_v7, %v2090_v62  ;;  %v1519_v10 = vpop.f32.mrb[3].mxu0 }
 0x180   : > { %v1571_v11 = vmin.f32 %v2895_v6, 20.0  ;;  %v2172_v12 = vadd.f32 %v1519_v10, %v766_v63 }
 0x181   : > { %v1581_v13 = vmul.f32 1.442695, %v1572_v8  ;;  %v2899_v14 = vadd.f32 %v2171_v9, %v1937_v1  ;;  %v2107_v15 = vpop.f32.mrb[4].mxu1 }
 0x182   : > { %v1579_v16 = vmul.f32 1.442695, %v1571_v11  ;;  %v2901_v17 = vadd.f32 %v2172_v12, %v1937_v1  ;;  %v2163_v18 = vpop.f32.mrb[4].mxu0  ;;  %v927_v19 = vpop.f32.mrb[5].mxu1 }
 0x183   : > { %2309 = vpow2.f32 %v1581_v13  ;;  %v1574_v20 = vmin.f32 %v2899_v14, 20.0  ;;  %v2173_v21 = vadd.f32 %v2163_v18, %v2107_v15  ;;  %v1529_v22 = vpop.f32.mrb[5].mxu0 }
 0x184   : > { %2311 = vpow2.f32 %v1579_v16  ;;  %v1573_v23 = vmin.f32 %v2901_v17, 20.0  ;;  %v2174_v24 = vadd.f32 %v1529_v22, %v927_v19 }
 0x185   : > { %v1585_v25 = vmul.f32 1.442695, %v1574_v20  ;;  %v2905_v26 = vadd.f32 %v2173_v21, %v1937_v1  ;;  %v2110_v27 = vpop.f32.mrb[6].mxu1 }
 0x186   : > { %v1583_v28 = vmul.f32 1.442695, %v1573_v23  ;;  %v2907_v29 = vadd.f32 %v2174_v24, %v1937_v1  ;;  %v2166_v30 = vpop.f32.mrb[6].mxu0  ;;  %v937_v31 = vpop.f32.mrb[7].mxu1 }
 0x187   : > { %2313 = vpow2.f32 %v1585_v25  ;;  %v1576_v32 = vmin.f32 %v2905_v26, 20.0  ;;  %v2175_v33 = vadd.f32 %v2166_v30, %v2110_v27  ;;  %v1539_v34 = vpop.f32.mrb[7].mxu0 }
 0x188   : > { %2315 = vpow2.f32 %v1583_v28  ;;  %v1575_v35 = vmin.f32 %v2907_v29, 20.0  ;;  %v2176_v36 = vadd.f32 %v1539_v34, %v937_v31 }
 0x189   : > { %v1589_v37 = vmul.f32 1.442695, %v1576_v32  ;;  %v2911_v38 = vadd.f32 %v2175_v33, %v1937_v1 }
 0x18a   : > { %v1587_v39 = vmul.f32 1.442695, %v1575_v35  ;;  %v2913_v40 = vadd.f32 %v2176_v36, %v1937_v1 }
 0x18b   : > { %2317 = vpow2.f32 %v1589_v37  ;;  %v1578_v41 = vmin.f32 %v2911_v38, 20.0 }
 0x18c   : > { %2319 = vpow2.f32 %v1587_v39  ;;  %v1577_v42 = vmin.f32 %v2913_v40, 20.0 }
 0x18d   : > { %v2310_v43 = vpop.eup %2309  ;;  %v1593_v44 = vmul.f32 1.442695, %v1578_v41 }
 0x18e   : > { %v2312_v45 = vpop.eup %2311  ;;  %v1596_v46 = vadd.f32 2.0, %v2310_v43  ;;  %v1591_v47 = vmul.f32 1.442695, %v1577_v42 }
 0x18f   : > { %v1595_v48 = vadd.f32 2.0, %v2312_v45  ;;  %2321 = vpow2.f32 %v1593_v44 }
 0x190   : > { %v1604_v49 = vmul.f32 %v2310_v43, %v1596_v46  ;;  %2323 = vpow2.f32 %v1591_v47 }
 0x191   : > { %v2314_v50 = vpop.eup %2313  ;;  %v1603_v51 = vmul.f32 %v2312_v45, %v1595_v48 }
 0x192   : > { %v2316_v52 = vpop.eup %2315  ;;  %v1620_v53 = vadd.f32 2.0, %v1604_v49  ;;  %v1598_v54 = vadd.f32 2.0, %v2314_v50  ;;  %v1612_v12 = vmul.f32 %v1604_v49, %v2893_v5 }
 0x193   : > { %v1619_v55 = vadd.f32 2.0, %v1603_v51  ;;  %v1597_v56 = vadd.f32 2.0, %v2316_v52  ;;  %v1611_v16 = vmul.f32 %v1603_v51, %v2895_v6 }
 0x194   : > { %2325 = vrcp.f32 %v1620_v53  ;;  %v1606_v57 = vmul.f32 %v2314_v50, %v1598_v54 }
 0x195   : > { %v2318_v58 = vpop.eup %2317  ;;  %2327 = vrcp.f32 %v1619_v55  ;;  %v1605_v59 = vmul.f32 %v2316_v52, %v1597_v56 }
 0x196   : > { %v2320_v60 = vpop.eup %2319  ;;  %v1622_v61 = vadd.f32 2.0, %v1606_v57  ;;  %v1600_v62 = vadd.f32 2.0, %v2318_v58  ;;  %v1614_v24 = vmul.f32 %v1606_v57, %v2899_v14 }
 0x197   : > { %v1621_v63 = vadd.f32 2.0, %v1605_v59  ;;  %v1599_v0 = vadd.f32 2.0, %v2320_v60  ;;  %v1613_v5 = vmul.f32 %v1605_v59, %v2901_v17 }
 0x198   : > { %2329 = vrcp.f32 %v1622_v61  ;;  %v1608_v1 = vmul.f32 %v2318_v58, %v1600_v62 }
 0x199   : > { %v2322_v2 = vpop.eup %2321  ;;  %2331 = vrcp.f32 %v1621_v63  ;;  %v1607_v3 = vmul.f32 %v2320_v60, %v1599_v0 }
 0x19a   : > { %v2324_v4 = vpop.eup %2323  ;;  %v1624_v7 = vadd.f32 2.0, %v1608_v1  ;;  %v1602_v8 = vadd.f32 2.0, %v2322_v2  ;;  %v1616_v31 = vmul.f32 %v1608_v1, %v2905_v26 }
 0x19b   : > { %v1623_v9 = vadd.f32 2.0, %v1607_v3  ;;  %v1601_v10 = vadd.f32 2.0, %v2324_v4  ;;  %v1615_v33 = vmul.f32 %v1607_v3, %v2907_v29 }
 0x19c   : > { %2333 = vrcp.f32 %v1624_v7  ;;  %v1610_v11 = vmul.f32 %v2322_v2, %v1602_v8 }
 0x19d   : > { %2335 = vrcp.f32 %v1623_v9  ;;  %v1609_v13 = vmul.f32 %v2324_v4, %v1601_v10 }
 0x19e   : > { %v2326_v15 = vpop.eup %2325  ;;  %v1626_v18 = vadd.f32 2.0, %v1610_v11  ;;  %v1618_v39 = vmul.f32 %v1610_v11, %v2911_v38 }
 0x19f   : > { %v2328_v19 = vpop.eup %2327  ;;  %v1636_v20 = vmul.f32 %v2326_v15, %v1612_v12  ;;  %v1625_v21 = vadd.f32 2.0, %v1609_v13  ;;  %v1617_v42 = vmul.f32 %v1609_v13, %v2913_v40 }
 0x1a0   : > { %v1635_v22 = vmul.f32 %v2328_v19, %v1611_v16  ;;  %2337 = vrcp.f32 %v1626_v18 }
 0x1a1   : > { %v1952_v23 = vpack.c.bf16 %v1636_v20, %v1636_v20  ;;  %2339 = vrcp.f32 %v1625_v21 }
 0x1a2   : > { %v2330_v25 = vpop.eup %2329  ;;  %v1951_v27 = vpack.c.bf16 %v1635_v22, %v1635_v22 }
 0x1a3   : > { %v2332_v28 = vpop.eup %2331  ;;  %1677 = vst.msk [vmem:[%s2922_s20 + $0x4] sm:$0xf] %vm1675_vm2, %v1952_v23  ;;  %v1638_v6 = vmul.f32 %v2330_v25, %v1614_v24 }
 0x1a4   : > { %1676 = vst.msk [vmem:[%s2922_s20] sm:$0xf] %vm1675_vm2, %v1951_v27  ;;  %v1637_v30 = vmul.f32 %v2332_v28, %v1613_v5 }
 0x1a5   : > { %v1954_v14 = vpack.c.bf16 %v1638_v6, %v1638_v6 }
 0x1a6   : > { %v2334_v32 = vpop.eup %2333  ;;  %v1953_v17 = vpack.c.bf16 %v1637_v30, %v1637_v30 }
 0x1a7   : > { %v2336_v34 = vpop.eup %2335  ;;  %1679 = vst.msk [vmem:[%s2922_s20 + $0xc] sm:$0xf] %vm1675_vm2, %v1954_v14  ;;  %v1640_v35 = vmul.f32 %v2334_v32, %v1616_v31 }
 0x1a8   : > { %1678 = vst.msk [vmem:[%s2922_s20 + $0x8] sm:$0xf] %vm1675_vm2, %v1953_v17  ;;  %v1639_v36 = vmul.f32 %v2336_v34, %v1615_v33 }
 0x1a9   : > { %v1956_v37 = vpack.c.bf16 %v1640_v35, %v1640_v35 }
 0x1aa   : > { %v2338_v41 = vpop.eup %2337  ;;  %v1955_v26 = vpack.c.bf16 %v1639_v36, %v1639_v36 }
 0x1ab   : > { %v2340_v29 = vpop.eup %2339  ;;  %1681 = vst.msk [vmem:[%s2922_s20 + $0x14] sm:$0xf] %vm1675_vm2, %v1956_v37  ;;  %v1642_v43 = vmul.f32 %v2338_v41, %v1618_v39 }
 0x1ac   : > { %1680 = vst.msk [vmem:[%s2922_s20 + $0x10] sm:$0xf] %vm1675_vm2, %v1955_v26  ;;  %v1641_v44 = vmul.f32 %v2340_v29, %v1617_v42 }
 0x1ad   : > { %v1958_v45 = vpack.c.bf16 %v1642_v43, %v1642_v43 }
 0x1ae   : > { %v1957_v38 = vpack.c.bf16 %v1641_v44, %v1641_v44 }
 0x1af   : > { %1683 = vst.msk [vmem:[%s2922_s20 + $0x1c] sm:$0xf] %vm1675_vm2, %v1958_v45 }
 0x1b0   : > { %1682 = vst.msk [vmem:[%s2922_s20 + $0x18] sm:$0xf] %vm1675_vm2, %v1957_v38 }
 0x1b1   : > { %2440 = shalt.err (!%p2437_p2)
}
 0x1b2   : > { %s2441_s17 = scalar_lea.hbm %s2945_s23, 512  ;;  %s2445_s29 = scalar_lea.hbm %s2998_s3, 1024 }
 0x1b3   : > { %p2442_p13 = scmp.ne.s32.totalorder %s2945_s23, %s2441_s17  ;;  %p2446_p4 = scmp.lt.u32.totalorder %s2945_s23, %s2998_s3 }
 0x1b4   : > { %p2447_p5 = scmp.lt.u32.totalorder %s2445_s29, %s2441_s17  ;;  %p2449_p11 = scmp.lt.u32.totalorder %s2441_s17, %s2945_s23 }
 0x1b5   : > { %p2443_p6 = pnand %p2442_p13, %p3012_p0 }
 0x1b6   : > { %p2448_p8 = por %p2447_p5, %p2446_p4 }
 0x1b7   : > { %p2444_p10 = pneg %p2443_p6 }
 0x1b8   : > { %p2450_p1 = por %p2449_p11, %p2448_p8 }
 0x1ba   : > { %p2451_p3 = pnand %p2450_p1, %p2444_p10 }
 0x1bc   : > { %2454 = shalt.err (!%p2451_p3)
}
 0x1bd   : > { %s2507_s18 = smov 64   ;;  %s2508_s20 = smov 4  }
 0x1be   : > { %2246 = dma.vmem_to_hbm [thread:$0]  (%p3012_p0), %s2947_s24, 512, %s2945_s23, %s1685_s16, %s2507_s18, %s2507_s18, %s2508_s20  }
 0x1bf PF: > { %s1713_s11 = sand.u32 1, %s2485_s12   ;;  %p3013_p7 = scmp.ne.s32.totalorder %s3003_s19, 0 }
 0x1c0   : > { %p3014_p9 = scmp.ge.s32.totalorder %s2497_s15, 2  ;;  %s1714_s27 = scalar_lea.sflag [#allocation4], %s1713_s11 }
 0x1c2   : > { %p2260_p12 = pnand %p3014_p9, %p3013_p7 }
 0x1c4   : > { %2480 = dma.done.wait (!%p2260_p12), %s1714_s27, 512  }
 0x1c5   : > { %2482 = vsyncadd (!%p2260_p12), %s1714_s27, 4294966784  ;;  %p17_p2 = scmp.ge.s32.totalorder %s2640_s5, 4   ;;  %s3015_s12 = smov %s2489_s13 }
 0x1c6   : > { %s3016_s13 = smov %s2493_s14  ;;  %s3017_s14 = smov %s2656_s8 }
 0x1c7   : > { %s3018_s15 = smov %s2640_s5  ;;  %19 = sbr.rel (!%p17_p2) target bundleno = 6 (0x6), region = 98 }
 0x1ce   :  { %1719 = vsyncpa [#allocation3], 1 }
 0x1cf   :  { %1721 = vsyncpa [#allocation3 + $0x1], 1 }
 0x1d0   :  { %1722 = vsyncpa [#allocation6], 1 }
 0x1d1   :  { %1723 = vsyncpa [#allocation4], 1 }
 0x1d2   :  { %1725 = vsyncpa [#allocation4 + $0x1], 1 }

// kernel: csp_block_forward.11
= control target key start
LH: loop header
LB: loop body
LE: loop exit
PB: predicated region body
PF: predicated region fallthrough
CT: control target
= control target key end

     0   :  { %10 = vsyncpa [#allocation3], 0  ;;  %s1217_s0 = inlined_call_operand.hbm [shape: bf16[128,8], index: 0, kind: input, shape index: {}]   ;;  %s1218_s1 = inlined_call_operand.hbm [shape: bf16[128,8], index: 1, kind: input, shape index: {}]   ;;  %s1219_s2 = inlined_call_operand.hbm [shape: bf16[8,8], index: 2, kind: input, shape index: {}]   ;;  %s1220_s3 = inlined_call_operand.hbm [shape: bf16[8,8], index: 3, kind: input, shape index: {}]   ;;  %s1221_s4 = inlined_call_operand.hbm [shape: f32[1,8], index: 4, kind: input, shape index: {}]   ;;  %s1222_s5 = inlined_call_operand.hbm [shape: f32[128,8], index: 5, kind: output, shape index: {}]  }
   0x1   :  { %11 = vsyncpa [#allocation6], 0 }
   0x2   :  { %12 = vsyncpa [#allocation9], 0 }
   0x3   :  { %13 = vsyncpa [#allocation4], 0  ;;  %s985_s18 = smov [#allocation5]   ;;  %s986_s20 = smov [#allocation8]  }
   0x4   :  { %s31_s19 = sshll.u32 %s985_s18, 4  ;;  %s54_s21 = sshll.u32 %s986_s20, 4  ;;  %s32_s19 = int_to_ptr.vmem [resolvable:$true] %s31_s19  ;;  %s55_s21 = int_to_ptr.vmem [resolvable:$true] %s54_s21 }
   0x5   :  { %s845_s24 = scalar_lea.hbm %s1218_s1, 1024 }
   0x6   :  { %p846_p0 = scmp.ne.s32.totalorder %s1218_s1, %s845_s24  ;;  %p849_p1 = scmp.lt.u32.totalorder %s845_s24, %s1218_s1 }
   0x8   :  { %p851_p2 = pnand %p849_p1, %p846_p0 }
   0xa   :  { %854 = shalt.err (!%p851_p2)
}
   0xb   :  { %s855_s29 = scalar_lea.vmem %s32_s19, 1024  ;;  %p860_p4 = scmp.lt.s32.totalorder %s32_s19, %s32_s19 }
   0xc   :  { %p856_p3 = scmp.ne.s32.totalorder %s32_s19, %s855_s29  ;;  %p861_p5 = scmp.lt.s32.totalorder %s855_s29, %s855_s29 }
   0xe   :  { %p862_p6 = por %p861_p5, %p860_p4 }
  0x10   :  { %p863_p7 = pnand %p862_p6, %p856_p3 }
  0x12   :  { %866 = shalt.err (!%p863_p7)
}
  0x13   :  { %s987_s30 = smov 64   ;;  %s988_s6 = smov 4  }
  0x14   :  { %37 = dma.hbm_to_vmem [thread:$0]  %s1218_s1, 1024, %s32_s19, [#allocation6], %s987_s30, %s987_s30, %s988_s6  }
  0x15   :  { %s867_s11 = scalar_lea.hbm %s1220_s3, 64 }
  0x16   :  { %p868_p8 = scmp.ne.s32.totalorder %s1220_s3, %s867_s11  ;;  %p871_p9 = scmp.lt.u32.totalorder %s867_s11, %s1220_s3 }
  0x18   :  { %p873_p10 = pnand %p871_p9, %p868_p8 }
  0x1a   :  { %876 = shalt.err (!%p873_p10)
}
  0x1b   :  { %s877_s16 = scalar_lea.vmem %s55_s21, 64  ;;  %p882_p12 = scmp.lt.s32.totalorder %s55_s21, %s55_s21 }
  0x1c   :  { %p878_p11 = scmp.ne.s32.totalorder %s55_s21, %s877_s16  ;;  %p883_p13 = scmp.lt.s32.totalorder %s877_s16, %s877_s16 }
  0x1e   :  { %p884_p0 = por %p883_p13, %p882_p12 }
  0x20   :  { %p885_p1 = pnand %p884_p0, %p878_p11 }
  0x22   :  { %888 = shalt.err (!%p885_p1)
}
  0x23   :  { %57 = dma.hbm_to_vmem [thread:$0]  %s1220_s3, 64, %s55_s21, [#allocation9]  }
  0x24   :  { %s989_s18 = smov [#allocation2]   ;;  %s990_s20 = smov [#allocation7]  }
  0x25   :  { %s19_s19 = sshll.u32 %s989_s18, 4  ;;  %s44_s22 = sshll.u32 %s990_s20, 4  ;;  %s20_s19 = int_to_ptr.vmem [resolvable:$true] %s19_s19  ;;  %s45_s22 = int_to_ptr.vmem [resolvable:$true] %s44_s22 }
  0x26   :  { %s889_s25 = scalar_lea.hbm %s1217_s0, 1024 }
  0x27   :  { %p890_p2 = scmp.ne.s32.totalorder %s1217_s0, %s889_s25  ;;  %p893_p3 = scmp.lt.u32.totalorder %s889_s25, %s1217_s0 }
  0x29   :  { %p895_p4 = pnand %p893_p3, %p890_p2 }
  0x2b   :  { %898 = shalt.err (!%p895_p4)
}
  0x2c   :  { %s899_s3 = scalar_lea.vmem %s20_s19, 1024  ;;  %p904_p6 = scmp.lt.s32.totalorder %s20_s19, %s20_s19 }
  0x2d   :  { %p900_p5 = scmp.ne.s32.totalorder %s20_s19, %s899_s3  ;;  %p905_p7 = scmp.lt.s32.totalorder %s899_s3, %s899_s3 }
  0x2f   :  { %p906_p8 = por %p905_p7, %p904_p6 }
  0x31   :  { %p907_p9 = pnand %p906_p8, %p900_p5 }
  0x33   :  { %910 = shalt.err (!%p907_p9)
}
  0x34   :  { %25 = dma.hbm_to_vmem [thread:$0]  %s1217_s0, 1024, %s20_s19, [#allocation3], %s987_s30, %s987_s30, %s988_s6  }
  0x35   :  { %s911_s10 = scalar_lea.hbm %s1219_s2, 64 }
  0x36   :  { %p912_p10 = scmp.ne.s32.totalorder %s1219_s2, %s911_s10  ;;  %p915_p11 = scmp.lt.u32.totalorder %s911_s10, %s1219_s2 }
  0x38   :  { %p917_p12 = pnand %p915_p11, %p912_p10 }
  0x3a   :  { %920 = shalt.err (!%p917_p12)
}
  0x3b   :  { %s921_s15 = scalar_lea.vmem %s45_s22, 64  ;;  %p926_p0 = scmp.lt.s32.totalorder %s45_s22, %s45_s22 }
  0x3c   :  { %p922_p13 = scmp.ne.s32.totalorder %s45_s22, %s921_s15  ;;  %p927_p1 = scmp.lt.s32.totalorder %s921_s15, %s921_s15 }
  0x3e   :  { %p928_p2 = por %p927_p1, %p926_p0 }
  0x40   :  { %p929_p3 = pnand %p928_p2, %p922_p13 }
  0x42   :  { %932 = shalt.err (!%p929_p3)
}
  0x43   :  { %47 = dma.hbm_to_vmem [thread:$0]  %s1219_s2, 64, %s45_s22, [#allocation6]  }
  0x44   :  { %s991_s6 = smov [#allocation10]   ;;  %s933_s18 = scalar_lea.hbm %s1221_s4, 16 }
  0x45   :  { %s64_s16 = sshll.u32 %s991_s6, 4  ;;  %p934_p4 = scmp.ne.s32.totalorder %s1221_s4, %s933_s18  ;;  %s65_s16 = int_to_ptr.vmem [resolvable:$true] %s64_s16 }
  0x46   :  { %p937_p5 = scmp.lt.u32.totalorder %s933_s18, %s1221_s4 }
  0x48   :  { %p939_p6 = pnand %p937_p5, %p934_p4 }
  0x4a   :  { %942 = shalt.err (!%p939_p6)
}
  0x4b   :  { %s943_s25 = scalar_lea.vmem %s65_s16, 16  ;;  %s947_s2 = scalar_lea.vmem %s65_s16, 32 }
  0x4c   :  { %p944_p7 = scmp.ne.s32.totalorder %s65_s16, %s943_s25  ;;  %p948_p8 = scmp.lt.s32.totalorder %s65_s16, %s65_s16 }
  0x4d   :  { %p949_p9 = scmp.lt.s32.totalorder %s947_s2, %s943_s25 }
  0x4f   :  { %p950_p10 = por %p949_p9, %p948_p8 }
  0x51   :  { %p951_p11 = pnand %p950_p10, %p944_p7 }
  0x53   :  { %954 = shalt.err (!%p951_p11)
}
  0x54   :  { %67 = dma.hbm_to_vmem [thread:$0]  %s1221_s4, 16, %s65_s16, [#allocation9]  }
  0x55   :  { %977 = dma.done.wait [#allocation3], 1024  }
  0x56   :  { %978 = vsyncadd [#allocation3], 4294966272 }
  0x57   :  { %979 = dma.done.wait [#allocation6], 1088  }
  0x58   :  { %980 = vsyncadd [#allocation6], 4294966208 }
  0x59   :  { %981 = dma.done.wait [#allocation9], 80  }
  0x5a   :  { %982 = vsyncadd [#allocation9], 4294967216  ;;  %vm183_vm0 = vcmask 1043456   ;;  %vm158_vm1 = vcmask 64512   ;;  %v117_v0 = vld [vmem:[#allocation8] sm:$0xf] }
  0x5b   :  { %v100_v1 = vld [vmem:[#allocation7] sm:$0xf]  ;;  %753 = vmatprep.subr.msk.bf16.mxu1 %vm183_vm0, %v117_v0  ;;  %v185_v2 = vsel %vm183_vm0, %v117_v0, 0  ;;  %v767_v6 = vld [vmem:[#allocation5 + $0x8] sm:$0xff]   ;;  %v769_v8 = vld [vmem:[#allocation5 + $0x10] sm:$0xff]   ;;  %s992_s4 = smov [#allocation11]  }
  0x5c   :  { %754 = vmatprep.subr.msk.bf16.mxu0 %vm183_vm0, %v100_v1  ;;  %v349_v3 = vsel %vm183_vm0, %v100_v1, 0  ;;  %v765_v4 = vld [vmem:[#allocation5] sm:$0xff]   ;;  %702 = vmatpush3.bf16.msra.mxu1 %v185_v2  ;;  %v768_v7 = vld [vmem:[#allocation2 + $0x8] sm:$0xff]   ;;  %v770_v9 = vld [vmem:[#allocation2 + $0x10] sm:$0xff]   ;;  %s636_s27 = sshll.u32 %s992_s4, 4  ;;  %s637_s27 = int_to_ptr.vmem [resolvable:$true] %s636_s27 }
  0x5d   :  { %v766_v5 = vld [vmem:[#allocation2] sm:$0xff]   ;;  %720 = vmatpush3.bf16.msra.mxu0 %v349_v3  ;;  %703 = vmatprep.mubr.msk.bf16.mxu1 %vm158_vm1, %v765_v4  ;;  %v771_v10 = vld [vmem:[#allocation5 + $0x18] sm:$0xff]   ;;  %v775_v14 = vld [vmem:[#allocation5 + $0x28] sm:$0xff]   ;;  %s955_s28 = scalar_lea.vmem %s637_s27, 2048  ;;  %p960_p13 = scmp.lt.s32.totalorder %s637_s27, %s637_s27 }
  0x5e   :  { %721 = vmatprep.mubr.msk.bf16.mxu0 %vm158_vm1, %v766_v5  ;;  %v772_v11 = vld [vmem:[#allocation2 + $0x18] sm:$0xff]   ;;  %v773_v12 = vld [vmem:[#allocation5 + $0x20] sm:$0xff]   ;;  %v776_v15 = vld [vmem:[#allocation2 + $0x28] sm:$0xff]   ;;  %p956_p12 = scmp.ne.s32.totalorder %s637_s27, %s955_s28  ;;  %p961_p0 = scmp.lt.s32.totalorder %s955_s28, %s955_s28 }
  0x5f   :  { %704 = vmatmul.mubr.msk.bf16.vlgmr.msra.gmra.mrb[0].mxu1 %vm158_vm1, %v767_v6  ;;  %v774_v13 = vld [vmem:[#allocation2 + $0x20] sm:$0xff]   ;;  %v777_v16 = vld [vmem:[#allocation5 + $0x30] sm:$0xff]   ;;  %v779_v18 = vld [vmem:[#allocation5 + $0x38] sm:$0xff]  }
  0x60   :  { %722 = vmatmul.mubr.msk.bf16.vlgmr.msra.gmra.mrb[0].mxu0 %vm158_vm1, %v768_v7  ;;  %707 = vmatprep.mubr.msk.bf16.mxu1 %vm158_vm1, %v769_v8  ;;  %v778_v17 = vld [vmem:[#allocation2 + $0x30] sm:$0xff]   ;;  %v780_v19 = vld [vmem:[#allocation2 + $0x38] sm:$0xff]   ;;  %v1107_v22 = vld [vmem:[#allocation10] ss:$0 sm:$0xff]  ;;  %p962_p1 = por %p961_p0, %p960_p13 }
  0x61   :  { %725 = vmatprep.mubr.msk.bf16.mxu0 %vm158_vm1, %v770_v9 }
  0x62   :  { %p963_p2 = pnand %p962_p1, %p956_p12 }
  0x67   :  { %708 = vmatmul.mubr.msk.bf16.gmra.mrb[4].mxu1 %vm158_vm1, %v771_v10 }
  0x68   :  { %726 = vmatmul.mubr.msk.bf16.gmra.mrb[4].mxu0 %vm158_vm1, %v772_v11  ;;  %711 = vmatprep.mubr.msk.bf16.mxu1 %vm158_vm1, %v773_v12 }
  0x69   :  { %729 = vmatprep.mubr.msk.bf16.mxu0 %vm158_vm1, %v774_v13 }
  0x6f   :  { %712 = vmatmul.mubr.msk.bf16.gmra.mrb[8].mxu1 %vm158_vm1, %v775_v14 }
  0x70   :  { %730 = vmatmul.mubr.msk.bf16.gmra.mrb[8].mxu0 %vm158_vm1, %v776_v15  ;;  %715 = vmatprep.mubr.msk.bf16.mxu1 %vm158_vm1, %v777_v16 }
  0x71   :  { %733 = vmatprep.mubr.msk.bf16.mxu0 %vm158_vm1, %v778_v17 }
  0x77   :  { %716 = vmatmul.mubr.msk.bf16.gmra.mrb[12].mxu1 %vm158_vm1, %v779_v18 }
  0x78   :  { %734 = vmatmul.mubr.msk.bf16.gmra.mrb[12].mxu0 %vm158_vm1, %v780_v19 }
 0x132   :  { %v705_v20 = vpop.f32.mrb[0].mxu1 }
 0x133   :  { %v723_v21 = vpop.f32.mrb[0].mxu0  ;;  %v221_v23 = vpop.f32.mrb[1].mxu1 }
 0x134   :  { %v394_v24 = vadd.f32 %v723_v21, %v705_v20  ;;  %v385_v25 = vpop.f32.mrb[1].mxu0  ;;  %v706_v26 = vpop.f32.mrb[2].mxu1 }
 0x135   :  { %v386_v27 = vadd.f32 %v385_v25, %v221_v23  ;;  %v724_v28 = vpop.f32.mrb[2].mxu0  ;;  %v224_v29 = vpop.f32.mrb[3].mxu1 }
 0x136   :  { %v1110_v30 = vadd.f32 %v1107_v22, %v394_v24  ;;  %v397_v31 = vadd.f32 %v724_v28, %v706_v26  ;;  %v388_v32 = vpop.f32.mrb[3].mxu0 }
 0x137   :  { %v1113_v33 = vadd.f32 %v1107_v22, %v386_v27  ;;  %v389_v34 = vadd.f32 %v388_v32, %v224_v29 }
 0x138   :  { %v473_v35 = vmin.f32 %v1110_v30, 20.0  ;;  %v1117_v36 = vadd.f32 %v1107_v22, %v397_v31 }
 0x139   :  { %v471_v37 = vmin.f32 %v1113_v33, 20.0  ;;  %v1121_v38 = vadd.f32 %v1107_v22, %v389_v34 }
 0x13a   :  { %v491_v39 = vmul.f32 1.442695, %v473_v35  ;;  %v474_v40 = vmin.f32 %v1117_v36, 20.0  ;;  %v709_v41 = vpop.f32.mrb[4].mxu1 }
 0x13b   :  { %v487_v42 = vmul.f32 1.442695, %v471_v37  ;;  %v472_v43 = vmin.f32 %v1121_v38, 20.0  ;;  %v727_v44 = vpop.f32.mrb[4].mxu0  ;;  %v237_v45 = vpop.f32.mrb[5].mxu1 }
 0x13c   :  { %781 = vpow2.f32 %v491_v39  ;;  %v493_v46 = vmul.f32 1.442695, %v474_v40  ;;  %v410_v47 = vadd.f32 %v727_v44, %v709_v41  ;;  %v401_v48 = vpop.f32.mrb[5].mxu0  ;;  %v710_v49 = vpop.f32.mrb[6].mxu1 }
 0x13d   :  { %783 = vpow2.f32 %v487_v42  ;;  %v489_v50 = vmul.f32 1.442695, %v472_v43  ;;  %v402_v51 = vadd.f32 %v401_v48, %v237_v45  ;;  %v728_v52 = vpop.f32.mrb[6].mxu0  ;;  %v240_v53 = vpop.f32.mrb[7].mxu1 }
 0x13e   :  { %785 = vpow2.f32 %v493_v46  ;;  %v1126_v54 = vadd.f32 %v1107_v22, %v410_v47  ;;  %v413_v55 = vadd.f32 %v728_v52, %v710_v49  ;;  %v404_v56 = vpop.f32.mrb[7].mxu0 }
 0x13f   :  { %787 = vpow2.f32 %v489_v50  ;;  %v1129_v57 = vadd.f32 %v1107_v22, %v402_v51  ;;  %v405_v58 = vadd.f32 %v404_v56, %v240_v53 }
 0x140   :  { %v477_v59 = vmin.f32 %v1126_v54, 20.0  ;;  %v1133_v60 = vadd.f32 %v1107_v22, %v413_v55 }
 0x141   :  { %v475_v61 = vmin.f32 %v1129_v57, 20.0  ;;  %v1137_v62 = vadd.f32 %v1107_v22, %v405_v58 }
 0x142   :  { %v499_v63 = vmul.f32 1.442695, %v477_v59  ;;  %v478_v0 = vmin.f32 %v1133_v60, 20.0  ;;  %v713_v1 = vpop.f32.mrb[8].mxu1 }
 0x143   :  { %v495_v2 = vmul.f32 1.442695, %v475_v61  ;;  %v476_v3 = vmin.f32 %v1137_v62, 20.0  ;;  %v731_v4 = vpop.f32.mrb[8].mxu0  ;;  %v253_v5 = vpop.f32.mrb[9].mxu1 }
 0x144   :  { %789 = vpow2.f32 %v499_v63  ;;  %v501_v6 = vmul.f32 1.442695, %v478_v0  ;;  %v426_v7 = vadd.f32 %v731_v4, %v713_v1  ;;  %v417_v8 = vpop.f32.mrb[9].mxu0  ;;  %v714_v9 = vpop.f32.mrb[10].mxu1 }
 0x145   :  { %791 = vpow2.f32 %v495_v2  ;;  %v497_v10 = vmul.f32 1.442695, %v476_v3  ;;  %v418_v11 = vadd.f32 %v417_v8, %v253_v5  ;;  %v732_v12 = vpop.f32.mrb[10].mxu0  ;;  %v256_v13 = vpop.f32.mrb[11].mxu1 }
 0x146   :  { %v782_v14 = vpop.eup %781  ;;  %793 = vpow2.f32 %v501_v6  ;;  %v1142_v15 = vadd.f32 %v1107_v22, %v426_v7  ;;  %v429_v16 = vadd.f32 %v732_v12, %v714_v9  ;;  %v420_v17 = vpop.f32.mrb[11].mxu0 }
 0x147   :  { %v784_v18 = vpop.eup %783  ;;  %v521_v19 = vadd.f32 2.0, %v782_v14  ;;  %795 = vpow2.f32 %v497_v10  ;;  %v1145_v20 = vadd.f32 %v1107_v22, %v418_v11  ;;  %v421_v21 = vadd.f32 %v420_v17, %v256_v13 }
 0x148   :  { %v786_v23 = vpop.eup %785  ;;  %v519_v24 = vadd.f32 2.0, %v784_v18  ;;  %v481_v25 = vmin.f32 %v1142_v15, 20.0  ;;  %v1149_v26 = vadd.f32 %v1107_v22, %v429_v16 }
 0x149   :  { %v788_v27 = vpop.eup %787  ;;  %v537_v28 = vmul.f32 %v782_v14, %v521_v19  ;;  %v522_v29 = vadd.f32 2.0, %v786_v23  ;;  %v479_v31 = vmin.f32 %v1145_v20, 20.0  ;;  %v1153_v32 = vadd.f32 %v1107_v22, %v421_v21 }
 0x14a   :  { %v535_v34 = vmul.f32 %v784_v18, %v519_v24  ;;  %v520_v35 = vadd.f32 2.0, %v788_v27  ;;  %v507_v37 = vmul.f32 1.442695, %v481_v25  ;;  %v482_v39 = vmin.f32 %v1149_v26, 20.0  ;;  %v717_v40 = vpop.f32.mrb[12].mxu1 }
 0x14b   :  { %v569_v41 = vadd.f32 2.0, %v537_v28  ;;  %v538_v42 = vmul.f32 %v786_v23, %v522_v29  ;;  %v735_v43 = vpop.f32.mrb[12].mxu0  ;;  %v269_v44 = vpop.f32.mrb[13].mxu1  ;;  %v503_v50 = vmul.f32 1.442695, %v479_v31  ;;  %v480_v58 = vmin.f32 %v1153_v32, 20.0 }
 0x14c   :  { %v567_v45 = vadd.f32 2.0, %v535_v34  ;;  %v536_v46 = vmul.f32 %v788_v27, %v520_v35  ;;  %797 = vpow2.f32 %v507_v37  ;;  %v433_v47 = vpop.f32.mrb[13].mxu0  ;;  %v718_v48 = vpop.f32.mrb[14].mxu1  ;;  %v509_v56 = vmul.f32 1.442695, %v482_v39 }
 0x14d   :  { %799 = vrcp.f32 %v569_v41  ;;  %v570_v49 = vadd.f32 2.0, %v538_v42  ;;  %v736_v51 = vpop.f32.mrb[14].mxu0  ;;  %v272_v52 = vpop.f32.mrb[15].mxu1  ;;  %v442_v0 = vadd.f32 %v735_v43, %v717_v40  ;;  %v434_v1 = vadd.f32 %v433_v47, %v269_v44 }
 0x14e   :  { %v790_v53 = vpop.eup %789  ;;  %801 = vrcp.f32 %v567_v45  ;;  %v568_v55 = vadd.f32 2.0, %v536_v46  ;;  %v436_v59 = vpop.f32.mrb[15].mxu0  ;;  %v505_v4 = vmul.f32 1.442695, %v480_v58  ;;  %v445_v5 = vadd.f32 %v736_v51, %v718_v48 }
 0x14f   :  { %v792_v61 = vpop.eup %791  ;;  %803 = vrcp.f32 %v570_v49  ;;  %v525_v63 = vadd.f32 2.0, %v790_v53  ;;  %v1158_v9 = vadd.f32 %v1107_v22, %v442_v0  ;;  %v1161_v12 = vadd.f32 %v1107_v22, %v434_v1 }
 0x150   :  { %v794_v2 = vpop.eup %793  ;;  %805 = vrcp.f32 %v568_v55  ;;  %v523_v3 = vadd.f32 2.0, %v792_v61  ;;  %v553_v16 = vmul.f32 %v537_v28, %v1110_v30  ;;  %v551_v21 = vmul.f32 %v535_v34, %v1113_v33 }
 0x151   :  { %v796_v6 = vpop.eup %795  ;;  %v541_v7 = vmul.f32 %v790_v53, %v525_v63  ;;  %v526_v8 = vadd.f32 2.0, %v794_v2  ;;  %807 = vpow2.f32 %v503_v50  ;;  %v485_v19 = vmin.f32 %v1158_v9, 20.0 }
 0x152   :  { %v539_v10 = vmul.f32 %v792_v61, %v523_v3  ;;  %v524_v11 = vadd.f32 2.0, %v796_v6  ;;  %809 = vpow2.f32 %v509_v56  ;;  %v483_v24 = vmin.f32 %v1161_v12, 20.0 }
 0x153   :  { %v573_v13 = vadd.f32 2.0, %v541_v7  ;;  %v542_v14 = vmul.f32 %v794_v2, %v526_v8  ;;  %811 = vpow2.f32 %v505_v4  ;;  %v554_v27 = vmul.f32 %v538_v42, %v1117_v36 }
 0x154   :  { %v571_v17 = vadd.f32 2.0, %v539_v10  ;;  %v540_v18 = vmul.f32 %v796_v6, %v524_v11  ;;  %v515_v31 = vmul.f32 1.442695, %v485_v19  ;;  %v511_v30 = vmul.f32 1.442695, %v483_v24 }
 0x155   :  { %813 = vrcp.f32 %v573_v13  ;;  %v574_v23 = vadd.f32 2.0, %v542_v14  ;;  %v1169_v28 = vadd.f32 %v1107_v22, %v445_v5  ;;  %v552_v33 = vmul.f32 %v536_v46, %v1121_v38 }
 0x156   :  { %v798_v25 = vpop.eup %797  ;;  %815 = vrcp.f32 %v571_v17  ;;  %v572_v29 = vadd.f32 2.0, %v540_v18  ;;  %v437_v34 = vadd.f32 %v436_v59, %v272_v52  ;;  %v557_v55 = vmul.f32 %v541_v7, %v1126_v54 }
 0x157   :  { %v800_v35 = vpop.eup %799  ;;  %817 = vrcp.f32 %v574_v23  ;;  %v529_v37 = vadd.f32 2.0, %v798_v25  ;;  %v486_v36 = vmin.f32 %v1169_v28, 20.0  ;;  %v555_v63 = vmul.f32 %v539_v10, %v1129_v57 }
 0x158   :  { %v802_v39 = vpop.eup %801  ;;  %v601_v40 = vmul.f32 %v800_v35, %v553_v16  ;;  %819 = vrcp.f32 %v572_v29  ;;  %v1175_v47 = vadd.f32 %v1107_v22, %v437_v34  ;;  %v558_v3 = vmul.f32 %v542_v14, %v1133_v60 }
 0x159   :  { %v804_v41 = vpop.eup %803  ;;  %v599_v43 = vmul.f32 %v802_v39, %v551_v21  ;;  %v545_v44 = vmul.f32 %v798_v25, %v529_v37  ;;  %821 = vpow2.f32 %v515_v31  ;;  %v517_v49 = vmul.f32 1.442695, %v486_v36 }
 0x15a   :  { %v806_v42 = vpop.eup %805  ;;  %617 = vst.msk [vmem:[#allocation11 + $0x10] sm:$0xff] %vm158_vm1, %v601_v40  ;;  %v602_v45 = vmul.f32 %v804_v41, %v554_v27  ;;  %823 = vpow2.f32 %v511_v30  ;;  %v484_v52 = vmin.f32 %v1175_v47, 20.0  ;;  %v556_v54 = vmul.f32 %v540_v18, %v1137_v62 }
 0x15b   :  { %v808_v48 = vpop.eup %807  ;;  %615 = vst.msk [vmem:[#allocation11] sm:$0xff] %vm158_vm1, %v599_v43  ;;  %v600_v38 = vmul.f32 %v806_v42, %v552_v33  ;;  %v577_v46 = vadd.f32 2.0, %v545_v44  ;;  %v561_v17 = vmul.f32 %v545_v44, %v1142_v15 }
 0x15c   :  { %v810_v50 = vpop.eup %809  ;;  %618 = vst.msk [vmem:[#allocation11 + $0x18] sm:$0xff] %vm158_vm1, %v602_v45  ;;  %v527_v51 = vadd.f32 2.0, %v808_v48  ;;  %v513_v59 = vmul.f32 1.442695, %v484_v52 }
 0x15d   :  { %v812_v53 = vpop.eup %811  ;;  %616 = vst.msk [vmem:[#allocation11 + $0x8] sm:$0xff] %vm158_vm1, %v600_v38  ;;  %825 = vrcp.f32 %v577_v46  ;;  %v530_v22 = vadd.f32 2.0, %v810_v50 }
 0x15e   :  { %v543_v56 = vmul.f32 %v808_v48, %v527_v51  ;;  %v528_v58 = vadd.f32 2.0, %v812_v53  ;;  %827 = vpow2.f32 %v517_v49 }
 0x15f   :  { %v814_v61 = vpop.eup %813  ;;  %v546_v0 = vmul.f32 %v810_v50, %v530_v22  ;;  %829 = vpow2.f32 %v513_v59 }
 0x160   :  { %v816_v1 = vpop.eup %815  ;;  %v605_v2 = vmul.f32 %v814_v61, %v557_v55  ;;  %v575_v4 = vadd.f32 2.0, %v543_v56  ;;  %v544_v5 = vmul.f32 %v812_v53, %v528_v58  ;;  %v559_v35 = vmul.f32 %v543_v56, %v1145_v20 }
 0x161   :  { %v818_v6 = vpop.eup %817  ;;  %v603_v8 = vmul.f32 %v816_v1, %v555_v63  ;;  %v578_v7 = vadd.f32 2.0, %v546_v0  ;;  %v562_v39 = vmul.f32 %v546_v0, %v1149_v26 }
 0x162   :  { %v820_v11 = vpop.eup %819  ;;  %621 = vst.msk [vmem:[#allocation11 + $0x30] sm:$0xff] %vm158_vm1, %v605_v2  ;;  %v606_v13 = vmul.f32 %v818_v6, %v558_v3  ;;  %831 = vrcp.f32 %v575_v4  ;;  %v576_v16 = vadd.f32 2.0, %v544_v5  ;;  %v560_v34 = vmul.f32 %v544_v5, %v1153_v32 }
 0x163   :  { %v822_v57 = vpop.eup %821  ;;  %619 = vst.msk [vmem:[#allocation11 + $0x20] sm:$0xff] %vm158_vm1, %v603_v8  ;;  %v604_v10 = vmul.f32 %v820_v11, %v556_v54  ;;  %833 = vrcp.f32 %v578_v7 }
 0x164   :  { %v824_v60 = vpop.eup %823  ;;  %622 = vst.msk [vmem:[#allocation11 + $0x38] sm:$0xff] %vm158_vm1, %v606_v13  ;;  %835 = vrcp.f32 %v576_v16  ;;  %v533_v14 = vadd.f32 2.0, %v822_v57 }
 0x165   :  { %620 = vst.msk [vmem:[#allocation11 + $0x28] sm:$0xff] %vm158_vm1, %v604_v10  ;;  %v531_v62 = vadd.f32 2.0, %v824_v60 }
 0x166   :  { %v549_v18 = vmul.f32 %v822_v57, %v533_v14 }
 0x167   :  { %v826_v19 = vpop.eup %825  ;;  %v547_v21 = vmul.f32 %v824_v60, %v531_v62 }
 0x168   :  { %v828_v23 = vpop.eup %827  ;;  %v609_v24 = vmul.f32 %v826_v19, %v561_v17  ;;  %v581_v25 = vadd.f32 2.0, %v549_v18  ;;  %v565_v26 = vmul.f32 %v549_v18, %v1158_v9 }
 0x169   :  { %v579_v27 = vadd.f32 2.0, %v547_v21  ;;  %v534_v29 = vadd.f32 2.0, %v828_v23  ;;  %v830_v31 = vpop.eup %829  ;;  %v563_v48 = vmul.f32 %v547_v21, %v1161_v12 }
 0x16a   :  { %625 = vst.msk [vmem:[#allocation11 + $0x50] sm:$0xff] %vm158_vm1, %v609_v24  ;;  %837 = vrcp.f32 %v581_v25  ;;  %v532_v15 = vadd.f32 2.0, %v830_v31 }
 0x16b   :  { %839 = vrcp.f32 %v579_v27  ;;  %v550_v37 = vmul.f32 %v828_v23, %v534_v29 }
 0x16c   :  { %v832_v30 = vpop.eup %831  ;;  %v548_v36 = vmul.f32 %v830_v31, %v532_v15 }
 0x16d   :  { %v834_v40 = vpop.eup %833  ;;  %v607_v33 = vmul.f32 %v832_v30, %v559_v35  ;;  %v582_v41 = vadd.f32 2.0, %v550_v37  ;;  %v566_v49 = vmul.f32 %v550_v37, %v1169_v28 }
 0x16e   :  { %v836_v43 = vpop.eup %835  ;;  %v610_v44 = vmul.f32 %v834_v40, %v562_v39  ;;  %v580_v20 = vadd.f32 2.0, %v548_v36  ;;  %v564_v52 = vmul.f32 %v548_v36, %v1175_v47 }
 0x16f   :  { %623 = vst.msk [vmem:[#allocation11 + $0x40] sm:$0xff] %vm158_vm1, %v607_v33  ;;  %v608_v42 = vmul.f32 %v836_v43, %v560_v34  ;;  %841 = vrcp.f32 %v582_v41 }
 0x170   :  { %626 = vst.msk [vmem:[#allocation11 + $0x58] sm:$0xff] %vm158_vm1, %v610_v44  ;;  %843 = vrcp.f32 %v580_v20 }
 0x171   :  { %624 = vst.msk [vmem:[#allocation11 + $0x48] sm:$0xff] %vm158_vm1, %v608_v42 }
 0x174   :  { %v838_v45 = vpop.eup %837 }
 0x175   :  { %v840_v32 = vpop.eup %839  ;;  %v613_v38 = vmul.f32 %v838_v45, %v565_v26 }
 0x176   :  { %v611_v46 = vmul.f32 %v840_v32, %v563_v48 }
 0x177   :  { %629 = vst.msk [vmem:[#allocation11 + $0x70] sm:$0xff] %vm158_vm1, %v613_v38 }
 0x178   :  { %627 = vst.msk [vmem:[#allocation11 + $0x60] sm:$0xff] %vm158_vm1, %v611_v46 }
 0x179   :  { %v842_v50 = vpop.eup %841 }
 0x17a   :  { %v614_v51 = vmul.f32 %v842_v50, %v566_v49  ;;  %v844_v53 = vpop.eup %843 }
 0x17b   :  { %v612_v9 = vmul.f32 %v844_v53, %v564_v52 }
 0x17c   :  { %630 = vst.msk [vmem:[#allocation11 + $0x78] sm:$0xff] %vm158_vm1, %v614_v51 }
 0x17d   :  { %628 = vst.msk [vmem:[#allocation11 + $0x68] sm:$0xff] %vm158_vm1, %v612_v9 }
 0x17e   :  { %966 = shalt.err (!%p963_p2)
}
 0x17f   :  { %s967_s21 = scalar_lea.hbm %s1222_s5, 2048 }
 0x180   :  { %p968_p3 = scmp.ne.s32.totalorder %s1222_s5, %s967_s21  ;;  %p971_p4 = scmp.lt.u32.totalorder %s967_s21, %s1222_s5 }
 0x182   :  { %p973_p5 = pnand %p971_p4, %p968_p3 }
 0x184   :  { %976 = shalt.err (!%p973_p5)
}
 0x185   :  { %s993_s11 = smov 128   ;;  %s994_s12 = smov 8  }
 0x186   :  { %642 = dma.vmem_to_hbm [thread:$0]  %s637_s27, 2048, %s1222_s5, [#allocation4], %s993_s11, %s993_s11, %s994_s12  }
 0x187   :  { %983 = dma.done.wait [#allocation4], 2048  }
 0x188   :  { %984 = vsyncadd [#allocation4], 4294965248 }
 0x189   :  { %646 = vsyncpa [#allocation3], 1 }
 0x18a   :  { %647 = vsyncpa [#allocation6], 1 }
 0x18b   :  { %648 = vsyncpa [#allocation9], 1 }
 0x18c   :  { %649 = vsyncpa [#allocation4], 1 }

// kernel: csp_block_forward.9
= control target key start
LH: loop header
LB: loop body
LE: loop exit
PB: predicated region body
PF: predicated region fallthrough
CT: control target
= control target key end

     0   :  { %9 = vsyncpa [#allocation3], 0  ;;  %s3175_s0 = inlined_call_operand.hbm [shape: f32[2,1,10,10,8], index: 0, kind: input, shape index: {}]   ;;  %s3176_s1 = inlined_call_operand.hbm [shape: f32[3,3,8,8], index: 1, kind: input, shape index: {}]   ;;  %s3177_s2 = inlined_call_operand.hbm [shape: f32[1,8], index: 2, kind: input, shape index: {}]   ;;  %s3178_s3 = inlined_call_operand.hbm [shape: bf16[2,64,8], index: 3, kind: input, shape index: {}]   ;;  %s3179_s4 = inlined_call_operand.hbm [shape: bf16[2,64,8], index: 4, kind: output, shape index: {}]  }
   0x1   :  { %11 = vsyncpa [#allocation3 + $0x1], 0 }
   0x2   :  { %12 = vsyncpa [#allocation6], 0 }
   0x3   :  { %13 = vsyncpa [#allocation9], 0 }
   0x4   :  { %15 = vsyncpa [#allocation9 + $0x1], 0 }
   0x5   :  { %16 = vsyncpa [#allocation4], 0 }
   0x6   :  { %18 = vsyncpa [#allocation4 + $0x1], 0  ;;  %s2664_s15 = smov 0   ;;  %s2666_s16 = smov 0  }
   0x7   :  { %s2668_s17 = smov 0   ;;  %s2670_s18 = smov 0  }
   0x8 LB: > { %s2685_s19 = sadd.s32 4294967295, %s2626_s18   ;;  %s1873_s20 = sadd.s32 4294967294, %s2626_s18   ;;  %s2626_s18 = sphi %s2670_s18, %s3205_s18   ;;  %s2622_s17 = sphi %s2668_s17, %s3204_s17   ;;  %s2618_s16 = sphi %s2666_s16, %s3203_s16   ;;  %s2614_s15 = sphi %s2664_s15, %s3202_s15  }
   0x9   : > { %s2689_s21 = sadd.s32 1, %s2626_s18   ;;  %s31_s22 = sadd.s32 1, %s2622_s17 }
   0xa   : > { %s28_s23 = ssub.s32 %s2626_s18, %s2689_s21  ;;  %p38_p0 = scmp.ne.s32.totalorder %s2622_s17, %s2618_s16 }
   0xb   : > { %p29_p1 = scmp.eq.s32.totalorder %s28_s23, 0  ;;  %p39_p2 = scmp.eq.s32.totalorder %s2626_s18, 0 }
   0xc   : > { %p44_p3 = scmp.ne.s32.totalorder %s2618_s16, %s2614_s15  ;;  %p3180_p4 = scmp.eq.s32.totalorder %s2685_s19, 0 }
   0xd   : > { %s2701_s24 = scalar_select %p29_p1, %s2622_s17, %s31_s22  }
   0xe   : > { %p2703_p5 = por %p39_p2, %p38_p0  ;;  %p2709_p6 = por %p3180_p4, %p44_p3 }
   0xf   : > { %3184 = sst [smem:[#allocation15_spill]] %s2701_s24  ;;  %p136_p7 = scmp.eq.s32.totalorder %s2685_s19, 1 }
  0x10   : > { %s3185_s25 = scalar_select %p2703_p5, 1, 0 }
  0x11   : > { %s3186_s26 = scalar_select %p2709_p6, 1, 0 }
  0x12   : > { %p142_p8 = scmp.eq.s32.totalorder %s1873_s20, 1  ;;  %p1874_p9 = scmp.ge.s32.totalorder %s2626_s18, 1 }
  0x13   : > { %p149_p10 = scmp.lt.s32.totalorder %s2626_s18, 3  ;;  %p2716_p11 = por %p136_p7, %p38_p0 }
  0x14   : > { %p2720_p12 = por %p142_p8, %p44_p3  ;;  %s2628_s30 = smov [#allocation5]  }
  0x15   : > { %s3187_s27 = scalar_select %p2716_p11, 1, 0 }
  0x16   : > { %s3188_s28 = scalar_select %p2720_p12, 1, 0 }
  0x17   : > { %p2724_p13 = pnand %p1874_p9, %p149_p10  ;;  %s161_s5 = sshll.u32 %s2628_s30, 4  ;;  %s162_s5 = int_to_ptr.vmem [resolvable:$true] %s161_s5 }
  0x18   : > { %s2629_s7 = smov [#allocation7]   ;;  %s2436_s11 = scalar_lea.hbm %s3176_s1, 1152 }
  0x19   : > { %s3189_s29 = scalar_select %p2724_p13, 1, 0 }
  0x1a   : > { %p2340_p1 = pneg %p2724_p13  ;;  %s175_s8 = sshll.u32 %s2629_s7, 4  ;;  %s176_s8 = int_to_ptr.vmem [resolvable:$true] %s175_s8 }
  0x1b   : > { %p2437_p7 = scmp.ne.s32.totalorder %s3176_s1, %s2436_s11 }
  0x1c   : > { %p2732_p2 = pnand %p2340_p1, %p3180_p4  ;;  %p2443_p1 = scmp.lt.u32.totalorder %s2436_s11, %s3176_s1 }
  0x1e   : > { %p2438_p8 = pneg %p2732_p2 }
  0x20   : > { %p2439_p9 = pnand %p2438_p8, %p2437_p7 }
  0x22   : > { %p2440_p10 = pneg %p2439_p9 }
  0x24   : > { %p2445_p0 = pnand %p2443_p1, %p2440_p10 }
  0x26   : > { %2448 = shalt.err (!%p2445_p0)
}
  0x27   : > { %s2449_s22 = scalar_lea.vmem %s162_s5, 1152  ;;  %p2457_p11 = scmp.lt.s32.totalorder %s162_s5, %s162_s5 }
  0x28   : > { %p2450_p4 = scmp.ne.s32.totalorder %s162_s5, %s2449_s22  ;;  %p2458_p6 = scmp.lt.s32.totalorder %s2449_s22, %s2449_s22 }
  0x2a   : > { %p2452_p3 = pnand %p2450_p4, %p2438_p8  ;;  %p2459_p13 = por %p2458_p6, %p2457_p11 }
  0x2c   : > { %p2453_p12 = pneg %p2452_p3 }
  0x2e   : > { %p2460_p5 = pnand %p2459_p13, %p2453_p12 }
  0x30   : > { %2463 = shalt.err (!%p2460_p5)
}
  0x31   : > { %s2630_s23 = smov 128   ;;  %s2631_s30 = smov 8  }
  0x32   : > { %2343 = dma.hbm_to_vmem [thread:$0]  (!%p2732_p2), %s3176_s1, 1152, %s162_s5, [#allocation6], %s2630_s23, %s2630_s23, %s2631_s30  }
  0x33   : > { %s2764_s10 = sand.u32 1, %s2622_s17   ;;  %s2464_s13 = scalar_lea.hbm %s3177_s2, 16 }
  0x34   : > { %p2465_p4 = scmp.ne.s32.totalorder %s3177_s2, %s2464_s13  ;;  %p2471_p11 = scmp.lt.u32.totalorder %s2464_s13, %s3177_s2 }
  0x36   : > { %p2467_p5 = pnand %p2465_p4, %p2438_p8 }
  0x38   : > { %p2468_p6 = pneg %p2467_p5 }
  0x3a   : > { %p2473_p12 = pnand %p2471_p11, %p2468_p6 }
  0x3c   : > { %2476 = shalt.err (!%p2473_p12)
}
  0x3d   : > { %s2477_s5 = scalar_lea.vmem %s176_s8, 16  ;;  %s2484_s7 = scalar_lea.vmem %s176_s8, 32 }
  0x3e   : > { %p2478_p13 = scmp.ne.s32.totalorder %s176_s8, %s2477_s5  ;;  %p2485_p7 = scmp.lt.s32.totalorder %s176_s8, %s176_s8 }
  0x3f   : > { %p2486_p9 = scmp.lt.s32.totalorder %s2484_s7, %s2477_s5 }
  0x40   : > { %p2480_p0 = pnand %p2478_p13, %p2438_p8 }
  0x41   : > { %p2487_p10 = por %p2486_p9, %p2485_p7 }
  0x42   : > { %p2481_p3 = pneg %p2480_p0 }
  0x44   : > { %p2488_p1 = pnand %p2487_p10, %p2481_p3 }
  0x46   : > { %2491 = shalt.err (!%p2488_p1)
}
  0x47   : > { %2346 = dma.hbm_to_vmem [thread:$0]  (!%p2732_p2), %s3177_s2, 16, %s176_s8, [#allocation6]  }
  0x48   : > { %s2323_s11 = smul.u32 160, %s2764_s10  ;;  %p3191_p8 = scmp.ne.s32.totalorder %s3185_s25, 0 }
  0x49   : > { %s2324_s12 = smul.u32 2560, %s2626_s18  ;;  %p3192_p4 = scmp.lt.s32.totalorder %s2626_s18, 2 }
  0x4a   : > { %s190_s8 = scalar_lea.vmem [#allocation2], %s2323_s11  ;;  %s187_s25 = scalar_lea.sflag [#allocation3], %s2764_s10 }
  0x4b   : > { %p2792_p5 = pnand %p3192_p4, %p3191_p8  ;;  %s2799_s6 = scalar_lea.hbm %s3175_s0, %s2324_s12 }
  0x4c   : > { %s197_s22 = sshll.u32 %s190_s8, 4  ;;  %s2492_s5 = scalar_lea.hbm %s2799_s6, 2560  ;;  %s2801_s22 = int_to_ptr.vmem [resolvable:$true] %s197_s22 }
  0x4d   : > { %p2493_p2 = scmp.ne.s32.totalorder %s2799_s6, %s2492_s5  ;;  %p2494_p6 = pneg %p2792_p5 }
  0x4e   : > { %s2497_s24 = scalar_lea.hbm %s3175_s0, 5120  ;;  %p2498_p13 = scmp.lt.u32.totalorder %s2799_s6, %s3175_s0 }
  0x4f   : > { %p2495_p11 = pnand %p2494_p6, %p2493_p2  ;;  %p2499_p0 = scmp.lt.u32.totalorder %s2497_s24, %s2492_s5 }
  0x50   : > { %p2501_p7 = scmp.lt.u32.totalorder %s2492_s5, %s2799_s6 }
  0x51   : > { %p2496_p12 = pneg %p2495_p11  ;;  %p2500_p3 = por %p2499_p0, %p2498_p13 }
  0x53   : > { %p2502_p9 = por %p2501_p7, %p2500_p3 }
  0x55   : > { %p2503_p10 = pnand %p2502_p9, %p2496_p12 }
  0x57   : > { %2506 = shalt.err (!%p2503_p10)
}
  0x58   : > { %s2507_s11 = scalar_lea.vmem %s2801_s22, 2560  ;;  %s2632_s20 = smov [#allocation2]  }
  0x59   : > { %p2508_p1 = scmp.ne.s32.totalorder %s2801_s22, %s2507_s11  ;;  %s2512_s8 = sshll.u32 %s2632_s20, 4  ;;  %s2513_s8 = int_to_ptr.vmem [resolvable:$false] %s2512_s8 }
  0x5a   : > { %s2514_s7 = scalar_lea.vmem %s2513_s8, 5120  ;;  %p2515_p2 = scmp.lt.s32.totalorder %s2801_s22, %s2513_s8 }
  0x5b   : > { %p2510_p8 = pnand %p2508_p1, %p2494_p6  ;;  %p2516_p11 = scmp.lt.s32.totalorder %s2514_s7, %s2507_s11 }
  0x5d   : > { %p2511_p4 = pneg %p2510_p8  ;;  %p2517_p13 = por %p2516_p11, %p2515_p2 }
  0x5f   : > { %p2518_p0 = pnand %p2517_p13, %p2511_p4 }
  0x61   : > { %2521 = shalt.err (!%p2518_p0)
}
  0x62   : > { %2350 = dma.hbm_to_vmem [thread:$0]  (!%p2792_p5), %s2799_s6, 2560, %s2801_s22, %s187_s25, %s2630_s23, %s2630_s23, %s2631_s30  }
  0x63   : > { %s1879_s5 = sshll.u32 %s2764_s10, 5  ;;  %s2021_s9 = sshll.u32 %s2626_s18, 9 }
  0x64   : > { %s2839_s14 = scalar_lea.hbm %s3178_s3, %s2021_s9  ;;  %s211_s11 = scalar_lea.vmem [#allocation8], %s1879_s5 }
  0x65   : > { %s218_s20 = sshll.u32 %s211_s11, 4  ;;  %s208_s8 = scalar_lea.sflag [#allocation9], %s2764_s10  ;;  %s2841_s20 = int_to_ptr.vmem [resolvable:$true] %s218_s20 }
  0x66   : > { %s2522_s7 = scalar_lea.hbm %s2839_s14, 512  ;;  %s2527_s6 = scalar_lea.hbm %s3178_s3, 1024 }
  0x67   : > { %p2523_p12 = scmp.ne.s32.totalorder %s2839_s14, %s2522_s7  ;;  %p2528_p9 = scmp.lt.u32.totalorder %s2839_s14, %s3178_s3 }
  0x68   : > { %p2529_p10 = scmp.lt.u32.totalorder %s2527_s6, %s2522_s7  ;;  %p2531_p8 = scmp.lt.u32.totalorder %s2522_s7, %s2839_s14 }
  0x69   : > { %p2525_p3 = pnand %p2523_p12, %p2494_p6 }
  0x6a   : > { %p2530_p1 = por %p2529_p10, %p2528_p9 }
  0x6b   : > { %p2526_p7 = pneg %p2525_p3 }
  0x6c   : > { %p2532_p4 = por %p2531_p8, %p2530_p1 }
  0x6e   : > { %p2533_p2 = pnand %p2532_p4, %p2526_p7 }
  0x70   : > { %2536 = shalt.err (!%p2533_p2)
}
  0x71   : > { %s2537_s5 = scalar_lea.vmem %s2841_s20, 512  ;;  %s2633_s9 = smov [#allocation8]  }
  0x72   : > { %p2538_p11 = scmp.ne.s32.totalorder %s2841_s20, %s2537_s5  ;;  %s2542_s24 = sshll.u32 %s2633_s9, 4  ;;  %s2543_s24 = int_to_ptr.vmem [resolvable:$false] %s2542_s24 }
  0x73   : > { %s2544_s12 = scalar_lea.vmem %s2543_s24, 1024  ;;  %p2545_p12 = scmp.lt.s32.totalorder %s2841_s20, %s2543_s24 }
  0x74   : > { %p2540_p13 = pnand %p2538_p11, %p2494_p6  ;;  %p2546_p3 = scmp.lt.s32.totalorder %s2544_s12, %s2537_s5 }
  0x76   : > { %p2541_p0 = pneg %p2540_p13  ;;  %p2547_p9 = por %p2546_p3, %p2545_p12 }
  0x78   : > { %p2548_p10 = pnand %p2547_p9, %p2541_p0 }
  0x7a   : > { %2551 = shalt.err (!%p2548_p10)
}
  0x7b   : > { %s2634_s11 = smov 64   ;;  %s2635_s7 = smov 4  }
  0x7c   : > { %2353 = dma.hbm_to_vmem [thread:$0]  (!%p2792_p5), %s2839_s14, 512, %s2841_s20, %s208_s8, %s2634_s11, %s2634_s11, %s2635_s7  }
  0x7d   : > { %p3194_p6 = scmp.ne.s32.totalorder %s3189_s29, 0 }
  0x7e   : > { %s2872_s23 = sand.u32 (!%p3194_p6), 1, %s2618_s16   ;;  %p3195_p7 = scmp.ne.s32.totalorder (!%p3194_p6), %s3186_s26, 0 }
  0x7f   : > { %230 = sbr.rel (%p3194_p6) target bundleno = 484 (0x1e4), region = 36  ;;  %s233_s6 = scalar_lea.sflag (!%p3194_p6), [#allocation3], %s2872_s23 }
  0x80   : > { %s2325_s30 = smul.u32 (!%p3194_p6), 160, %s2872_s23 }
  0x82   : > { %s2876_s22 = scalar_lea.vmem (!%p3194_p6), [#allocation2], %s2325_s30 }
  0x86   : > { %2597 = dma.done.wait (%p3195_p7), %s233_s6, 2560  }
  0x87   : > { %2599 = vsyncadd (%p3195_p7), %s233_s6, 4294964736  ;;  %p3196_p5 = scmp.eq.s32.totalorder %s2685_s19, 0 }
  0x89   : > { %2601 = dma.done.wait (%p3196_p5), [#allocation6], 1168   ;;  %p3197_p1 = pmov %p3196_p5 }
  0x8a   : > { %s1885_s29 = sshll.u32 %s2872_s23, 5  ;;  %s250_s10 = scalar_lea.sflag [#allocation9], %s2872_s23 }
  0x8b   : > { %2603 = vsyncadd (%p3197_p1), [#allocation6], 4294966128  ;;  %s2890_s13 = scalar_lea.vmem [#allocation8], %s1885_s29 }
  0x8c   : > { %2605 = dma.done.wait (%p3195_p7), %s250_s10, 512  }
  0x8d   : > { %2607 = vsyncadd (%p3195_p7), %s250_s10, 4294966784  ;;  %vm302_vm0 = vcmask 64512   ;;  %v301_v0 = vld [vmem:[#allocation5 + $0x8] sm:$0xff]  ;;  %v2896_v1 = vld [vmem:[#allocation5 + $0x20] sm:$0xff]  ;;  %vm1735_vm1 = vcmask 60416   ;;  %s3101_s26 = scalar_lea.vmem [#allocation10], %s1885_s29 }
  0x8e   : > { %v292_v2 = vld [vmem:[%s2876_s22 + $0x1] sm:$0xff]  ;;  %2131 = vmatprep.subr.mxu1 %v301_v0  ;;  %2187 = vmatprep.subr.mxu0 %v2896_v1  ;;  %v1927_v3 = vld [vmem:[%s2876_s22 + $0x11] sm:$0xff]  ;;  %s2030_s14 = sshll.u32 %s2685_s19, 9  ;;  %s1758_s20 = sshll.u32 %s3101_s26, 4  ;;  %s3127_s20 = int_to_ptr.vmem [resolvable:$true] %s1758_s20 }
  0x8f   : > { %v291_v4 = vld [vmem:[#allocation5] sm:$0xff]  ;;  %2132 = vmatpush3.msra.mxu1 %v301_v0  ;;  %2133 = vmatprep.mubr.msk.f32.mxu1 %vm302_vm0, %v292_v2  ;;  %v1012_v6 = vld [vmem:[#allocation5 + $0x28] sm:$0xff]  ;;  %v2909_v7 = vld [vmem:[%s2876_s22 + $0x31] sm:$0xff]  ;;  %s3125_s5 = scalar_lea.hbm %s3179_s4, %s2030_s14  ;;  %s1745_s19 = scalar_lea.sflag [#allocation4], %s2872_s23 }
  0x90   : > { %v2903_v5 = vld [vmem:[%s2876_s22 + $0x21] sm:$0xff]  ;;  %2188 = vmatpush3.msra.mxu0 %v2896_v1  ;;  %2189 = vmatprep.mubr.msk.f32.mxu0 %vm302_vm0, %v1927_v3  ;;  %v1160_v8 = vld [vmem:[#allocation5 + $0x30] sm:$0xff]  ;;  %v1307_v16 = vld [vmem:[#allocation5 + $0x38] sm:$0xff]  ;;  %s2552_s9 = scalar_lea.vmem %s3127_s20, 512  ;;  %p3198_p4 = scmp.ne.s32.totalorder %s3187_s27, 0 }
  0x91   : > { %2134 = vmatmul.mubr.msk.f32.vlgmr.msra.gmra.mrb[0].mxu1 %vm302_vm0, %v1927_v3  ;;  %2145 = vmatprep.subr.mxu1 %v291_v4  ;;  %v2914_v9 = vld [vmem:[%s2876_s22 + $0x41] sm:$0xff]  ;;  %v1943_v10 = vld [vmem:[%s2876_s22 + $0x12] sm:$0xff]  ;;  %p2553_p8 = scmp.ne.s32.totalorder %s3127_s20, %s2552_s9  ;;  %s2636_s24 = smov [#allocation10]  }
  0x92   : > { %2190 = vmatmul.mubr.msk.f32.vlgmr.msra.gmra.mrb[0].mxu0 %vm302_vm0, %v2903_v5  ;;  %2201 = vmatprep.subr.mxu0 %v1012_v6  ;;  %v570_v11 = vld [vmem:[#allocation5 + $0x10] sm:$0xff]  ;;  %v2932_v13 = vld [vmem:[%s2876_s22 + $0x22] sm:$0xff]  ;;  %v718_v25 = vld [vmem:[#allocation5 + $0x18] sm:$0xff]  ;;  %s2556_s12 = sshll.u32 %s2636_s24, 4  ;;  %s2557_s12 = int_to_ptr.vmem [resolvable:$false] %s2556_s12 }
  0x93   : > { %2146 = vmatpush3.msra.mxu1 %v291_v4  ;;  %2202 = vmatpush3.msra.mxu0 %v1012_v6  ;;  %v2928_v12 = vld [vmem:[%s2876_s22 + $0x51] sm:$0xff]  ;;  %v2935_v14 = vld [vmem:[%s2876_s22 + $0x61] sm:$0xff]  ;;  %p2554_p2 = pnand %p2553_p8, %p3198_p4  ;;  %s2558_s11 = scalar_lea.vmem %s2557_s12, 1024 }
  0x94   : > { %2136 = vmatprep.mubr.msk.f32.mxu1 %vm302_vm0, %v2903_v5  ;;  %2192 = vmatprep.mubr.msk.f32.mxu0 %vm302_vm0, %v2909_v7  ;;  %v2938_v15 = vld [vmem:[%s2876_s22 + $0x32] sm:$0xff]  ;;  %v2952_v18 = vld [vmem:[%s2876_s22 + $0x42] sm:$0xff]  ;;  %p2559_p13 = scmp.lt.s32.totalorder %s3127_s20, %s2557_s12  ;;  %p2560_p0 = scmp.lt.s32.totalorder %s2558_s11, %s2552_s9 }
  0x95   : > { %2137 = vmatmul.mubr.msk.f32.gmra.mrb[2].mxu1 %vm302_vm0, %v2909_v7  ;;  %2215 = vmatprep.subr.mxu0 %v1160_v8  ;;  %v2947_v17 = vld [vmem:[%s2876_s22 + $0x71] sm:$0xff]  ;;  %v283_v19 = vld [vmem:[%s2876_s22] sm:$0xff]  ;;  %v2007_v44 = vld [vmem:[#allocation7] ss:$0 sm:$0xff]  ;;  %p2555_p11 = pneg %p2554_p2 }
  0x96   : > { %2193 = vmatmul.mubr.msk.f32.gmra.mrb[2].mxu0 %vm302_vm0, %v2914_v9  ;;  %2139 = vmatprep.mubr.msk.f32.mxu1 %vm302_vm0, %v2914_v9  ;;  %v2956_v20 = vld [vmem:[%s2876_s22 + $0x52] sm:$0xff]  ;;  %v2967_v22 = vld [vmem:[%s2876_s22 + $0x62] sm:$0xff]  ;;  %p2561_p12 = por %p2560_p0, %p2559_p13 }
  0x97   : > { %2203 = vmatprep.mubr.msk.f32.mxu0 %vm302_vm0, %v1943_v10  ;;  %2159 = vmatprep.subr.mxu1 %v570_v11  ;;  %v284_v21 = vld [vmem:[%s2876_s22 + $0x10] sm:$0xff]  ;;  %v285_v23 = vld [vmem:[%s2876_s22 + $0x20] sm:$0xff] }
  0x98   : > { %v2971_v24 = vld [vmem:[%s2876_s22 + $0x72] sm:$0xff]  ;;  %v2981_v27 = vld [vmem:[%s2876_s22 + $0x82] sm:$0xff]  ;;  %p2562_p3 = pnand %p2561_p12, %p2555_p11 }
  0x99   : > { %2140 = vmatmul.mubr.msk.f32.gmra.mrb[4].mxu1 %vm302_vm0, %v2928_v12  ;;  %v286_v26 = vld [vmem:[%s2876_s22 + $0x30] sm:$0xff]  ;;  %v287_v28 = vld [vmem:[%s2876_s22 + $0x40] sm:$0xff] }
  0x9a   : > { %2204 = vmatmul.mubr.msk.f32.vlgmr.msra.gmra.mrb[0].mxu0 %vm302_vm0, %v2932_v13  ;;  %2142 = vmatprep.mubr.msk.f32.mxu1 %vm302_vm0, %v2935_v14  ;;  %v288_v29 = vld [vmem:[%s2876_s22 + $0x50] sm:$0xff]  ;;  %v289_v30 = vld [vmem:[%s2876_s22 + $0x60] sm:$0xff] }
  0x9b   : > { %2216 = vmatpush3.msra.mxu0 %v1160_v8  ;;  %2206 = vmatprep.mubr.msk.f32.mxu0 %vm302_vm0, %v2938_v15  ;;  %v1454_v31 = vld [vmem:[#allocation5 + $0x40] sm:$0xff]  ;;  %v290_v32 = vld [vmem:[%s2876_s22 + $0x70] sm:$0xff] }
  0x9c   : > { %2229 = vmatprep.subr.mxu0 %v1307_v16  ;;  %v561_v33 = vld [vmem:[%s2876_s22 + $0x2] sm:$0xff]  ;;  %v1966_v35 = vld [vmem:[%s2876_s22 + $0x90] sm:$0xff] }
  0x9d   : > { %2143 = vmatmul.mubr.msk.f32.gmra.mrb[6].mxu1 %vm302_vm0, %v2947_v17  ;;  %v1965_v34 = vld [vmem:[%s2876_s22 + $0x80] sm:$0xff]  ;;  %v1982_v37 = vld [vmem:[%s2876_s22 + $0x91] sm:$0xff] }
  0x9e   : > { %2207 = vmatmul.mubr.msk.f32.gmra.mrb[2].mxu0 %vm302_vm0, %v2952_v18  ;;  %2147 = vmatprep.mubr.msk.f32.mxu1 %vm302_vm0, %v283_v19  ;;  %v1981_v36 = vld [vmem:[%s2876_s22 + $0x81] sm:$0xff]  ;;  %v1998_v38 = vld [vmem:[%s2876_s22 + $0x92] sm:$0xff] }
  0x9f   : > { %2209 = vmatprep.mubr.msk.f32.mxu0 %vm302_vm0, %v2956_v20 }
  0xa1   : > { %2148 = vmatmul.mubr.msk.f32.vlgmr.msra.gmra.mrb[0].mxu1 %vm302_vm0, %v284_v21 }
  0xa2   : > { %2210 = vmatmul.mubr.msk.f32.gmra.mrb[4].mxu0 %vm302_vm0, %v2967_v22  ;;  %2160 = vmatpush3.msra.mxu1 %v570_v11 }
  0xa3   : > { %2150 = vmatprep.mubr.msk.f32.mxu1 %vm302_vm0, %v285_v23  ;;  %2212 = vmatprep.mubr.msk.f32.mxu0 %vm302_vm0, %v2971_v24 }
  0xa4   : > { %2173 = vmatprep.subr.mxu1 %v718_v25 }
  0xa5   : > { %2151 = vmatmul.mubr.msk.f32.gmra.mrb[2].mxu1 %vm302_vm0, %v286_v26 }
  0xa6   : > { %2213 = vmatmul.mubr.msk.f32.gmra.mrb[6].mxu0 %vm302_vm0, %v2981_v27  ;;  %2153 = vmatprep.mubr.msk.f32.mxu1 %vm302_vm0, %v287_v28 }
  0xa7   : > { %2217 = vmatprep.mubr.msk.f32.mxu0 %vm302_vm0, %v285_v23 }
  0xa9   : > { %2154 = vmatmul.mubr.msk.f32.gmra.mrb[4].mxu1 %vm302_vm0, %v288_v29 }
  0xaa   : > { %2218 = vmatmul.mubr.msk.f32.vlgmr.msra.gmra.mrb[0].mxu0 %vm302_vm0, %v286_v26  ;;  %2156 = vmatprep.mubr.msk.f32.mxu1 %vm302_vm0, %v289_v30 }
  0xab   : > { %2230 = vmatpush3.msra.mxu0 %v1307_v16  ;;  %2220 = vmatprep.mubr.msk.f32.mxu0 %vm302_vm0, %v287_v28 }
  0xac   : > { %2243 = vmatprep.subr.mxu0 %v1454_v31 }
  0xad   : > { %2157 = vmatmul.mubr.msk.f32.gmra.mrb[6].mxu1 %vm302_vm0, %v290_v32 }
  0xae   : > { %2221 = vmatmul.mubr.msk.f32.gmra.mrb[2].mxu0 %vm302_vm0, %v288_v29  ;;  %2161 = vmatprep.mubr.msk.f32.mxu1 %vm302_vm0, %v561_v33 }
  0xaf   : > { %2223 = vmatprep.mubr.msk.f32.mxu0 %vm302_vm0, %v289_v30 }
  0xb1   : > { %2162 = vmatmul.mubr.msk.f32.vlgmr.msra.gmra.mrb[0].mxu1 %vm302_vm0, %v1943_v10 }
  0xb2   : > { %2224 = vmatmul.mubr.msk.f32.gmra.mrb[4].mxu0 %vm302_vm0, %v290_v32  ;;  %2174 = vmatpush3.msra.mxu1 %v718_v25 }
  0xb3   : > { %2164 = vmatprep.mubr.msk.f32.mxu1 %vm302_vm0, %v2932_v13  ;;  %2226 = vmatprep.mubr.msk.f32.mxu0 %vm302_vm0, %v1965_v34 }
  0xb4   : > { %2257 = vmatprep.subr.mxu1 %v2896_v1 }
  0xb5   : > { %2165 = vmatmul.mubr.msk.f32.gmra.mrb[2].mxu1 %vm302_vm0, %v2938_v15 }
  0xb6   : > { %2227 = vmatmul.mubr.msk.f32.gmra.mrb[6].mxu0 %vm302_vm0, %v1966_v35  ;;  %2167 = vmatprep.mubr.msk.f32.mxu1 %vm302_vm0, %v2952_v18 }
  0xb7   : > { %2231 = vmatprep.mubr.msk.f32.mxu0 %vm302_vm0, %v2903_v5 }
  0xb9   : > { %2168 = vmatmul.mubr.msk.f32.gmra.mrb[4].mxu1 %vm302_vm0, %v2956_v20 }
  0xba   : > { %2232 = vmatmul.mubr.msk.f32.vlgmr.msra.gmra.mrb[0].mxu0 %vm302_vm0, %v2909_v7  ;;  %2170 = vmatprep.mubr.msk.f32.mxu1 %vm302_vm0, %v2967_v22 }
  0xbb   : > { %2244 = vmatpush3.msra.mxu0 %v1454_v31  ;;  %2234 = vmatprep.mubr.msk.f32.mxu0 %vm302_vm0, %v2914_v9 }
  0xbd   : > { %2171 = vmatmul.mubr.msk.f32.gmra.mrb[6].mxu1 %vm302_vm0, %v2971_v24 }
  0xbe   : > { %2235 = vmatmul.mubr.msk.f32.gmra.mrb[2].mxu0 %vm302_vm0, %v2928_v12  ;;  %2175 = vmatprep.mubr.msk.f32.mxu1 %vm302_vm0, %v284_v21 }
  0xbf   : > { %2237 = vmatprep.mubr.msk.f32.mxu0 %vm302_vm0, %v2935_v14 }
  0xc1   : > { %2176 = vmatmul.mubr.msk.f32.vlgmr.msra.gmra.mrb[0].mxu1 %vm302_vm0, %v285_v23 }
  0xc2   : > { %2238 = vmatmul.mubr.msk.f32.gmra.mrb[4].mxu0 %vm302_vm0, %v2947_v17  ;;  %2258 = vmatpush3.msra.mxu1 %v2896_v1 }
  0xc3   : > { %2178 = vmatprep.mubr.msk.f32.mxu1 %vm302_vm0, %v286_v26  ;;  %2240 = vmatprep.mubr.msk.f32.mxu0 %vm302_vm0, %v1981_v36 }
  0xc5   : > { %2179 = vmatmul.mubr.msk.f32.gmra.mrb[2].mxu1 %vm302_vm0, %v287_v28 }
  0xc6   : > { %2241 = vmatmul.mubr.msk.f32.gmra.mrb[6].mxu0 %vm302_vm0, %v1982_v37  ;;  %2181 = vmatprep.mubr.msk.f32.mxu1 %vm302_vm0, %v288_v29 }
  0xc7   : > { %2245 = vmatprep.mubr.msk.f32.mxu0 %vm302_vm0, %v2932_v13 }
  0xc9   : > { %2182 = vmatmul.mubr.msk.f32.gmra.mrb[4].mxu1 %vm302_vm0, %v289_v30 }
  0xca   : > { %2246 = vmatmul.mubr.msk.f32.vlgmr.msra.gmra.mrb[0].mxu0 %vm302_vm0, %v2938_v15  ;;  %2184 = vmatprep.mubr.msk.f32.mxu1 %vm302_vm0, %v290_v32 }
  0xcb   : > { %2248 = vmatprep.mubr.msk.f32.mxu0 %vm302_vm0, %v2952_v18 }
  0xcd   : > { %2185 = vmatmul.mubr.msk.f32.gmra.mrb[6].mxu1 %vm302_vm0, %v1965_v34 }
  0xce   : > { %2249 = vmatmul.mubr.msk.f32.gmra.mrb[2].mxu0 %vm302_vm0, %v2956_v20  ;;  %2195 = vmatprep.mubr.msk.f32.mxu1 %vm302_vm0, %v2928_v12 }
  0xcf   : > { %2251 = vmatprep.mubr.msk.f32.mxu0 %vm302_vm0, %v2967_v22 }
  0xd1   : > { %2196 = vmatmul.mubr.msk.f32.vlgmr.msra.gmra.mrb[4].mxu1 %vm302_vm0, %v2935_v14 }
  0xd2   : > { %2252 = vmatmul.mubr.msk.f32.gmra.mrb[4].mxu0 %vm302_vm0, %v2971_v24  ;;  %2198 = vmatprep.mubr.msk.f32.mxu1 %vm302_vm0, %v2947_v17 }
  0xd3   : > { %2254 = vmatprep.mubr.msk.f32.mxu0 %vm302_vm0, %v2981_v27 }
  0xd5   : > { %2199 = vmatmul.mubr.msk.f32.gmra.mrb[6].mxu1 %vm302_vm0, %v1981_v36 }
  0xd6   : > { %2255 = vmatmul.mubr.msk.f32.gmra.mrb[6].mxu0 %vm302_vm0, %v1998_v38 }
 0x194   : > { %v2177_v39 = vpop.f32.mrb[0].mxu1 }
 0x195   : > { %v809_v40 = vpop.f32.mrb[1].mxu1 }
 0x198   : > { %v2180_v41 = vpop.f32.mrb[2].mxu1 }
 0x199   : > { %v819_v42 = vpop.f32.mrb[3].mxu1 }
 0x19d   : > { %v2247_v43 = vpop.f32.mrb[0].mxu0 }
 0x19e   : > { %v2259_v45 = vadd.f32 %v2247_v43, %v2177_v39  ;;  %v1545_v46 = vpop.f32.mrb[1].mxu0 }
 0x19f   : > { %v2260_v47 = vadd.f32 %v1545_v46, %v809_v40 }
 0x1a0   : > { %v3068_v48 = vadd.f32 %v2259_v45, %v2007_v44 }
 0x1a1   : > { %v3070_v49 = vadd.f32 %v2260_v47, %v2007_v44  ;;  %v2250_v50 = vpop.f32.mrb[2].mxu0 }
 0x1a2   : > { %v1608_v51 = vmin.f32 %v3068_v48, 20.0  ;;  %v2261_v52 = vadd.f32 %v2250_v50, %v2180_v41  ;;  %v1555_v53 = vpop.f32.mrb[3].mxu0  ;;  %v2032_v50 = vld [vmem:[%s2890_s13] sm:$0xff]  }
 0x1a3   : > { %v1607_v54 = vmin.f32 %v3070_v49, 20.0  ;;  %v2262_v55 = vadd.f32 %v1555_v53, %v819_v42 }
 0x1a4   : > { %v1617_v56 = vmul.f32 1.442695, %v1608_v51  ;;  %v3074_v57 = vadd.f32 %v2261_v52, %v2007_v44  ;;  %v2197_v58 = vpop.f32.mrb[4].mxu1 }
 0x1a5   : > { %v1615_v59 = vmul.f32 1.442695, %v1607_v54  ;;  %v3076_v60 = vadd.f32 %v2262_v55, %v2007_v44  ;;  %v2253_v61 = vpop.f32.mrb[4].mxu0  ;;  %v976_v62 = vpop.f32.mrb[5].mxu1 }
 0x1a6   : > { %2404 = vpow2.f32 %v1617_v56  ;;  %v1610_v63 = vmin.f32 %v3074_v57, 20.0  ;;  %v2263_v0 = vadd.f32 %v2253_v61, %v2197_v58  ;;  %v1565_v1 = vpop.f32.mrb[5].mxu0  ;;  %v2034_v58 = vunpack.c.h.bf16 %v2032_v50 }
 0x1a7   : > { %2406 = vpow2.f32 %v1615_v59  ;;  %v1609_v2 = vmin.f32 %v3076_v60, 20.0  ;;  %v2264_v3 = vadd.f32 %v1565_v1, %v976_v62 }
 0x1a8   : > { %v1621_v4 = vmul.f32 1.442695, %v1610_v63  ;;  %v3080_v5 = vadd.f32 %v2263_v0, %v2007_v44  ;;  %v2200_v6 = vpop.f32.mrb[6].mxu1  ;;  %v2033_v63 = vunpack.c.l.bf16 %v2032_v50  ;;  %v2047_v0 = vld [vmem:[%s2890_s13 + $0x8] sm:$0xff]  }
 0x1a9   : > { %v1619_v7 = vmul.f32 1.442695, %v1609_v2  ;;  %v3082_v8 = vadd.f32 %v2264_v3, %v2007_v44  ;;  %v2256_v9 = vpop.f32.mrb[6].mxu0  ;;  %v986_v10 = vpop.f32.mrb[7].mxu1 }
 0x1aa   : > { %2408 = vpow2.f32 %v1621_v4  ;;  %v1612_v11 = vmin.f32 %v3080_v5, 20.0  ;;  %v2265_v12 = vadd.f32 %v2256_v9, %v2200_v6  ;;  %v1575_v13 = vpop.f32.mrb[7].mxu0 }
 0x1ab   : > { %2410 = vpow2.f32 %v1619_v7  ;;  %v1611_v14 = vmin.f32 %v3082_v8, 20.0  ;;  %v2266_v15 = vadd.f32 %v1575_v13, %v986_v10  ;;  %v2048_v13 = vld [vmem:[%s2890_s13 + $0x10] sm:$0xff]  }
 0x1ac   : > { %v1625_v16 = vmul.f32 1.442695, %v1612_v11  ;;  %v3086_v17 = vadd.f32 %v2265_v12, %v2007_v44  ;;  %v2037_v12 = vunpack.c.l.bf16 %v2047_v0 }
 0x1ad   : > { %v1623_v18 = vmul.f32 1.442695, %v1611_v14  ;;  %v3088_v19 = vadd.f32 %v2266_v15, %v2007_v44 }
 0x1ae   : > { %2412 = vpow2.f32 %v1625_v16  ;;  %v1614_v20 = vmin.f32 %v3086_v17, 20.0 }
 0x1af   : > { %2414 = vpow2.f32 %v1623_v18  ;;  %v1613_v21 = vmin.f32 %v3088_v19, 20.0 }
 0x1b0   : > { %v2405_v22 = vpop.eup %2404  ;;  %v1629_v23 = vmul.f32 1.442695, %v1614_v20 }
 0x1b1   : > { %v2407_v24 = vpop.eup %2406  ;;  %v1632_v25 = vadd.f32 2.0, %v2405_v22  ;;  %v1627_v26 = vmul.f32 1.442695, %v1613_v21 }
 0x1b2   : > { %v1631_v27 = vadd.f32 2.0, %v2407_v24  ;;  %2416 = vpow2.f32 %v1629_v23 }
 0x1b3   : > { %v1640_v28 = vmul.f32 %v2405_v22, %v1632_v25  ;;  %2418 = vpow2.f32 %v1627_v26  ;;  %v2041_v25 = vunpack.c.l.bf16 %v2048_v13  ;;  %v2049_v26 = vld [vmem:[%s2890_s13 + $0x18] sm:$0xff]  }
 0x1b4   : > { %v2409_v29 = vpop.eup %2408  ;;  %v1639_v30 = vmul.f32 %v2407_v24, %v1631_v27 }
 0x1b5   : > { %v2411_v31 = vpop.eup %2410  ;;  %v1656_v32 = vadd.f32 2.0, %v1640_v28  ;;  %v1634_v33 = vadd.f32 2.0, %v2409_v29  ;;  %v1648_v56 = vmul.f32 %v1640_v28, %v3068_v48  ;;  %v2038_v48 = vunpack.c.h.bf16 %v2047_v0 }
 0x1b6   : > { %v1655_v34 = vadd.f32 2.0, %v1639_v30  ;;  %v1633_v35 = vadd.f32 2.0, %v2411_v31  ;;  %v1647_v62 = vmul.f32 %v1639_v30, %v3070_v49 }
 0x1b7   : > { %2420 = vrcp.f32 %v1656_v32  ;;  %v1642_v36 = vmul.f32 %v2409_v29, %v1634_v33  ;;  %v2046_v33 = vunpack.c.h.bf16 %v2049_v26 }
 0x1b8   : > { %v2413_v37 = vpop.eup %2412  ;;  %2422 = vrcp.f32 %v1655_v34  ;;  %v1641_v38 = vmul.f32 %v2411_v31, %v1633_v35 }
 0x1b9   : > { %v2415_v39 = vpop.eup %2414  ;;  %v1658_v40 = vadd.f32 2.0, %v1642_v36  ;;  %v1636_v41 = vadd.f32 2.0, %v2413_v37  ;;  %v1650_v9 = vmul.f32 %v1642_v36, %v3074_v57  ;;  %v2045_v36 = vunpack.c.l.bf16 %v2049_v26 }
 0x1ba   : > { %v1657_v42 = vadd.f32 2.0, %v1641_v38  ;;  %v1635_v43 = vadd.f32 2.0, %v2415_v39  ;;  %v1649_v49 = vmul.f32 %v1641_v38, %v3076_v60  ;;  %v2042_v60 = vunpack.c.h.bf16 %v2048_v13 }
 0x1bb   : > { %2424 = vrcp.f32 %v1658_v40  ;;  %v1644_v44 = vmul.f32 %v2413_v37, %v1636_v41 }
 0x1bc   : > { %v2417_v45 = vpop.eup %2416  ;;  %2426 = vrcp.f32 %v1657_v42  ;;  %v1643_v46 = vmul.f32 %v2415_v39, %v1635_v43 }
 0x1bd   : > { %v2419_v47 = vpop.eup %2418  ;;  %v1660_v51 = vadd.f32 2.0, %v1644_v44  ;;  %v1638_v52 = vadd.f32 2.0, %v2417_v45  ;;  %v1652_v21 = vmul.f32 %v1644_v44, %v3080_v5 }
 0x1be   : > { %v1659_v53 = vadd.f32 2.0, %v1643_v46  ;;  %v1637_v54 = vadd.f32 2.0, %v2419_v47  ;;  %v1651_v24 = vmul.f32 %v1643_v46, %v3082_v8 }
 0x1bf   : > { %2428 = vrcp.f32 %v1660_v51  ;;  %v1646_v55 = vmul.f32 %v2417_v45, %v1638_v52 }
 0x1c0   : > { %2430 = vrcp.f32 %v1659_v53  ;;  %v1645_v59 = vmul.f32 %v2419_v47, %v1637_v54 }
 0x1c1   : > { %v2421_v61 = vpop.eup %2420  ;;  %v1662_v1 = vadd.f32 2.0, %v1646_v55  ;;  %v1654_v32 = vmul.f32 %v1646_v55, %v3086_v17 }
 0x1c2   : > { %v2423_v2 = vpop.eup %2422  ;;  %v1672_v3 = vmul.f32 %v2421_v61, %v1648_v56  ;;  %v1661_v4 = vadd.f32 2.0, %v1645_v59  ;;  %v1653_v35 = vmul.f32 %v1645_v59, %v3088_v19 }
 0x1c3   : > { %v1671_v6 = vmul.f32 %v2423_v2, %v1647_v62  ;;  %2432 = vrcp.f32 %v1662_v1 }
 0x1c4   : > { %v1696_v7 = vadd.f32 %v2034_v58, %v1672_v3  ;;  %2434 = vrcp.f32 %v1661_v4 }
 0x1c5   : > { %v2425_v10 = vpop.eup %2424  ;;  %v1695_v11 = vadd.f32 %v2033_v63, %v1671_v6 }
 0x1c6   : > { %v2427_v14 = vpop.eup %2426  ;;  %v2023_v15 = vpack.c.bf16 %v1696_v7, %v1696_v7  ;;  %v1674_v16 = vmul.f32 %v2425_v10, %v1650_v9 }
 0x1c7   : > { %v2022_v18 = vpack.c.bf16 %v1695_v11, %v1695_v11  ;;  %v1673_v20 = vmul.f32 %v2427_v14, %v1649_v49 }
 0x1c8   : > { %1737 = vst.msk [vmem:[%s3101_s26 + $0x4] sm:$0xf] %vm1735_vm1, %v2023_v15  ;;  %v1698_v57 = vadd.f32 %v2038_v48, %v1674_v16 }
 0x1c9   : > { %v2429_v22 = vpop.eup %2428  ;;  %1736 = vst.msk [vmem:[%s3101_s26] sm:$0xf] %vm1735_vm1, %v2022_v18  ;;  %v1697_v23 = vadd.f32 %v2037_v12, %v1673_v20 }
 0x1ca   : > { %v2431_v27 = vpop.eup %2430  ;;  %v2025_v28 = vpack.c.bf16 %v1698_v57, %v1698_v57  ;;  %v1676_v29 = vmul.f32 %v2429_v22, %v1652_v21 }
 0x1cb   : > { %v2024_v30 = vpack.c.bf16 %v1697_v23, %v1697_v23  ;;  %v1675_v31 = vmul.f32 %v2431_v27, %v1651_v24 }
 0x1cc   : > { %1739 = vst.msk [vmem:[%s3101_s26 + $0xc] sm:$0xf] %vm1735_vm1, %v2025_v28  ;;  %v1700_v5 = vadd.f32 %v2042_v60, %v1676_v29 }
 0x1cd   : > { %v2433_v34 = vpop.eup %2432  ;;  %1738 = vst.msk [vmem:[%s3101_s26 + $0x8] sm:$0xf] %vm1735_vm1, %v2024_v30  ;;  %v1699_v8 = vadd.f32 %v2041_v25, %v1675_v31 }
 0x1ce   : > { %v2435_v37 = vpop.eup %2434  ;;  %v2027_v38 = vpack.c.bf16 %v1700_v5, %v1700_v5  ;;  %v1678_v39 = vmul.f32 %v2433_v34, %v1654_v32 }
 0x1cf   : > { %v2026_v40 = vpack.c.bf16 %v1699_v8, %v1699_v8  ;;  %v1677_v41 = vmul.f32 %v2435_v37, %v1653_v35 }
 0x1d0   : > { %1741 = vst.msk [vmem:[%s3101_s26 + $0x14] sm:$0xf] %vm1735_vm1, %v2027_v38  ;;  %v1702_v17 = vadd.f32 %v2046_v33, %v1678_v39 }
 0x1d1   : > { %1740 = vst.msk [vmem:[%s3101_s26 + $0x10] sm:$0xf] %vm1735_vm1, %v2026_v40  ;;  %v1701_v42 = vadd.f32 %v2045_v36, %v1677_v41 }
 0x1d2   : > { %v2029_v43 = vpack.c.bf16 %v1702_v17, %v1702_v17 }
 0x1d3   : > { %v2028_v19 = vpack.c.bf16 %v1701_v42, %v1701_v42 }
 0x1d4   : > { %1743 = vst.msk [vmem:[%s3101_s26 + $0x1c] sm:$0xf] %vm1735_vm1, %v2029_v43 }
 0x1d5   : > { %1742 = vst.msk [vmem:[%s3101_s26 + $0x18] sm:$0xf] %vm1735_vm1, %v2028_v19 }
 0x1d6   : > { %2565 = shalt.err (!%p2562_p3)
}
 0x1d7   : > { %s2566_s7 = scalar_lea.hbm %s3125_s5, 512  ;;  %s2570_s22 = scalar_lea.hbm %s3179_s4, 1024 }
 0x1d8   : > { %p2567_p9 = scmp.ne.s32.totalorder %s3125_s5, %s2566_s7  ;;  %p2571_p7 = scmp.lt.u32.totalorder %s3125_s5, %s3179_s4 }
 0x1d9   : > { %p2572_p5 = scmp.lt.u32.totalorder %s2570_s22, %s2566_s7  ;;  %p2574_p8 = scmp.lt.u32.totalorder %s2566_s7, %s3125_s5 }
 0x1da   : > { %p2568_p10 = pnand %p2567_p9, %p3198_p4 }
 0x1db   : > { %p2573_p1 = por %p2572_p5, %p2571_p7 }
 0x1dc   : > { %p2569_p6 = pneg %p2568_p10 }
 0x1dd   : > { %p2575_p2 = por %p2574_p8, %p2573_p1 }
 0x1df   : > { %p2576_p11 = pnand %p2575_p2, %p2569_p6 }
 0x1e1   : > { %2579 = shalt.err (!%p2576_p11)
}
 0x1e2   : > { %s2637_s13 = smov 64   ;;  %s2638_s26 = smov 4  }
 0x1e3   : > { %2338 = dma.vmem_to_hbm [thread:$0]  (%p3198_p4), %s3127_s20, 512, %s3125_s5, %s1745_s19, %s2637_s13, %s2637_s13, %s2638_s26  }
 0x1e4 PF: > { %s1773_s14 = sand.u32 1, %s2614_s15   ;;  %p3199_p13 = scmp.ne.s32.totalorder %s3188_s28, 0 }
 0x1e5   : > { %p3200_p0 = scmp.ge.s32.totalorder %s2626_s18, 2  ;;  %s1774_s8 = scalar_lea.sflag [#allocation4], %s1773_s14 }
 0x1e7   : > { %p2355_p12 = pnand %p3200_p0, %p3199_p13 }
 0x1e9   : > { %2609 = dma.done.wait (!%p2355_p12), %s1774_s8, 512  }
 0x1ea   : > { %2611 = vsyncadd (!%p2355_p12), %s1774_s8, 4294966784  ;;  %s3201_s25 = sld [smem:[#allocation15_spill]]  ;;  %p21_p3 = scmp.ge.s32.totalorder %s2689_s21, 4  }
 0x1eb   : > { %s3202_s15 = smov %s2618_s16  ;;  %s3203_s16 = smov %s2622_s17 }
 0x1ec   : > { %s3205_s18 = smov %s2689_s21  ;;  %23 = sbr.rel (!%p21_p3) target bundleno = 8 (0x8), region = 112 }
 0x1f0   : > { %s3204_s17 = smov %s3201_s25 }
 0x1f3   :  { %1779 = vsyncpa [#allocation3], 1 }
 0x1f4   :  { %1781 = vsyncpa [#allocation3 + $0x1], 1 }
 0x1f5   :  { %1782 = vsyncpa [#allocation6], 1 }
 0x1f6   :  { %1783 = vsyncpa [#allocation9], 1 }
 0x1f7   :  { %1785 = vsyncpa [#allocation9 + $0x1], 1 }
 0x1f8   :  { %1786 = vsyncpa [#allocation4], 1 }
 0x1f9   :  { %1788 = vsyncpa [#allocation4 + $0x1], 1 }

</bundles_post_ra>
